<compile_context>
chip_gen: v5e
topology: v5e:2x2
jax: 0.10.0
libtpu: 0.0.40
codegen_flags: <defaults>
</compile_context>

<pallas_src>
import functools

import jax
import jax.numpy as jnp
from jax import lax
from jax.experimental import pallas as pl
from jax.experimental.pallas import tpu as pltpu


_VMEM_LIMIT_BYTES = 32 * 1024 * 1024  # safe headroom on v5e/v6e/v7x


def _tile(dim, quantum, prefs):
    """Largest preferred tile that divides `dim` and respects the (8,128)
    tiling quantum; falls back to the full dimension (always legal)."""
    for t in prefs:
        if t % quantum == 0 and dim % t == 0:
            return t
    return dim


# ---------------------------------------------------------------------------
# Fused, tiled linear:   out = act(LN?(x) @ w + b) + residual
# ---------------------------------------------------------------------------
def _make_linear_kernel(has_ln, has_bias, has_residual, activation):
    def kernel(*refs):
        x_ref, w_ref = refs[0], refs[1]
        idx = 2
        g_ref = be_ref = b_ref = r_ref = None
        if has_ln:
            g_ref, be_ref = refs[idx], refs[idx + 1]
            idx += 2
        if has_bias:
            b_ref = refs[idx]
            idx += 1
        if has_residual:
            r_ref = refs[idx]
            idx += 1
        o_ref, acc_ref = refs[idx], refs[idx + 1]

        @pl.when(pl.program_id(2) == 0)
        def _():
            acc_ref[...] = jnp.zeros_like(acc_ref)

        x = x_ref[...]
        if has_ln:
            # LayerNorm prologue (full-K block), computed in f32.
            xf = x.astype(jnp.float32)
            mu = jnp.mean(xf, axis=-1, keepdims=True)
            xc = xf - mu
            var = jnp.mean(xc * xc, axis=-1, keepdims=True)
            xf = xc * lax.rsqrt(var + 1e-5) * g_ref[...] + be_ref[...]
            x = xf.astype(w_ref.dtype)
        acc_ref[...] += jnp.dot(x, w_ref[...], preferred_element_type=jnp.float32)

        @pl.when(pl.program_id(2) == pl.num_programs(2) - 1)
        def _():
            y = acc_ref[...]
            if has_bias:
                y = y + b_ref[...].astype(jnp.float32)
            if activation == "relu":
                y = jnp.maximum(y, 0.0)
            elif activation == "quickgelu":
                y = y * jax.nn.sigmoid(1.702 * y)
            if has_residual:
                y = y + r_ref[...].astype(jnp.float32)
            o_ref[...] = y.astype(o_ref.dtype)

    return kernel


def pallas_linear(x, w, b=None, *, ln=None, activation=None, residual=None,
                  out_dtype=None):
    """x: [..., K] @ w: [K, N] with fused LN prologue / bias / activation /
    residual epilogue.  Tiled over (M, N) with a K-reduction grid axis."""
    lead = x.shape[:-1]
    K = x.shape[-1]
    N = w.shape[-1]
    x2 = x.reshape(-1, K)
    M = x2.shape[0]
    out_dtype = out_dtype or x.dtype

    tm = _tile(M, 8, (256, 128, 64, 32, 16, 8))
    tn = _tile(N, 128, (512, 256, 128))
    # LN prologue needs the full K row to compute mean/var.
    tk = K if ln is not None else _tile(K, 128, (512, 256, 128))

    in_specs = [pl.BlockSpec((tm, tk), lambda i, j, k: (i, k)),
                pl.BlockSpec((tk, tn), lambda i, j, k: (k, j))]
    args = [x2, w]
    if ln is not None:
        gamma, beta = ln
        in_specs += [pl.BlockSpec((1, K), lambda i, j, k: (0, 0)),
                     pl.BlockSpec((1, K), lambda i, j, k: (0, 0))]
        args += [gamma.reshape(1, K).astype(jnp.float32),
                 beta.reshape(1, K).astype(jnp.float32)]
    if b is not None:
        in_specs.append(pl.BlockSpec((1, tn), lambda i, j, k: (0, j)))
        args.append(b.reshape(1, N).astype(jnp.float32))
    if residual is not None:
        in_specs.append(pl.BlockSpec((tm, tn), lambda i, j, k: (i, j)))
        args.append(residual.reshape(-1, N))

    kern = _make_linear_kernel(ln is not None, b is not None,
                               residual is not None, activation)
    out = pl.pallas_call(
        kern,
        out_shape=jax.ShapeDtypeStruct((M, N), out_dtype),
        grid_spec=pltpu.PrefetchScalarGridSpec(
            num_scalar_prefetch=0,
            grid=(M // tm, N // tn, K // tk),
            in_specs=in_specs,
            out_specs=pl.BlockSpec((tm, tn), lambda i, j, k: (i, j)),
            scratch_shapes=[pltpu.VMEM((tm, tn), jnp.float32)]),
        compiler_params=pltpu.CompilerParams(
            dimension_semantics=("parallel", "parallel", "arbitrary"),
            vmem_limit_bytes=_VMEM_LIMIT_BYTES),
    )(*args)
    return out.reshape(*lead, N)


def pallas_head_proj(x_heads, w_heads, b, residual):
    """Attention output projection reading head-major input directly.

    x_heads: [H, M, Dh], w_heads: [H, Dh, N], residual: [M, N].
    Computes sum_h x_heads[h] @ w_heads[h] + b + residual, with the head axis
    as the K-reduction grid axis (no head-merge transpose needed in XLA)."""
    H, M, Dh = x_heads.shape
    N = w_heads.shape[-1]
    tm = _tile(M, 8, (256, 128, 64, 32, 16, 8))
    tn = _tile(N, 128, (512, 256, 128))
    kern = _make_linear_kernel(False, True, True, None)
    return pl.pallas_call(
        kern,
        out_shape=jax.ShapeDtypeStruct((M, N), residual.dtype),
        grid_spec=pltpu.PrefetchScalarGridSpec(
            num_scalar_prefetch=0,
            grid=(M // tm, N // tn, H),
            in_specs=[pl.BlockSpec((None, tm, Dh), lambda i, j, h: (h, i, 0)),
                      pl.BlockSpec((None, Dh, tn), lambda i, j, h: (h, 0, j)),
                      pl.BlockSpec((1, tn), lambda i, j, h: (0, j)),
                      pl.BlockSpec((tm, tn), lambda i, j, h: (i, j))],
            out_specs=pl.BlockSpec((tm, tn), lambda i, j, h: (i, j)),
            scratch_shapes=[pltpu.VMEM((tm, tn), jnp.float32)]),
        compiler_params=pltpu.CompilerParams(
            dimension_semantics=("parallel", "parallel", "arbitrary"),
            vmem_limit_bytes=_VMEM_LIMIT_BYTES),
    )(x_heads, w_heads, b.reshape(1, N).astype(jnp.float32), residual)


# ---------------------------------------------------------------------------
# Standalone row-tiled LayerNorm (ln_pre / ln_post / ln_final)
# ---------------------------------------------------------------------------
def _ln_kernel(x_ref, g_ref, b_ref, o_ref):
    x = x_ref[...].astype(jnp.float32)
    mu = jnp.mean(x, axis=-1, keepdims=True)
    xc = x - mu
    var = jnp.mean(xc * xc, axis=-1, keepdims=True)
    y = xc * lax.rsqrt(var + 1e-5) * g_ref[...] + b_ref[...]
    o_ref[...] = y.astype(o_ref.dtype)


def pallas_layernorm(x, g, b):
    lead = x.shape[:-1]
    D = x.shape[-1]
    x2 = x.reshape(-1, D)
    M = x2.shape[0]
    tm = _tile(M, 8, (512, 256, 128, 64, 32, 16, 8))
    out = pl.pallas_call(
        _ln_kernel,
        out_shape=jax.ShapeDtypeStruct((M, D), x.dtype),
        grid_spec=pltpu.PrefetchScalarGridSpec(
            num_scalar_prefetch=0,
            grid=(M // tm,),
            in_specs=[pl.BlockSpec((tm, D), lambda i: (i, 0)),
                      pl.BlockSpec((1, D), lambda i: (0, 0)),
                      pl.BlockSpec((1, D), lambda i: (0, 0))],
            out_specs=pl.BlockSpec((tm, D), lambda i: (i, 0))),
        compiler_params=pltpu.CompilerParams(
            dimension_semantics=("parallel",)),
    )(x2, g.reshape(1, D).astype(jnp.float32), b.reshape(1, D).astype(jnp.float32))
    return out.reshape(*lead, D)


# ---------------------------------------------------------------------------
# Flash attention (online softmax, no SxS score materialization)
# ---------------------------------------------------------------------------
def _flash_attn_kernel(q_ref, k_ref, v_ref, o_ref, m_ref, l_ref, acc_ref,
                       *, scale, causal):
    ki = pl.program_id(2)

    @pl.when(ki == 0)
    def _():
        m_ref[...] = jnp.full_like(m_ref, -jnp.inf)
        l_ref[...] = jnp.zeros_like(l_ref)
        acc_ref[...] = jnp.zeros_like(acc_ref)

    q = q_ref[...] * scale                       # scale folded into q (bf16)
    s = lax.dot_general(q, k_ref[...], (((1,), (1,)), ((), ())),
                        preferred_element_type=jnp.float32)   # [tq, tkv]

    if causal:
        tq, tkv = s.shape
        qi = pl.program_id(1)
        row = qi * tq + lax.broadcasted_iota(jnp.int32, (tq, tkv), 0)
        col = ki * tkv + lax.broadcasted_iota(jnp.int32, (tq, tkv), 1)
        s = jnp.where(col <= row, s, jnp.float32(-1e30))

    m_prev = m_ref[...]
    m_new = jnp.maximum(m_prev, jnp.max(s, axis=-1, keepdims=True))
    alpha = jnp.exp(m_prev - m_new)
    p = jnp.exp(s - m_new)
    l_ref[...] = alpha * l_ref[...] + jnp.sum(p, axis=-1, keepdims=True)
    acc_ref[...] = alpha * acc_ref[...] + jnp.dot(
        p.astype(v_ref.dtype), v_ref[...], preferred_element_type=jnp.float32)
    m_ref[...] = m_new

    @pl.when(ki == pl.num_programs(2) - 1)
    def _():
        o_ref[...] = (acc_ref[...] *
                      pl.reciprocal(l_ref[...], approx=True)).astype(o_ref.dtype)


def pallas_flash_attention(q, k, v, *, causal):
    """q, k, v: [B*H, S, Dh] (bf16) -> [B*H, S, Dh]."""
    BH, S, Dh = q.shape
    tq = _tile(S, 8, (256, 128))
    tkv = _tile(S, 8, (512, 256, 128))
    scale = 1.0 / (Dh ** 0.5)
    kern = functools.partial(_flash_attn_kernel, scale=scale, causal=causal)
    return pl.pallas_call(
        kern,
        out_shape=jax.ShapeDtypeStruct((BH, S, Dh), q.dtype),
        grid_spec=pltpu.PrefetchScalarGridSpec(
            num_scalar_prefetch=0,
            grid=(BH, S // tq, S // tkv),
            in_specs=[pl.BlockSpec((None, tq, Dh), lambda b, qi, ki: (b, qi, 0)),
                      pl.BlockSpec((None, tkv, Dh), lambda b, qi, ki: (b, ki, 0)),
                      pl.BlockSpec((None, tkv, Dh), lambda b, qi, ki: (b, ki, 0))],
            out_specs=pl.BlockSpec((None, tq, Dh), lambda b, qi, ki: (b, qi, 0)),
            scratch_shapes=[pltpu.VMEM((tq, 1), jnp.float32),
                            pltpu.VMEM((tq, 1), jnp.float32),
                            pltpu.VMEM((tq, Dh), jnp.float32)]),
        compiler_params=pltpu.CompilerParams(
            dimension_semantics=("parallel", "parallel", "arbitrary"),
            vmem_limit_bytes=_VMEM_LIMIT_BYTES),
    )(q, k, v)


# ---------------------------------------------------------------------------
# PACL head: patch similarity -> softmax over patches -> weighted sum ->
# pairwise cosine similarity.
# ---------------------------------------------------------------------------
def _pacl_head_kernel(v_ref, t_ref, o_ref):
    v = v_ref[...]          # [B, P, D] f32
    t = t_ref[...]          # [B, D]    f32
    # TODO(synk): express the per-batch matvecs below as MXU matmuls and pad
    # the [B_img, B_text] output to 128 lanes once batch sizes grow.
    sim = jnp.sum(v * t[:, None, :], axis=-1)            # [B, P]
    m = jnp.max(sim, axis=1, keepdims=True)
    e = jnp.exp(sim - m)
    wts = e / jnp.sum(e, axis=1, keepdims=True)           # softmax over patches
    wv = jnp.sum(v * wts[:, :, None], axis=1)              # [B, D]
    eps = 1e-8
    wv_hat = wv / jnp.maximum(jnp.sqrt(jnp.sum(wv * wv, -1, keepdims=True)), eps)
    t_hat = t / jnp.maximum(jnp.sqrt(jnp.sum(t * t, -1, keepdims=True)), eps)
    o_ref[...] = jnp.einsum("id,jd->ij", wv_hat, t_hat,
                            preferred_element_type=jnp.float32)


def pallas_pacl_head(patch_shared, text_emb):
    B = patch_shared.shape[0]
    vmem = pl.BlockSpec(memory_space=pltpu.MemorySpace.VMEM)
    return pl.pallas_call(
        _pacl_head_kernel,
        out_shape=jax.ShapeDtypeStruct((B, text_emb.shape[0]), jnp.float32),
        in_specs=[vmem, vmem],
        out_specs=vmem,
    )(patch_shared.astype(jnp.float32), text_emb.astype(jnp.float32))


# ---------------------------------------------------------------------------
# Transformer / CLIP glue (plain JAX only for reshapes, gather, concat)
# ---------------------------------------------------------------------------
def residual_attention_block(x, p, *, n_heads, causal):
    B, S, D = x.shape
    dh = D // n_heads

    # Attention: LN1 fused as QKV prologue; QKV stays packed; one transpose to
    # head-major; out-proj reduces over heads and fuses the residual add.
    qkv = pallas_linear(x, p["w_qkv"], p["b_qkv"], ln=(p["ln1_g"], p["ln1_b"]))
    qkv_h = (qkv.reshape(B, S, 3, n_heads, dh)
                .transpose(2, 3, 0, 1, 4)
                .reshape(3, n_heads * B, S, dh))
    o = pallas_flash_attention(qkv_h[0], qkv_h[1], qkv_h[2], causal=causal)
    x = pallas_head_proj(o.reshape(n_heads, B * S, dh),
                         p["w_out"].reshape(n_heads, dh, D),
                         p["b_out"],
                         residual=x.reshape(B * S, D)).reshape(B, S, D)

    # MLP: LN2 fused as fc prologue, QuickGELU fused in fc epilogue, residual
    # add fused in proj epilogue.
    h = pallas_linear(x, p["w_fc"], p["b_fc"], ln=(p["ln2_g"], p["ln2_b"]),
                      activation="quickgelu")
    x = pallas_linear(h, p["w_proj"], p["b_proj"], residual=x)
    return x


def vision_encoder(images, vp, cfg):
    """VisionTransformerWrapper forward (returns patch embeddings, no CLS)."""
    B, C, H, W = images.shape
    p = cfg["patch"]
    gh, gw = H // p, W // p
    width = cfg["vision_width"]
    # TODO(synk): for large images, DMA strided NCHW patch tiles inside the
    # conv matmul kernel instead of this XLA 6-D reshape/transpose.
    patches = (images.reshape(B, C, gh, p, gw, p)
               .transpose(0, 2, 4, 1, 3, 5)
               .reshape(B, gh * gw, C * p * p)).astype(jnp.bfloat16)
    x = pallas_linear(patches, vp["conv_w"])                   # conv1, no bias
    cls = jnp.broadcast_to(vp["class_embedding"][None, None, :],
                           (B, 1, width)).astype(x.dtype)
    x = jnp.concatenate([cls, x], axis=1)
    x = x + vp["pos_embed"][None].astype(x.dtype)
    x = pallas_layernorm(x, vp["ln_pre_g"], vp["ln_pre_b"])
    for blk in vp["blocks"]:
        x = residual_attention_block(x, blk, n_heads=cfg["vision_heads"],
                                     causal=False)
    x = pallas_layernorm(x[:, 1:, :], vp["ln_post_g"], vp["ln_post_b"])
    return x  # [B, n_patches, vision_width]


def encode_text(tokens, tp, cfg):
    x = tp["token_embedding"][tokens]             # gather stays in plain JAX
    x = x + tp["pos_embed"][None].astype(x.dtype)
    for blk in tp["blocks"]:
        x = residual_attention_block(x, blk, n_heads=cfg["text_heads"],
                                     causal=True)
    x = pallas_layernorm(x, tp["ln_final_g"], tp["ln_final_b"])
    eot = jnp.argmax(tokens, axis=-1)
    feat = x[jnp.arange(tokens.shape[0]), eot]    # [B, D]
    return pallas_linear(feat, tp["text_projection"], out_dtype=jnp.float32)


def pallas_vision_embedder(x, ep):
    # PACLVisionEmbedder: (Linear -> ReLU -> Linear) + residual Linear
    h = pallas_linear(x, ep["w1"], ep["b1"], activation="relu")
    main = pallas_linear(h, ep["w2"], ep["b2"])
    return pallas_linear(x, ep["wr"], ep["br"], residual=main,
                         out_dtype=jnp.float32)


def pacl_clip_forward(params, images, text_tokens, cfg):
    patch_embeddings = vision_encoder(images, params["visual"], cfg)
    patch_shared = pallas_vision_embedder(patch_embeddings, params["embedder"])
    text_embeddings = encode_text(text_tokens, params["text"], cfg)
    return pallas_pacl_head(patch_shared, text_embeddings)   # [B_img, B_text]


# ---------------------------------------------------------------------------
# Deterministic synthetic parameters (weights bf16, biases/LN params f32)
# ---------------------------------------------------------------------------
def _init(key, shape, scale=0.02, dtype=jnp.bfloat16):
    return (scale * jax.random.normal(key, shape, jnp.float32)).astype(dtype)


def _init_block(key, width):
    ks = jax.random.split(key, 4)
    f32 = jnp.float32
    return dict(
        ln1_g=jnp.ones((width,), f32), ln1_b=jnp.zeros((width,), f32),
        w_qkv=_init(ks[0], (width, 3 * width)), b_qkv=jnp.zeros((3 * width,), f32),
        w_out=_init(ks[1], (width, width)), b_out=jnp.zeros((width,), f32),
        ln2_g=jnp.ones((width,), f32), ln2_b=jnp.zeros((width,), f32),
        w_fc=_init(ks[2], (width, 4 * width)), b_fc=jnp.zeros((4 * width,), f32),
        w_proj=_init(ks[3], (4 * width, width)), b_proj=jnp.zeros((width,), f32),
    )


def init_params(key, cfg):
    ks = jax.random.split(key, 12)
    C, p, W = cfg["in_channels"], cfg["patch"], cfg["vision_width"]
    P = cfg["n_patches"]
    f32 = jnp.float32
    visual = dict(
        conv_w=_init(ks[0], (C * p * p, W)),
        class_embedding=_init(ks[1], (W,)),
        pos_embed=_init(ks[2], (P + 1, W)),
        ln_pre_g=jnp.ones((W,), f32), ln_pre_b=jnp.zeros((W,), f32),
        ln_post_g=jnp.ones((W,), f32), ln_post_b=jnp.zeros((W,), f32),
        blocks=[_init_block(k, W)
                for k in jax.random.split(ks[3], cfg["vision_layers"])],
    )
    TW = cfg["text_width"]
    text = dict(
        token_embedding=_init(ks[4], (cfg["vocab"], TW)),
        pos_embed=_init(ks[5], (cfg["context"], TW)),
        ln_final_g=jnp.ones((TW,), f32), ln_final_b=jnp.zeros((TW,), f32),
        text_projection=_init(ks[6], (TW, cfg["embed_dim"])),
        blocks=[_init_block(k, TW)
                for k in jax.random.split(ks[7], cfg["text_layers"])],
    )
    D = cfg["embed_dim"]
    embedder = dict(
        w1=_init(ks[8], (W, D)), b1=jnp.zeros((D,), f32),
        w2=_init(ks[9], (D, D)), b2=jnp.zeros((D,), f32),
        wr=_init(ks[10], (W, D)), br=jnp.zeros((D,), f32),
    )
    return dict(visual=visual, text=text, embedder=embedder)


# ---------------------------------------------------------------------------
if __name__ == "__main__":
    cfg = dict(
        in_channels=3, patch=8, n_patches=4,             # 16x16 image, 8x8 patch
        vision_width=32, vision_heads=2, vision_layers=2,
        vocab=64, context=8, text_width=32, text_heads=2, text_layers=2,
        embed_dim=32,                                    # projection_dim
    )
    key = jax.random.PRNGKey(0)
    k_param, k_img, k_txt = jax.random.split(key, 3)
    params = init_params(k_param, cfg)

    images = jax.random.normal(k_img, (2, 3, 16, 16), jnp.float32)       # NCHW
    text_tokens = jax.random.randint(k_txt, (2, cfg["context"]), 0, cfg["vocab"])

    fwd = jax.jit(functools.partial(pacl_clip_forward, cfg=cfg))
    compat = fwd(params, images, text_tokens)            # [B_img, B_text]
    jax.block_until_ready(compat)
    assert compat.shape == (2, 2)
    print("KERNEL_OK")
</pallas_src>

<mosaic_0001>
module attributes {stable_mosaic.version = 11 : i64} {
  func.func @kernel(%arg0: i32, %arg1: i32, %arg2: i32, %arg3: memref<8x192xbf16, #tpu.memory_space<vmem>>, %arg4: memref<192x32xbf16, #tpu.memory_space<vmem>>, %arg5: memref<8x32xbf16, #tpu.memory_space<vmem>>, %arg6: memref<8x32xf32, #tpu.memory_space<vmem>>) attributes {dimension_semantics = [#tpu.dimension_semantics<parallel>, #tpu.dimension_semantics<parallel>, #tpu.dimension_semantics<arbitrary>], iteration_bounds = array<i64: 1, 1, 1>, scalar_prefetch = 0 : i64, scratch_operands = 1 : i64, tpu.core_type = #tpu.core_type<tc>, window_params = [{transform_indices = @transform_0, window_bounds = array<i64: 8, 192>}, {transform_indices = @transform_1, window_bounds = array<i64: 192, 32>}, {transform_indices = @transform_2, window_bounds = array<i64: 8, 32>}]} {
    %c0_i32 = arith.constant 0 : i32
    %0 = arith.cmpi eq, %arg2, %c0_i32 : i32
    %1 = arith.extui %0 : i1 to i32
    %c0_i32_0 = arith.constant 0 : i32
    %2 = arith.cmpi ne, %1, %c0_i32_0 : i32
    scf.if %2 {
      %cst_10 = arith.constant 0.000000e+00 : f32
      %12 = vector.broadcast %cst_10 : f32 to vector<8x32xf32>
      %c0_11 = arith.constant 0 : index
      %c0_12 = arith.constant 0 : index
      %13 = vector.load %arg6[%c0_11, %c0_12] : memref<8x32xf32, #tpu.memory_space<vmem>>, vector<8x32xf32>
      tpu.vector_store %arg6[%c0_11, %c0_12], %12 {strides = array<i32>} : memref<8x32xf32, #tpu.memory_space<vmem>>, vector<8x32xf32>,
    } else {
    }
    %c0 = arith.constant 0 : index
    %c0_1 = arith.constant 0 : index
    %3 = vector.load %arg3[%c0, %c0_1] : memref<8x192xbf16, #tpu.memory_space<vmem>>, vector<8x192xbf16>
    %c0_2 = arith.constant 0 : index
    %c0_3 = arith.constant 0 : index
    %4 = vector.load %arg6[%c0_2, %c0_3] : memref<8x32xf32, #tpu.memory_space<vmem>>, vector<8x32xf32>
    %c0_4 = arith.constant 0 : index
    %c0_5 = arith.constant 0 : index
    %5 = vector.load %arg4[%c0_4, %c0_5] : memref<192x32xbf16, #tpu.memory_space<vmem>>, vector<192x32xbf16>
    %cst = arith.constant dense<0.000000e+00> : vector<8x32xf32>
    %6 = tpu.matmul %3, %5, %cst {dimension_numbers = #tpu.dot_dimension_numbers<[1], [0], [0], [1], [0, 0, 1, 1], [], []>} : vector<8x192xbf16>, vector<192x32xbf16>, vector<8x32xf32> -> vector<8x32xf32>
    %7 = arith.addf %4, %6 : vector<8x32xf32>
    %c0_6 = arith.constant 0 : index
    %c0_7 = arith.constant 0 : index
    %8 = vector.load %arg6[%c0_6, %c0_7] : memref<8x32xf32, #tpu.memory_space<vmem>>, vector<8x32xf32>
    tpu.vector_store %arg6[%c0_6, %c0_7], %7 {strides = array<i32>} : memref<8x32xf32, #tpu.memory_space<vmem>>, vector<8x32xf32>,
    %c0_i32_8 = arith.constant 0 : i32
    %9 = arith.cmpi eq, %arg2, %c0_i32_8 : i32
    %10 = arith.extui %9 : i1 to i32
    %c0_i32_9 = arith.constant 0 : i32
    %11 = arith.cmpi ne, %10, %c0_i32_9 : i32
    scf.if %11 {
      %c0_10 = arith.constant 0 : index
      %c0_11 = arith.constant 0 : index
      %12 = vector.load %arg6[%c0_10, %c0_11] : memref<8x32xf32, #tpu.memory_space<vmem>>, vector<8x32xf32>
      %13 = arith.truncf %12 : vector<8x32xf32> to vector<8x32xbf16>
      %c0_12 = arith.constant 0 : index
      %c0_13 = arith.constant 0 : index
      %14 = vector.load %arg5[%c0_12, %c0_13] : memref<8x32xbf16, #tpu.memory_space<vmem>>, vector<8x32xbf16>
      tpu.vector_store %arg5[%c0_12, %c0_13], %13 {strides = array<i32>} : memref<8x32xbf16, #tpu.memory_space<vmem>>, vector<8x32xbf16>,
    } else {
    }
    return
  }
  func.func @transform_0(%arg0: i32, %arg1: i32, %arg2: i32) -> (i32, i32) {
    %c0_i32 = arith.constant 0 : i32
    return %arg0, %arg2 : i32, i32
  }
  func.func @transform_1(%arg0: i32, %arg1: i32, %arg2: i32) -> (i32, i32) {
    %c0_i32 = arith.constant 0 : i32
    return %arg2, %arg1 : i32, i32
  }
  func.func @transform_2(%arg0: i32, %arg1: i32, %arg2: i32) -> (i32, i32) {
    %c0_i32 = arith.constant 0 : i32
    return %arg0, %arg1 : i32, i32
  }
}

module attributes {stable_mosaic.version = 11 : i64} {
  func.func @kernel(%arg0: i32, %arg1: i32, %arg2: i32, %arg3: memref<10x32xbf16, #tpu.memory_space<vmem>>, %arg4: memref<32x96xbf16, #tpu.memory_space<vmem>>, %arg5: memref<1x32xf32, #tpu.memory_space<vmem>>, %arg6: memref<1x32xf32, #tpu.memory_space<vmem>>, %arg7: memref<1x96xf32, #tpu.memory_space<vmem>>, %arg8: memref<10x96xbf16, #tpu.memory_space<vmem>>, %arg9: memref<10x96xf32, #tpu.memory_space<vmem>>) attributes {dimension_semantics = [#tpu.dimension_semantics<parallel>, #tpu.dimension_semantics<parallel>, #tpu.dimension_semantics<arbitrary>], iteration_bounds = array<i64: 1, 1, 1>, scalar_prefetch = 0 : i64, scratch_operands = 1 : i64, tpu.core_type = #tpu.core_type<tc>, window_params = [{transform_indices = @transform_0, window_bounds = array<i64: 10, 32>}, {transform_indices = @transform_1, window_bounds = array<i64: 32, 96>}, {pipeline_mode = #tpu.pipeline_mode<synchronous>, transform_indices = @transform_2, window_bounds = array<i64: 1, 32>}, {pipeline_mode = #tpu.pipeline_mode<synchronous>, transform_indices = @transform_3, window_bounds = array<i64: 1, 32>}, {transform_indices = @transform_4, window_bounds = array<i64: 1, 96>}, {transform_indices = @transform_5, window_bounds = array<i64: 10, 96>}]} {
    %c0_i32 = arith.constant 0 : i32
    %0 = arith.cmpi eq, %arg2, %c0_i32 : i32
    %1 = arith.extui %0 : i1 to i32
    %c0_i32_0 = arith.constant 0 : i32
    %2 = arith.cmpi ne, %1, %c0_i32_0 : i32
    scf.if %2 {
      %cst_19 = arith.constant 0.000000e+00 : f32
      %36 = vector.broadcast %cst_19 : f32 to vector<10x96xf32>
      %c0_20 = arith.constant 0 : index
      %c0_21 = arith.constant 0 : index
      %37 = vector.load %arg9[%c0_20, %c0_21] : memref<10x96xf32, #tpu.memory_space<vmem>>, vector<10x96xf32>
      tpu.vector_store %arg9[%c0_20, %c0_21], %36 {strides = array<i32>} : memref<10x96xf32, #tpu.memory_space<vmem>>, vector<10x96xf32>,
    } else {
    }
    %c0 = arith.constant 0 : index
    %c0_1 = arith.constant 0 : index
    %3 = vector.load %arg3[%c0, %c0_1] : memref<10x32xbf16, #tpu.memory_space<vmem>>, vector<10x32xbf16>
    %4 = arith.extf %3 : vector<10x32xbf16> to vector<10x32xf32>
    %cst = arith.constant dense<0.000000e+00> : vector<10xf32>
    %5 = vector.multi_reduction <add>, %4, %cst [1] : vector<10x32xf32> to vector<10xf32>
    %6 = vector.shape_cast %5 : vector<10xf32> to vector<10x1xf32>
    %cst_2 = arith.constant 3.200000e+01 : f32
    %7 = vector.broadcast %cst_2 : f32 to vector<10x1xf32>
    %8 = arith.divf %6, %7 : vector<10x1xf32>
    %9 = vector.broadcast %8 : vector<10x1xf32> to vector<10x32xf32>
    %10 = arith.subf %4, %9 : vector<10x32xf32>
    %11 = arith.mulf %10, %10 : vector<10x32xf32>
    %cst_3 = arith.constant dense<0.000000e+00> : vector<10xf32>
    %12 = vector.multi_reduction <add>, %11, %cst_3 [1] : vector<10x32xf32> to vector<10xf32>
    %13 = vector.shape_cast %12 : vector<10xf32> to vector<10x1xf32>
    %cst_4 = arith.constant 3.200000e+01 : f32
    %14 = vector.broadcast %cst_4 : f32 to vector<10x1xf32>
    %15 = arith.divf %13, %14 : vector<10x1xf32>
    %cst_5 = arith.constant 9.99999974E-6 : f32
    %16 = vector.broadcast %cst_5 : f32 to vector<10x1xf32>
    %17 = arith.addf %15, %16 : vector<10x1xf32>
    %18 = math.rsqrt %17 : vector<10x1xf32>
    %19 = vector.broadcast %18 : vector<10x1xf32> to vector<10x32xf32>
    %20 = arith.mulf %10, %19 : vector<10x32xf32>
    %c0_6 = arith.constant 0 : index
    %c0_7 = arith.constant 0 : index
    %21 = vector.load %arg5[%c0_6, %c0_7] : memref<1x32xf32, #tpu.memory_space<vmem>>, vector<1x32xf32>
    %22 = vector.broadcast %21 : vector<1x32xf32> to vector<10x32xf32>
    %23 = arith.mulf %20, %22 : vector<10x32xf32>
    %c0_8 = arith.constant 0 : index
    %c0_9 = arith.constant 0 : index
    %24 = vector.load %arg6[%c0_8, %c0_9] : memref<1x32xf32, #tpu.memory_space<vmem>>, vector<1x32xf32>
    %25 = vector.broadcast %24 : vector<1x32xf32> to vector<10x32xf32>
    %26 = arith.addf %23, %25 : vector<10x32xf32>
    %27 = arith.truncf %26 : vector<10x32xf32> to vector<10x32xbf16>
    %c0_10 = arith.constant 0 : index
    %c0_11 = arith.constant 0 : index
    %28 = vector.load %arg9[%c0_10, %c0_11] : memref<10x96xf32, #tpu.memory_space<vmem>>, vector<10x96xf32>
    %c0_12 = arith.constant 0 : index
    %c0_13 = arith.constant 0 : index
    %29 = vector.load %arg4[%c0_12, %c0_13] : memref<32x96xbf16, #tpu.memory_space<vmem>>, vector<32x96xbf16>
    %cst_14 = arith.constant dense<0.000000e+00> : vector<10x96xf32>
    %30 = tpu.matmul %27, %29, %cst_14 {dimension_numbers = #tpu.dot_dimension_numbers<[1], [0], [0], [1], [0, 0, 1, 1], [], []>} : vector<10x32xbf16>, vector<32x96xbf16>, vector<10x96xf32> -> vector<10x96xf32>
    %31 = arith.addf %28, %30 : vector<10x96xf32>
    %c0_15 = arith.constant 0 : index
    %c0_16 = arith.constant 0 : index
    %32 = vector.load %arg9[%c0_15, %c0_16] : memref<10x96xf32, #tpu.memory_space<vmem>>, vector<10x96xf32>
    tpu.vector_store %arg9[%c0_15, %c0_16], %31 {strides = array<i32>} : memref<10x96xf32, #tpu.memory_space<vmem>>, vector<10x96xf32>,
    %c0_i32_17 = arith.constant 0 : i32
    %33 = arith.cmpi eq, %arg2, %c0_i32_17 : i32
    %34 = arith.extui %33 : i1 to i32
    %c0_i32_18 = arith.constant 0 : i32
    %35 = arith.cmpi ne, %34, %c0_i32_18 : i32
    scf.if %35 {
      %c0_19 = arith.constant 0 : index
      %c0_20 = arith.constant 0 : index
      %36 = vector.load %arg9[%c0_19, %c0_20] : memref<10x96xf32, #tpu.memory_space<vmem>>, vector<10x96xf32>
      %c0_21 = arith.constant 0 : index
      %c0_22 = arith.constant 0 : index
      %37 = vector.load %arg7[%c0_21, %c0_22] : memref<1x96xf32, #tpu.memory_space<vmem>>, vector<1x96xf32>
      %38 = vector.broadcast %37 : vector<1x96xf32> to vector<10x96xf32>
      %39 = arith.addf %36, %38 : vector<10x96xf32>
      %40 = arith.truncf %39 : vector<10x96xf32> to vector<10x96xbf16>
      %c0_23 = arith.constant 0 : index
      %c0_24 = arith.constant 0 : index
      %41 = vector.load %arg8[%c0_23, %c0_24] : memref<10x96xbf16, #tpu.memory_space<vmem>>, vector<10x96xbf16>
      tpu.vector_store %arg8[%c0_23, %c0_24], %40 {strides = array<i32>} : memref<10x96xbf16, #tpu.memory_space<vmem>>, vector<10x96xbf16>,
    } else {
    }
    return
  }
  func.func @transform_0(%arg0: i32, %arg1: i32, %arg2: i32) -> (i32, i32) {
    %c0_i32 = arith.constant 0 : i32
    return %arg0, %arg2 : i32, i32
  }
  func.func @transform_1(%arg0: i32, %arg1: i32, %arg2: i32) -> (i32, i32) {
    %c0_i32 = arith.constant 0 : i32
    return %arg2, %arg1 : i32, i32
  }
  func.func @transform_2(%arg0: i32, %arg1: i32, %arg2: i32) -> (i32, i32) {
    %c0_i32 = arith.constant 0 : i32
    %c0_i32_0 = arith.constant 0 : i32
    %c0_i32_1 = arith.constant 0 : i32
    return %c0_i32, %c0_i32_0 : i32, i32
  }
  func.func @transform_3(%arg0: i32, %arg1: i32, %arg2: i32) -> (i32, i32) {
    %c0_i32 = arith.constant 0 : i32
    %c0_i32_0 = arith.constant 0 : i32
    %c0_i32_1 = arith.constant 0 : i32
    return %c0_i32, %c0_i32_0 : i32, i32
  }
  func.func @transform_4(%arg0: i32, %arg1: i32, %arg2: i32) -> (i32, i32) {
    %c0_i32 = arith.constant 0 : i32
    %c0_i32_0 = arith.constant 0 : i32
    return %c0_i32, %arg1 : i32, i32
  }
  func.func @transform_5(%arg0: i32, %arg1: i32, %arg2: i32) -> (i32, i32) {
    %c0_i32 = arith.constant 0 : i32
    return %arg0, %arg1 : i32, i32
  }
}

module attributes {stable_mosaic.version = 11 : i64} {
  func.func @_ln_kernel(%arg0: i32, %arg1: memref<10x32xbf16, #tpu.memory_space<vmem>>, %arg2: memref<1x32xf32, #tpu.memory_space<vmem>>, %arg3: memref<1x32xf32, #tpu.memory_space<vmem>>, %arg4: memref<10x32xbf16, #tpu.memory_space<vmem>>) attributes {dimension_semantics = [#tpu.dimension_semantics<parallel>], iteration_bounds = array<i64: 1>, scalar_prefetch = 0 : i64, scratch_operands = 0 : i64, tpu.core_type = #tpu.core_type<tc>, window_params = [{transform_indices = @transform_0, window_bounds = array<i64: 10, 32>}, {pipeline_mode = #tpu.pipeline_mode<synchronous>, transform_indices = @transform_1, window_bounds = array<i64: 1, 32>}, {pipeline_mode = #tpu.pipeline_mode<synchronous>, transform_indices = @transform_2, window_bounds = array<i64: 1, 32>}, {transform_indices = @transform_3, window_bounds = array<i64: 10, 32>}]} {
    %c0 = arith.constant 0 : index
    %c0_0 = arith.constant 0 : index
    %0 = vector.load %arg1[%c0, %c0_0] : memref<10x32xbf16, #tpu.memory_space<vmem>>, vector<10x32xbf16>
    %1 = arith.extf %0 : vector<10x32xbf16> to vector<10x32xf32>
    %cst = arith.constant dense<0.000000e+00> : vector<10xf32>
    %2 = vector.multi_reduction <add>, %1, %cst [1] : vector<10x32xf32> to vector<10xf32>
    %3 = vector.shape_cast %2 : vector<10xf32> to vector<10x1xf32>
    %cst_1 = arith.constant 3.200000e+01 : f32
    %4 = vector.broadcast %cst_1 : f32 to vector<10x1xf32>
    %5 = arith.divf %3, %4 : vector<10x1xf32>
    %6 = vector.broadcast %5 : vector<10x1xf32> to vector<10x32xf32>
    %7 = arith.subf %1, %6 : vector<10x32xf32>
    %8 = arith.mulf %7, %7 : vector<10x32xf32>
    %cst_2 = arith.constant dense<0.000000e+00> : vector<10xf32>
    %9 = vector.multi_reduction <add>, %8, %cst_2 [1] : vector<10x32xf32> to vector<10xf32>
    %10 = vector.shape_cast %9 : vector<10xf32> to vector<10x1xf32>
    %cst_3 = arith.constant 3.200000e+01 : f32
    %11 = vector.broadcast %cst_3 : f32 to vector<10x1xf32>
    %12 = arith.divf %10, %11 : vector<10x1xf32>
    %cst_4 = arith.constant 9.99999974E-6 : f32
    %13 = vector.broadcast %cst_4 : f32 to vector<10x1xf32>
    %14 = arith.addf %12, %13 : vector<10x1xf32>
    %15 = math.rsqrt %14 : vector<10x1xf32>
    %16 = vector.broadcast %15 : vector<10x1xf32> to vector<10x32xf32>
    %17 = arith.mulf %7, %16 : vector<10x32xf32>
    %c0_5 = arith.constant 0 : index
    %c0_6 = arith.constant 0 : index
    %18 = vector.load %arg2[%c0_5, %c0_6] : memref<1x32xf32, #tpu.memory_space<vmem>>, vector<1x32xf32>
    %19 = vector.broadcast %18 : vector<1x32xf32> to vector<10x32xf32>
    %20 = arith.mulf %17, %19 : vector<10x32xf32>
    %c0_7 = arith.constant 0 : index
    %c0_8 = arith.constant 0 : index
    %21 = vector.load %arg3[%c0_7, %c0_8] : memref<1x32xf32, #tpu.memory_space<vmem>>, vector<1x32xf32>
    %22 = vector.broadcast %21 : vector<1x32xf32> to vector<10x32xf32>
    %23 = arith.addf %20, %22 : vector<10x32xf32>
    %24 = arith.truncf %23 : vector<10x32xf32> to vector<10x32xbf16>
    %c0_9 = arith.constant 0 : index
    %c0_10 = arith.constant 0 : index
    %25 = vector.load %arg4[%c0_9, %c0_10] : memref<10x32xbf16, #tpu.memory_space<vmem>>, vector<10x32xbf16>
    tpu.vector_store %arg4[%c0_9, %c0_10], %24 {strides = array<i32>} : memref<10x32xbf16, #tpu.memory_space<vmem>>, vector<10x32xbf16>,
    return
  }
  func.func @transform_0(%arg0: i32) -> (i32, i32) {
    %c0_i32 = arith.constant 0 : i32
    %c0_i32_0 = arith.constant 0 : i32
    return %arg0, %c0_i32 : i32, i32
  }
  func.func @transform_1(%arg0: i32) -> (i32, i32) {
    %c0_i32 = arith.constant 0 : i32
    %c0_i32_0 = arith.constant 0 : i32
    %c0_i32_1 = arith.constant 0 : i32
    return %c0_i32, %c0_i32_0 : i32, i32
  }
  func.func @transform_2(%arg0: i32) -> (i32, i32) {
    %c0_i32 = arith.constant 0 : i32
    %c0_i32_0 = arith.constant 0 : i32
    %c0_i32_1 = arith.constant 0 : i32
    return %c0_i32, %c0_i32_0 : i32, i32
  }
  func.func @transform_3(%arg0: i32) -> (i32, i32) {
    %c0_i32 = arith.constant 0 : i32
    %c0_i32_0 = arith.constant 0 : i32
    return %arg0, %c0_i32 : i32, i32
  }
}

module attributes {stable_mosaic.version = 11 : i64} {
  func.func @_flash_attn_kernel(%arg0: i32, %arg1: i32, %arg2: i32, %arg3: memref<1x5x16xbf16, #tpu.memory_space<vmem>>, %arg4: memref<1x5x16xbf16, #tpu.memory_space<vmem>>, %arg5: memref<1x5x16xbf16, #tpu.memory_space<vmem>>, %arg6: memref<1x5x16xbf16, #tpu.memory_space<vmem>>, %arg7: memref<5x1xf32, #tpu.memory_space<vmem>>, %arg8: memref<5x1xf32, #tpu.memory_space<vmem>>, %arg9: memref<5x16xf32, #tpu.memory_space<vmem>>) attributes {dimension_semantics = [#tpu.dimension_semantics<parallel>, #tpu.dimension_semantics<parallel>, #tpu.dimension_semantics<arbitrary>], iteration_bounds = array<i64: 4, 1, 1>, scalar_prefetch = 0 : i64, scratch_operands = 3 : i64, tpu.core_type = #tpu.core_type<tc>, window_params = [{transform_indices = @transform_0, window_bounds = array<i64: 1, 5, 16>}, {transform_indices = @transform_1, window_bounds = array<i64: 1, 5, 16>}, {transform_indices = @transform_2, window_bounds = array<i64: 1, 5, 16>}, {transform_indices = @transform_3, window_bounds = array<i64: 1, 5, 16>}]} {
    %c0_i32 = arith.constant 0 : i32
    %0 = arith.cmpi eq, %arg2, %c0_i32 : i32
    %1 = arith.extui %0 : i1 to i32
    %c0_i32_0 = arith.constant 0 : i32
    %2 = arith.cmpi ne, %1, %c0_i32_0 : i32
    scf.if %2 {
      %cst_27 = arith.constant 0xFF800000 : f32
      %38 = vector.broadcast %cst_27 : f32 to vector<5x1xf32>
      %c0_28 = arith.constant 0 : index
      %c0_29 = arith.constant 0 : index
      %39 = vector.load %arg7[%c0_28, %c0_29] : memref<5x1xf32, #tpu.memory_space<vmem>>, vector<5x1xf32>
      tpu.vector_store %arg7[%c0_28, %c0_29], %38 {strides = array<i32>} : memref<5x1xf32, #tpu.memory_space<vmem>>, vector<5x1xf32>,
      %cst_30 = arith.constant 0.000000e+00 : f32
      %40 = vector.broadcast %cst_30 : f32 to vector<5x1xf32>
      %c0_31 = arith.constant 0 : index
      %c0_32 = arith.constant 0 : index
      %41 = vector.load %arg8[%c0_31, %c0_32] : memref<5x1xf32, #tpu.memory_space<vmem>>, vector<5x1xf32>
      tpu.vector_store %arg8[%c0_31, %c0_32], %40 {strides = array<i32>} : memref<5x1xf32, #tpu.memory_space<vmem>>, vector<5x1xf32>,
      %cst_33 = arith.constant 0.000000e+00 : f32
      %42 = vector.broadcast %cst_33 : f32 to vector<5x16xf32>
      %c0_34 = arith.constant 0 : index
      %c0_35 = arith.constant 0 : index
      %43 = vector.load %arg9[%c0_34, %c0_35] : memref<5x16xf32, #tpu.memory_space<vmem>>, vector<5x16xf32>
      tpu.vector_store %arg9[%c0_34, %c0_35], %42 {strides = array<i32>} : memref<5x16xf32, #tpu.memory_space<vmem>>, vector<5x16xf32>,
    } else {
    }
    %c0 = arith.constant 0 : index
    %c0_1 = arith.constant 0 : index
    %c0_2 = arith.constant 0 : index
    %3 = vector.load %arg3[%c0, %c0_1, %c0_2] : memref<1x5x16xbf16, #tpu.memory_space<vmem>>, vector<1x5x16xbf16>
    %4 = vector.shape_cast %3 : vector<1x5x16xbf16> to vector<5x16xbf16>
    %cst = arith.constant 2.500000e-01 : bf16
    %5 = vector.broadcast %cst : bf16 to vector<5x16xbf16>
    %6 = arith.mulf %4, %5 : vector<5x16xbf16>
    %c0_3 = arith.constant 0 : index
    %c0_4 = arith.constant 0 : index
    %c0_5 = arith.constant 0 : index
    %7 = vector.load %arg4[%c0_3, %c0_4, %c0_5] : memref<1x5x16xbf16, #tpu.memory_space<vmem>>, vector<1x5x16xbf16>
    %8 = vector.shape_cast %7 : vector<1x5x16xbf16> to vector<5x16xbf16>
    %cst_6 = arith.constant dense<0.000000e+00> : vector<5x5xf32>
    %9 = tpu.matmul %6, %8, %cst_6 {dimension_numbers = #tpu.dot_dimension_numbers<[1], [1], [0], [0], [0, 0, 1, 0], [], []>} : vector<5x16xbf16>, vector<5x16xbf16>, vector<5x5xf32> -> vector<5x5xf32>
    %c0_7 = arith.constant 0 : index
    %c0_8 = arith.constant 0 : index
    %10 = vector.load %arg7[%c0_7, %c0_8] : memref<5x1xf32, #tpu.memory_space<vmem>>, vector<5x1xf32>
    %cst_9 = arith.constant dense<0xFF800000> : vector<5xf32>
    %11 = vector.multi_reduction <maximumf>, %9, %cst_9 [1] : vector<5x5xf32> to vector<5xf32>
    %12 = vector.shape_cast %11 : vector<5xf32> to vector<5x1xf32>
    %13 = arith.maximumf %10, %12 : vector<5x1xf32>
    %14 = arith.subf %10, %13 : vector<5x1xf32>
    %15 = math.exp %14 : vector<5x1xf32>
    %16 = vector.broadcast %13 : vector<5x1xf32> to vector<5x5xf32>
    %17 = arith.subf %9, %16 : vector<5x5xf32>
    %18 = math.exp %17 : vector<5x5xf32>
    %c0_10 = arith.constant 0 : index
    %c0_11 = arith.constant 0 : index
    %19 = vector.load %arg8[%c0_10, %c0_11] : memref<5x1xf32, #tpu.memory_space<vmem>>, vector<5x1xf32>
    %20 = arith.mulf %15, %19 : vector<5x1xf32>
    %cst_12 = arith.constant dense<0.000000e+00> : vector<5xf32>
    %21 = vector.multi_reduction <add>, %18, %cst_12 [1] : vector<5x5xf32> to vector<5xf32>
    %22 = vector.shape_cast %21 : vector<5xf32> to vector<5x1xf32>
    %23 = arith.addf %20, %22 : vector<5x1xf32>
    %c0_13 = arith.constant 0 : index
    %c0_14 = arith.constant 0 : index
    %24 = vector.load %arg8[%c0_13, %c0_14] : memref<5x1xf32, #tpu.memory_space<vmem>>, vector<5x1xf32>
    tpu.vector_store %arg8[%c0_13, %c0_14], %23 {strides = array<i32>} : memref<5x1xf32, #tpu.memory_space<vmem>>, vector<5x1xf32>,
    %c0_15 = arith.constant 0 : index
    %c0_16 = arith.constant 0 : index
    %25 = vector.load %arg9[%c0_15, %c0_16] : memref<5x16xf32, #tpu.memory_space<vmem>>, vector<5x16xf32>
    %26 = vector.broadcast %15 : vector<5x1xf32> to vector<5x16xf32>
    %27 = arith.mulf %26, %25 : vector<5x16xf32>
    %28 = arith.truncf %18 : vector<5x5xf32> to vector<5x5xbf16>
    %c0_17 = arith.constant 0 : index
    %c0_18 = arith.constant 0 : index
    %c0_19 = arith.constant 0 : index
    %29 = vector.load %arg5[%c0_17, %c0_18, %c0_19] : memref<1x5x16xbf16, #tpu.memory_space<vmem>>, vector<1x5x16xbf16>
    %30 = vector.shape_cast %29 : vector<1x5x16xbf16> to vector<5x16xbf16>
    %cst_20 = arith.constant dense<0.000000e+00> : vector<5x16xf32>
    %31 = tpu.matmul %28, %30, %cst_20 {dimension_numbers = #tpu.dot_dimension_numbers<[1], [0], [0], [1], [0, 0, 1, 1], [], []>} : vector<5x5xbf16>, vector<5x16xbf16>, vector<5x16xf32> -> vector<5x16xf32>
    %32 = arith.addf %27, %31 : vector<5x16xf32>
    %c0_21 = arith.constant 0 : index
    %c0_22 = arith.constant 0 : index
    %33 = vector.load %arg9[%c0_21, %c0_22] : memref<5x16xf32, #tpu.memory_space<vmem>>, vector<5x16xf32>
    tpu.vector_store %arg9[%c0_21, %c0_22], %32 {strides = array<i32>} : memref<5x16xf32, #tpu.memory_space<vmem>>, vector<5x16xf32>,
    %c0_23 = arith.constant 0 : index
    %c0_24 = arith.constant 0 : index
    %34 = vector.load %arg7[%c0_23, %c0_24] : memref<5x1xf32, #tpu.memory_space<vmem>>, vector<5x1xf32>
    tpu.vector_store %arg7[%c0_23, %c0_24], %13 {strides = array<i32>} : memref<5x1xf32, #tpu.memory_space<vmem>>, vector<5x1xf32>,
    %c0_i32_25 = arith.constant 0 : i32
    %35 = arith.cmpi eq, %arg2, %c0_i32_25 : i32
    %36 = arith.extui %35 : i1 to i32
    %c0_i32_26 = arith.constant 0 : i32
    %37 = arith.cmpi ne, %36, %c0_i32_26 : i32
    scf.if %37 {
      %c0_27 = arith.constant 0 : index
      %c0_28 = arith.constant 0 : index
      %38 = vector.load %arg9[%c0_27, %c0_28] : memref<5x16xf32, #tpu.memory_space<vmem>>, vector<5x16xf32>
      %c0_29 = arith.constant 0 : index
      %c0_30 = arith.constant 0 : index
      %39 = vector.load %arg8[%c0_29, %c0_30] : memref<5x1xf32, #tpu.memory_space<vmem>>, vector<5x1xf32>
      %40 = tpu.reciprocal %39 {approx = true} : vector<5x1xf32> -> vector<5x1xf32>
      %41 = vector.broadcast %40 : vector<5x1xf32> to vector<5x16xf32>
      %42 = arith.mulf %38, %41 : vector<5x16xf32>
      %43 = arith.truncf %42 : vector<5x16xf32> to vector<5x16xbf16>
      %c0_31 = arith.constant 0 : index
      %c0_32 = arith.constant 0 : index
      %c0_33 = arith.constant 0 : index
      %44 = vector.load %arg6[%c0_31, %c0_32, %c0_33] : memref<1x5x16xbf16, #tpu.memory_space<vmem>>, vector<1x5x16xbf16>
      %45 = vector.shape_cast %44 : vector<1x5x16xbf16> to vector<5x16xbf16>
      %46 = vector.shape_cast %43 : vector<5x16xbf16> to vector<1x5x16xbf16>
      tpu.vector_store %arg6[%c0_31, %c0_32, %c0_33], %46 {strides = array<i32>} : memref<1x5x16xbf16, #tpu.memory_space<vmem>>, vector<1x5x16xbf16>,
    } else {
    }
    return
  }
  func.func @transform_0(%arg0: i32, %arg1: i32, %arg2: i32) -> (i32, i32, i32) {
    %c0_i32 = arith.constant 0 : i32
    %c0_i32_0 = arith.constant 0 : i32
    return %arg0, %arg1, %c0_i32 : i32, i32, i32
  }
  func.func @transform_1(%arg0: i32, %arg1: i32, %arg2: i32) -> (i32, i32, i32) {
    %c0_i32 = arith.constant 0 : i32
    %c0_i32_0 = arith.constant 0 : i32
    return %arg0, %arg2, %c0_i32 : i32, i32, i32
  }
  func.func @transform_2(%arg0: i32, %arg1: i32, %arg2: i32) -> (i32, i32, i32) {
    %c0_i32 = arith.constant 0 : i32
    %c0_i32_0 = arith.constant 0 : i32
    return %arg0, %arg2, %c0_i32 : i32, i32, i32
  }
  func.func @transform_3(%arg0: i32, %arg1: i32, %arg2: i32) -> (i32, i32, i32) {
    %c0_i32 = arith.constant 0 : i32
    %c0_i32_0 = arith.constant 0 : i32
    return %arg0, %arg1, %c0_i32 : i32, i32, i32
  }
}

module attributes {stable_mosaic.version = 11 : i64} {
  func.func @kernel(%arg0: i32, %arg1: i32, %arg2: i32, %arg3: memref<1x10x16xbf16, #tpu.memory_space<vmem>>, %arg4: memref<1x16x32xbf16, #tpu.memory_space<vmem>>, %arg5: memref<1x32xf32, #tpu.memory_space<vmem>>, %arg6: memref<10x32xbf16, #tpu.memory_space<vmem>>, %arg7: memref<10x32xbf16, #tpu.memory_space<vmem>>, %arg8: memref<10x32xf32, #tpu.memory_space<vmem>>) attributes {dimension_semantics = [#tpu.dimension_semantics<parallel>, #tpu.dimension_semantics<parallel>, #tpu.dimension_semantics<arbitrary>], iteration_bounds = array<i64: 1, 1, 2>, scalar_prefetch = 0 : i64, scratch_operands = 1 : i64, tpu.core_type = #tpu.core_type<tc>, window_params = [{transform_indices = @transform_0, window_bounds = array<i64: 1, 10, 16>}, {transform_indices = @transform_1, window_bounds = array<i64: 1, 16, 32>}, {transform_indices = @transform_2, window_bounds = array<i64: 1, 32>}, {transform_indices = @transform_3, window_bounds = array<i64: 10, 32>}, {transform_indices = @transform_4, window_bounds = array<i64: 10, 32>}]} {
    %c0_i32 = arith.constant 0 : i32
    %0 = arith.cmpi eq, %arg2, %c0_i32 : i32
    %1 = arith.extui %0 : i1 to i32
    %c0_i32_0 = arith.constant 0 : i32
    %2 = arith.cmpi ne, %1, %c0_i32_0 : i32
    scf.if %2 {
      %cst_11 = arith.constant 0.000000e+00 : f32
      %14 = vector.broadcast %cst_11 : f32 to vector<10x32xf32>
      %c0_12 = arith.constant 0 : index
      %c0_13 = arith.constant 0 : index
      %15 = vector.load %arg8[%c0_12, %c0_13] : memref<10x32xf32, #tpu.memory_space<vmem>>, vector<10x32xf32>
      tpu.vector_store %arg8[%c0_12, %c0_13], %14 {strides = array<i32>} : memref<10x32xf32, #tpu.memory_space<vmem>>, vector<10x32xf32>,
    } else {
    }
    %c0 = arith.constant 0 : index
    %c0_1 = arith.constant 0 : index
    %c0_2 = arith.constant 0 : index
    %3 = vector.load %arg3[%c0, %c0_1, %c0_2] : memref<1x10x16xbf16, #tpu.memory_space<vmem>>, vector<1x10x16xbf16>
    %4 = vector.shape_cast %3 : vector<1x10x16xbf16> to vector<10x16xbf16>
    %c0_3 = arith.constant 0 : index
    %c0_4 = arith.constant 0 : index
    %5 = vector.load %arg8[%c0_3, %c0_4] : memref<10x32xf32, #tpu.memory_space<vmem>>, vector<10x32xf32>
    %c0_5 = arith.constant 0 : index
    %c0_6 = arith.constant 0 : index
    %c0_7 = arith.constant 0 : index
    %6 = vector.load %arg4[%c0_5, %c0_6, %c0_7] : memref<1x16x32xbf16, #tpu.memory_space<vmem>>, vector<1x16x32xbf16>
    %7 = vector.shape_cast %6 : vector<1x16x32xbf16> to vector<16x32xbf16>
    %cst = arith.constant dense<0.000000e+00> : vector<10x32xf32>
    %8 = tpu.matmul %4, %7, %cst {dimension_numbers = #tpu.dot_dimension_numbers<[1], [0], [0], [1], [0, 0, 1, 1], [], []>} : vector<10x16xbf16>, vector<16x32xbf16>, vector<10x32xf32> -> vector<10x32xf32>
    %9 = arith.addf %5, %8 : vector<10x32xf32>
    %c0_8 = arith.constant 0 : index
    %c0_9 = arith.constant 0 : index
    %10 = vector.load %arg8[%c0_8, %c0_9] : memref<10x32xf32, #tpu.memory_space<vmem>>, vector<10x32xf32>
    tpu.vector_store %arg8[%c0_8, %c0_9], %9 {strides = array<i32>} : memref<10x32xf32, #tpu.memory_space<vmem>>, vector<10x32xf32>,
    %c1_i32 = arith.constant 1 : i32
    %11 = arith.cmpi eq, %arg2, %c1_i32 : i32
    %12 = arith.extui %11 : i1 to i32
    %c0_i32_10 = arith.constant 0 : i32
    %13 = arith.cmpi ne, %12, %c0_i32_10 : i32
    scf.if %13 {
      %c0_11 = arith.constant 0 : index
      %c0_12 = arith.constant 0 : index
      %14 = vector.load %arg8[%c0_11, %c0_12] : memref<10x32xf32, #tpu.memory_space<vmem>>, vector<10x32xf32>
      %c0_13 = arith.constant 0 : index
      %c0_14 = arith.constant 0 : index
      %15 = vector.load %arg5[%c0_13, %c0_14] : memref<1x32xf32, #tpu.memory_space<vmem>>, vector<1x32xf32>
      %16 = vector.broadcast %15 : vector<1x32xf32> to vector<10x32xf32>
      %17 = arith.addf %14, %16 : vector<10x32xf32>
      %c0_15 = arith.constant 0 : index
      %c0_16 = arith.constant 0 : index
      %18 = vector.load %arg6[%c0_15, %c0_16] : memref<10x32xbf16, #tpu.memory_space<vmem>>, vector<10x32xbf16>
      %19 = arith.extf %18 : vector<10x32xbf16> to vector<10x32xf32>
      %20 = arith.addf %17, %19 : vector<10x32xf32>
      %21 = arith.truncf %20 : vector<10x32xf32> to vector<10x32xbf16>
      %c0_17 = arith.constant 0 : index
      %c0_18 = arith.constant 0 : index
      %22 = vector.load %arg7[%c0_17, %c0_18] : memref<10x32xbf16, #tpu.memory_space<vmem>>, vector<10x32xbf16>
      tpu.vector_store %arg7[%c0_17, %c0_18], %21 {strides = array<i32>} : memref<10x32xbf16, #tpu.memory_space<vmem>>, vector<10x32xbf16>,
    } else {
    }
    return
  }
  func.func @transform_0(%arg0: i32, %arg1: i32, %arg2: i32) -> (i32, i32, i32) {
    %c0_i32 = arith.constant 0 : i32
    %c0_i32_0 = arith.constant 0 : i32
    return %arg2, %arg0, %c0_i32 : i32, i32, i32
  }
  func.func @transform_1(%arg0: i32, %arg1: i32, %arg2: i32) -> (i32, i32, i32) {
    %c0_i32 = arith.constant 0 : i32
    %c0_i32_0 = arith.constant 0 : i32
    return %arg2, %c0_i32, %arg1 : i32, i32, i32
  }
  func.func @transform_2(%arg0: i32, %arg1: i32, %arg2: i32) -> (i32, i32) {
    %c0_i32 = arith.constant 0 : i32
    %c0_i32_0 = arith.constant 0 : i32
    return %c0_i32, %arg1 : i32, i32
  }
  func.func @transform_3(%arg0: i32, %arg1: i32, %arg2: i32) -> (i32, i32) {
    %c0_i32 = arith.constant 0 : i32
    return %arg0, %arg1 : i32, i32
  }
  func.func @transform_4(%arg0: i32, %arg1: i32, %arg2: i32) -> (i32, i32) {
    %c0_i32 = arith.constant 0 : i32
    return %arg0, %arg1 : i32, i32
  }
}

module attributes {stable_mosaic.version = 11 : i64} {
  func.func @kernel(%arg0: i32, %arg1: i32, %arg2: i32, %arg3: memref<10x32xbf16, #tpu.memory_space<vmem>>, %arg4: memref<32x128xbf16, #tpu.memory_space<vmem>>, %arg5: memref<1x32xf32, #tpu.memory_space<vmem>>, %arg6: memref<1x32xf32, #tpu.memory_space<vmem>>, %arg7: memref<1x128xf32, #tpu.memory_space<vmem>>, %arg8: memref<10x128xbf16, #tpu.memory_space<vmem>>, %arg9: memref<10x128xf32, #tpu.memory_space<vmem>>) attributes {dimension_semantics = [#tpu.dimension_semantics<parallel>, #tpu.dimension_semantics<parallel>, #tpu.dimension_semantics<arbitrary>], iteration_bounds = array<i64: 1, 1, 1>, scalar_prefetch = 0 : i64, scratch_operands = 1 : i64, tpu.core_type = #tpu.core_type<tc>, window_params = [{transform_indices = @transform_0, window_bounds = array<i64: 10, 32>}, {transform_indices = @transform_1, window_bounds = array<i64: 32, 128>}, {pipeline_mode = #tpu.pipeline_mode<synchronous>, transform_indices = @transform_2, window_bounds = array<i64: 1, 32>}, {pipeline_mode = #tpu.pipeline_mode<synchronous>, transform_indices = @transform_3, window_bounds = array<i64: 1, 32>}, {transform_indices = @transform_4, window_bounds = array<i64: 1, 128>}, {transform_indices = @transform_5, window_bounds = array<i64: 10, 128>}]} {
    %c0_i32 = arith.constant 0 : i32
    %0 = arith.cmpi eq, %arg2, %c0_i32 : i32
    %1 = arith.extui %0 : i1 to i32
    %c0_i32_0 = arith.constant 0 : i32
    %2 = arith.cmpi ne, %1, %c0_i32_0 : i32
    scf.if %2 {
      %cst_19 = arith.constant 0.000000e+00 : f32
      %36 = vector.broadcast %cst_19 : f32 to vector<10x128xf32>
      %c0_20 = arith.constant 0 : index
      %c0_21 = arith.constant 0 : index
      %37 = vector.load %arg9[%c0_20, %c0_21] : memref<10x128xf32, #tpu.memory_space<vmem>>, vector<10x128xf32>
      tpu.vector_store %arg9[%c0_20, %c0_21], %36 {strides = array<i32>} : memref<10x128xf32, #tpu.memory_space<vmem>>, vector<10x128xf32>,
    } else {
    }
    %c0 = arith.constant 0 : index
    %c0_1 = arith.constant 0 : index
    %3 = vector.load %arg3[%c0, %c0_1] : memref<10x32xbf16, #tpu.memory_space<vmem>>, vector<10x32xbf16>
    %4 = arith.extf %3 : vector<10x32xbf16> to vector<10x32xf32>
    %cst = arith.constant dense<0.000000e+00> : vector<10xf32>
    %5 = vector.multi_reduction <add>, %4, %cst [1] : vector<10x32xf32> to vector<10xf32>
    %6 = vector.shape_cast %5 : vector<10xf32> to vector<10x1xf32>
    %cst_2 = arith.constant 3.200000e+01 : f32
    %7 = vector.broadcast %cst_2 : f32 to vector<10x1xf32>
    %8 = arith.divf %6, %7 : vector<10x1xf32>
    %9 = vector.broadcast %8 : vector<10x1xf32> to vector<10x32xf32>
    %10 = arith.subf %4, %9 : vector<10x32xf32>
    %11 = arith.mulf %10, %10 : vector<10x32xf32>
    %cst_3 = arith.constant dense<0.000000e+00> : vector<10xf32>
    %12 = vector.multi_reduction <add>, %11, %cst_3 [1] : vector<10x32xf32> to vector<10xf32>
    %13 = vector.shape_cast %12 : vector<10xf32> to vector<10x1xf32>
    %cst_4 = arith.constant 3.200000e+01 : f32
    %14 = vector.broadcast %cst_4 : f32 to vector<10x1xf32>
    %15 = arith.divf %13, %14 : vector<10x1xf32>
    %cst_5 = arith.constant 9.99999974E-6 : f32
    %16 = vector.broadcast %cst_5 : f32 to vector<10x1xf32>
    %17 = arith.addf %15, %16 : vector<10x1xf32>
    %18 = math.rsqrt %17 : vector<10x1xf32>
    %19 = vector.broadcast %18 : vector<10x1xf32> to vector<10x32xf32>
    %20 = arith.mulf %10, %19 : vector<10x32xf32>
    %c0_6 = arith.constant 0 : index
    %c0_7 = arith.constant 0 : index
    %21 = vector.load %arg5[%c0_6, %c0_7] : memref<1x32xf32, #tpu.memory_space<vmem>>, vector<1x32xf32>
    %22 = vector.broadcast %21 : vector<1x32xf32> to vector<10x32xf32>
    %23 = arith.mulf %20, %22 : vector<10x32xf32>
    %c0_8 = arith.constant 0 : index
    %c0_9 = arith.constant 0 : index
    %24 = vector.load %arg6[%c0_8, %c0_9] : memref<1x32xf32, #tpu.memory_space<vmem>>, vector<1x32xf32>
    %25 = vector.broadcast %24 : vector<1x32xf32> to vector<10x32xf32>
    %26 = arith.addf %23, %25 : vector<10x32xf32>
    %27 = arith.truncf %26 : vector<10x32xf32> to vector<10x32xbf16>
    %c0_10 = arith.constant 0 : index
    %c0_11 = arith.constant 0 : index
    %28 = vector.load %arg9[%c0_10, %c0_11] : memref<10x128xf32, #tpu.memory_space<vmem>>, vector<10x128xf32>
    %c0_12 = arith.constant 0 : index
    %c0_13 = arith.constant 0 : index
    %29 = vector.load %arg4[%c0_12, %c0_13] : memref<32x128xbf16, #tpu.memory_space<vmem>>, vector<32x128xbf16>
    %cst_14 = arith.constant dense<0.000000e+00> : vector<10x128xf32>
    %30 = tpu.matmul %27, %29, %cst_14 {dimension_numbers = #tpu.dot_dimension_numbers<[1], [0], [0], [1], [0, 0, 1, 1], [], []>} : vector<10x32xbf16>, vector<32x128xbf16>, vector<10x128xf32> -> vector<10x128xf32>
    %31 = arith.addf %28, %30 : vector<10x128xf32>
    %c0_15 = arith.constant 0 : index
    %c0_16 = arith.constant 0 : index
    %32 = vector.load %arg9[%c0_15, %c0_16] : memref<10x128xf32, #tpu.memory_space<vmem>>, vector<10x128xf32>
    tpu.vector_store %arg9[%c0_15, %c0_16], %31 {strides = array<i32>} : memref<10x128xf32, #tpu.memory_space<vmem>>, vector<10x128xf32>,
    %c0_i32_17 = arith.constant 0 : i32
    %33 = arith.cmpi eq, %arg2, %c0_i32_17 : i32
    %34 = arith.extui %33 : i1 to i32
    %c0_i32_18 = arith.constant 0 : i32
    %35 = arith.cmpi ne, %34, %c0_i32_18 : i32
    scf.if %35 {
      %c0_19 = arith.constant 0 : index
      %c0_20 = arith.constant 0 : index
      %36 = vector.load %arg9[%c0_19, %c0_20] : memref<10x128xf32, #tpu.memory_space<vmem>>, vector<10x128xf32>
      %c0_21 = arith.constant 0 : index
      %c0_22 = arith.constant 0 : index
      %37 = vector.load %arg7[%c0_21, %c0_22] : memref<1x128xf32, #tpu.memory_space<vmem>>, vector<1x128xf32>
      %38 = vector.broadcast %37 : vector<1x128xf32> to vector<10x128xf32>
      %39 = arith.addf %36, %38 : vector<10x128xf32>
      %cst_23 = arith.constant 1.702000e+00 : f32
      %40 = vector.broadcast %cst_23 : f32 to vector<10x128xf32>
      %41 = arith.mulf %40, %39 : vector<10x128xf32>
      %42 = arith.negf %41 : vector<10x128xf32>
      %43 = math.exp %42 : vector<10x128xf32>
      %cst_24 = arith.constant 1.000000e+00 : f32
      %44 = vector.broadcast %cst_24 : f32 to vector<10x128xf32>
      %45 = arith.addf %44, %43 : vector<10x128xf32>
      %46 = arith.divf %44, %45 : vector<10x128xf32>
      %47 = arith.mulf %39, %46 : vector<10x128xf32>
      %48 = arith.truncf %47 : vector<10x128xf32> to vector<10x128xbf16>
      %c0_25 = arith.constant 0 : index
      %c0_26 = arith.constant 0 : index
      %49 = vector.load %arg8[%c0_25, %c0_26] : memref<10x128xbf16, #tpu.memory_space<vmem>>, vector<10x128xbf16>
      tpu.vector_store %arg8[%c0_25, %c0_26], %48 {strides = array<i32>} : memref<10x128xbf16, #tpu.memory_space<vmem>>, vector<10x128xbf16>,
    } else {
    }
    return
  }
  func.func @transform_0(%arg0: i32, %arg1: i32, %arg2: i32) -> (i32, i32) {
    %c0_i32 = arith.constant 0 : i32
    return %arg0, %arg2 : i32, i32
  }
  func.func @transform_1(%arg0: i32, %arg1: i32, %arg2: i32) -> (i32, i32) {
    %c0_i32 = arith.constant 0 : i32
    return %arg2, %arg1 : i32, i32
  }
  func.func @transform_2(%arg0: i32, %arg1: i32, %arg2: i32) -> (i32, i32) {
    %c0_i32 = arith.constant 0 : i32
    %c0_i32_0 = arith.constant 0 : i32
    %c0_i32_1 = arith.constant 0 : i32
    return %c0_i32, %c0_i32_0 : i32, i32
  }
  func.func @transform_3(%arg0: i32, %arg1: i32, %arg2: i32) -> (i32, i32) {
    %c0_i32 = arith.constant 0 : i32
    %c0_i32_0 = arith.constant 0 : i32
    %c0_i32_1 = arith.constant 0 : i32
    return %c0_i32, %c0_i32_0 : i32, i32
  }
  func.func @transform_4(%arg0: i32, %arg1: i32, %arg2: i32) -> (i32, i32) {
    %c0_i32 = arith.constant 0 : i32
    %c0_i32_0 = arith.constant 0 : i32
    return %c0_i32, %arg1 : i32, i32
  }
  func.func @transform_5(%arg0: i32, %arg1: i32, %arg2: i32) -> (i32, i32) {
    %c0_i32 = arith.constant 0 : i32
    return %arg0, %arg1 : i32, i32
  }
}

module attributes {stable_mosaic.version = 11 : i64} {
  func.func @kernel(%arg0: i32, %arg1: i32, %arg2: i32, %arg3: memref<10x128xbf16, #tpu.memory_space<vmem>>, %arg4: memref<128x32xbf16, #tpu.memory_space<vmem>>, %arg5: memref<1x32xf32, #tpu.memory_space<vmem>>, %arg6: memref<10x32xbf16, #tpu.memory_space<vmem>>, %arg7: memref<10x32xbf16, #tpu.memory_space<vmem>>, %arg8: memref<10x32xf32, #tpu.memory_space<vmem>>) attributes {dimension_semantics = [#tpu.dimension_semantics<parallel>, #tpu.dimension_semantics<parallel>, #tpu.dimension_semantics<arbitrary>], iteration_bounds = array<i64: 1, 1, 1>, scalar_prefetch = 0 : i64, scratch_operands = 1 : i64, tpu.core_type = #tpu.core_type<tc>, window_params = [{transform_indices = @transform_0, window_bounds = array<i64: 10, 128>}, {transform_indices = @transform_1, window_bounds = array<i64: 128, 32>}, {transform_indices = @transform_2, window_bounds = array<i64: 1, 32>}, {transform_indices = @transform_3, window_bounds = array<i64: 10, 32>}, {transform_indices = @transform_4, window_bounds = array<i64: 10, 32>}]} {
    %c0_i32 = arith.constant 0 : i32
    %0 = arith.cmpi eq, %arg2, %c0_i32 : i32
    %1 = arith.extui %0 : i1 to i32
    %c0_i32_0 = arith.constant 0 : i32
    %2 = arith.cmpi ne, %1, %c0_i32_0 : i32
    scf.if %2 {
      %cst_10 = arith.constant 0.000000e+00 : f32
      %12 = vector.broadcast %cst_10 : f32 to vector<10x32xf32>
      %c0_11 = arith.constant 0 : index
      %c0_12 = arith.constant 0 : index
      %13 = vector.load %arg8[%c0_11, %c0_12] : memref<10x32xf32, #tpu.memory_space<vmem>>, vector<10x32xf32>
      tpu.vector_store %arg8[%c0_11, %c0_12], %12 {strides = array<i32>} : memref<10x32xf32, #tpu.memory_space<vmem>>, vector<10x32xf32>,
    } else {
    }
    %c0 = arith.constant 0 : index
    %c0_1 = arith.constant 0 : index
    %3 = vector.load %arg3[%c0, %c0_1] : memref<10x128xbf16, #tpu.memory_space<vmem>>, vector<10x128xbf16>
    %c0_2 = arith.constant 0 : index
    %c0_3 = arith.constant 0 : index
    %4 = vector.load %arg8[%c0_2, %c0_3] : memref<10x32xf32, #tpu.memory_space<vmem>>, vector<10x32xf32>
    %c0_4 = arith.constant 0 : index
    %c0_5 = arith.constant 0 : index
    %5 = vector.load %arg4[%c0_4, %c0_5] : memref<128x32xbf16, #tpu.memory_space<vmem>>, vector<128x32xbf16>
    %cst = arith.constant dense<0.000000e+00> : vector<10x32xf32>
    %6 = tpu.matmul %3, %5, %cst {dimension_numbers = #tpu.dot_dimension_numbers<[1], [0], [0], [1], [0, 0, 1, 1], [], []>} : vector<10x128xbf16>, vector<128x32xbf16>, vector<10x32xf32> -> vector<10x32xf32>
    %7 = arith.addf %4, %6 : vector<10x32xf32>
    %c0_6 = arith.constant 0 : index
    %c0_7 = arith.constant 0 : index
    %8 = vector.load %arg8[%c0_6, %c0_7] : memref<10x32xf32, #tpu.memory_space<vmem>>, vector<10x32xf32>
    tpu.vector_store %arg8[%c0_6, %c0_7], %7 {strides = array<i32>} : memref<10x32xf32, #tpu.memory_space<vmem>>, vector<10x32xf32>,
    %c0_i32_8 = arith.constant 0 : i32
    %9 = arith.cmpi eq, %arg2, %c0_i32_8 : i32
    %10 = arith.extui %9 : i1 to i32
    %c0_i32_9 = arith.constant 0 : i32
    %11 = arith.cmpi ne, %10, %c0_i32_9 : i32
    scf.if %11 {
      %c0_10 = arith.constant 0 : index
      %c0_11 = arith.constant 0 : index
      %12 = vector.load %arg8[%c0_10, %c0_11] : memref<10x32xf32, #tpu.memory_space<vmem>>, vector<10x32xf32>
      %c0_12 = arith.constant 0 : index
      %c0_13 = arith.constant 0 : index
      %13 = vector.load %arg5[%c0_12, %c0_13] : memref<1x32xf32, #tpu.memory_space<vmem>>, vector<1x32xf32>
      %14 = vector.broadcast %13 : vector<1x32xf32> to vector<10x32xf32>
      %15 = arith.addf %12, %14 : vector<10x32xf32>
      %c0_14 = arith.constant 0 : index
      %c0_15 = arith.constant 0 : index
      %16 = vector.load %arg6[%c0_14, %c0_15] : memref<10x32xbf16, #tpu.memory_space<vmem>>, vector<10x32xbf16>
      %17 = arith.extf %16 : vector<10x32xbf16> to vector<10x32xf32>
      %18 = arith.addf %15, %17 : vector<10x32xf32>
      %19 = arith.truncf %18 : vector<10x32xf32> to vector<10x32xbf16>
      %c0_16 = arith.constant 0 : index
      %c0_17 = arith.constant 0 : index
      %20 = vector.load %arg7[%c0_16, %c0_17] : memref<10x32xbf16, #tpu.memory_space<vmem>>, vector<10x32xbf16>
      tpu.vector_store %arg7[%c0_16, %c0_17], %19 {strides = array<i32>} : memref<10x32xbf16, #tpu.memory_space<vmem>>, vector<10x32xbf16>,
    } else {
    }
    return
  }
  func.func @transform_0(%arg0: i32, %arg1: i32, %arg2: i32) -> (i32, i32) {
    %c0_i32 = arith.constant 0 : i32
    return %arg0, %arg2 : i32, i32
  }
  func.func @transform_1(%arg0: i32, %arg1: i32, %arg2: i32) -> (i32, i32) {
    %c0_i32 = arith.constant 0 : i32
    return %arg2, %arg1 : i32, i32
  }
  func.func @transform_2(%arg0: i32, %arg1: i32, %arg2: i32) -> (i32, i32) {
    %c0_i32 = arith.constant 0 : i32
    %c0_i32_0 = arith.constant 0 : i32
    return %c0_i32, %arg1 : i32, i32
  }
  func.func @transform_3(%arg0: i32, %arg1: i32, %arg2: i32) -> (i32, i32) {
    %c0_i32 = arith.constant 0 : i32
    return %arg0, %arg1 : i32, i32
  }
  func.func @transform_4(%arg0: i32, %arg1: i32, %arg2: i32) -> (i32, i32) {
    %c0_i32 = arith.constant 0 : i32
    return %arg0, %arg1 : i32, i32
  }
}

module attributes {stable_mosaic.version = 11 : i64} {
  func.func @_ln_kernel(%arg0: i32, %arg1: memref<8x32xbf16, #tpu.memory_space<vmem>>, %arg2: memref<1x32xf32, #tpu.memory_space<vmem>>, %arg3: memref<1x32xf32, #tpu.memory_space<vmem>>, %arg4: memref<8x32xbf16, #tpu.memory_space<vmem>>) attributes {dimension_semantics = [#tpu.dimension_semantics<parallel>], iteration_bounds = array<i64: 1>, scalar_prefetch = 0 : i64, scratch_operands = 0 : i64, tpu.core_type = #tpu.core_type<tc>, window_params = [{transform_indices = @transform_0, window_bounds = array<i64: 8, 32>}, {pipeline_mode = #tpu.pipeline_mode<synchronous>, transform_indices = @transform_1, window_bounds = array<i64: 1, 32>}, {pipeline_mode = #tpu.pipeline_mode<synchronous>, transform_indices = @transform_2, window_bounds = array<i64: 1, 32>}, {transform_indices = @transform_3, window_bounds = array<i64: 8, 32>}]} {
    %c0 = arith.constant 0 : index
    %c0_0 = arith.constant 0 : index
    %0 = vector.load %arg1[%c0, %c0_0] : memref<8x32xbf16, #tpu.memory_space<vmem>>, vector<8x32xbf16>
    %1 = arith.extf %0 : vector<8x32xbf16> to vector<8x32xf32>
    %cst = arith.constant dense<0.000000e+00> : vector<8xf32>
    %2 = vector.multi_reduction <add>, %1, %cst [1] : vector<8x32xf32> to vector<8xf32>
    %3 = vector.shape_cast %2 : vector<8xf32> to vector<8x1xf32>
    %cst_1 = arith.constant 3.200000e+01 : f32
    %4 = vector.broadcast %cst_1 : f32 to vector<8x1xf32>
    %5 = arith.divf %3, %4 : vector<8x1xf32>
    %6 = vector.broadcast %5 : vector<8x1xf32> to vector<8x32xf32>
    %7 = arith.subf %1, %6 : vector<8x32xf32>
    %8 = arith.mulf %7, %7 : vector<8x32xf32>
    %cst_2 = arith.constant dense<0.000000e+00> : vector<8xf32>
    %9 = vector.multi_reduction <add>, %8, %cst_2 [1] : vector<8x32xf32> to vector<8xf32>
    %10 = vector.shape_cast %9 : vector<8xf32> to vector<8x1xf32>
    %cst_3 = arith.constant 3.200000e+01 : f32
    %11 = vector.broadcast %cst_3 : f32 to vector<8x1xf32>
    %12 = arith.divf %10, %11 : vector<8x1xf32>
    %cst_4 = arith.constant 9.99999974E-6 : f32
    %13 = vector.broadcast %cst_4 : f32 to vector<8x1xf32>
    %14 = arith.addf %12, %13 : vector<8x1xf32>
    %15 = math.rsqrt %14 : vector<8x1xf32>
    %16 = vector.broadcast %15 : vector<8x1xf32> to vector<8x32xf32>
    %17 = arith.mulf %7, %16 : vector<8x32xf32>
    %c0_5 = arith.constant 0 : index
    %c0_6 = arith.constant 0 : index
    %18 = vector.load %arg2[%c0_5, %c0_6] : memref<1x32xf32, #tpu.memory_space<vmem>>, vector<1x32xf32>
    %19 = vector.broadcast %18 : vector<1x32xf32> to vector<8x32xf32>
    %20 = arith.mulf %17, %19 : vector<8x32xf32>
    %c0_7 = arith.constant 0 : index
    %c0_8 = arith.constant 0 : index
    %21 = vector.load %arg3[%c0_7, %c0_8] : memref<1x32xf32, #tpu.memory_space<vmem>>, vector<1x32xf32>
    %22 = vector.broadcast %21 : vector<1x32xf32> to vector<8x32xf32>
    %23 = arith.addf %20, %22 : vector<8x32xf32>
    %24 = arith.truncf %23 : vector<8x32xf32> to vector<8x32xbf16>
    %c0_9 = arith.constant 0 : index
    %c0_10 = arith.constant 0 : index
    %25 = vector.load %arg4[%c0_9, %c0_10] : memref<8x32xbf16, #tpu.memory_space<vmem>>, vector<8x32xbf16>
    tpu.vector_store %arg4[%c0_9, %c0_10], %24 {strides = array<i32>} : memref<8x32xbf16, #tpu.memory_space<vmem>>, vector<8x32xbf16>,
    return
  }
  func.func @transform_0(%arg0: i32) -> (i32, i32) {
    %c0_i32 = arith.constant 0 : i32
    %c0_i32_0 = arith.constant 0 : i32
    return %arg0, %c0_i32 : i32, i32
  }
  func.func @transform_1(%arg0: i32) -> (i32, i32) {
    %c0_i32 = arith.constant 0 : i32
    %c0_i32_0 = arith.constant 0 : i32
    %c0_i32_1 = arith.constant 0 : i32
    return %c0_i32, %c0_i32_0 : i32, i32
  }
  func.func @transform_2(%arg0: i32) -> (i32, i32) {
    %c0_i32 = arith.constant 0 : i32
    %c0_i32_0 = arith.constant 0 : i32
    %c0_i32_1 = arith.constant 0 : i32
    return %c0_i32, %c0_i32_0 : i32, i32
  }
  func.func @transform_3(%arg0: i32) -> (i32, i32) {
    %c0_i32 = arith.constant 0 : i32
    %c0_i32_0 = arith.constant 0 : i32
    return %arg0, %c0_i32 : i32, i32
  }
}

module attributes {stable_mosaic.version = 11 : i64} {
  func.func @kernel(%arg0: i32, %arg1: i32, %arg2: i32, %arg3: memref<8x32xbf16, #tpu.memory_space<vmem>>, %arg4: memref<32x32xbf16, #tpu.memory_space<vmem>>, %arg5: memref<1x32xf32, #tpu.memory_space<vmem>>, %arg6: memref<8x32xbf16, #tpu.memory_space<vmem>>, %arg7: memref<8x32xf32, #tpu.memory_space<vmem>>) attributes {dimension_semantics = [#tpu.dimension_semantics<parallel>, #tpu.dimension_semantics<parallel>, #tpu.dimension_semantics<arbitrary>], iteration_bounds = array<i64: 1, 1, 1>, scalar_prefetch = 0 : i64, scratch_operands = 1 : i64, tpu.core_type = #tpu.core_type<tc>, window_params = [{transform_indices = @transform_0, window_bounds = array<i64: 8, 32>}, {transform_indices = @transform_1, window_bounds = array<i64: 32, 32>}, {transform_indices = @transform_2, window_bounds = array<i64: 1, 32>}, {transform_indices = @transform_3, window_bounds = array<i64: 8, 32>}]} {
    %c0_i32 = arith.constant 0 : i32
    %0 = arith.cmpi eq, %arg2, %c0_i32 : i32
    %1 = arith.extui %0 : i1 to i32
    %c0_i32_0 = arith.constant 0 : i32
    %2 = arith.cmpi ne, %1, %c0_i32_0 : i32
    scf.if %2 {
      %cst_10 = arith.constant 0.000000e+00 : f32
      %12 = vector.broadcast %cst_10 : f32 to vector<8x32xf32>
      %c0_11 = arith.constant 0 : index
      %c0_12 = arith.constant 0 : index
      %13 = vector.load %arg7[%c0_11, %c0_12] : memref<8x32xf32, #tpu.memory_space<vmem>>, vector<8x32xf32>
      tpu.vector_store %arg7[%c0_11, %c0_12], %12 {strides = array<i32>} : memref<8x32xf32, #tpu.memory_space<vmem>>, vector<8x32xf32>,
    } else {
    }
    %c0 = arith.constant 0 : index
    %c0_1 = arith.constant 0 : index
    %3 = vector.load %arg3[%c0, %c0_1] : memref<8x32xbf16, #tpu.memory_space<vmem>>, vector<8x32xbf16>
    %c0_2 = arith.constant 0 : index
    %c0_3 = arith.constant 0 : index
    %4 = vector.load %arg7[%c0_2, %c0_3] : memref<8x32xf32, #tpu.memory_space<vmem>>, vector<8x32xf32>
    %c0_4 = arith.constant 0 : index
    %c0_5 = arith.constant 0 : index
    %5 = vector.load %arg4[%c0_4, %c0_5] : memref<32x32xbf16, #tpu.memory_space<vmem>>, vector<32x32xbf16>
    %cst = arith.constant dense<0.000000e+00> : vector<8x32xf32>
    %6 = tpu.matmul %3, %5, %cst {dimension_numbers = #tpu.dot_dimension_numbers<[1], [0], [0], [1], [0, 0, 1, 1], [], []>} : vector<8x32xbf16>, vector<32x32xbf16>, vector<8x32xf32> -> vector<8x32xf32>
    %7 = arith.addf %4, %6 : vector<8x32xf32>
    %c0_6 = arith.constant 0 : index
    %c0_7 = arith.constant 0 : index
    %8 = vector.load %arg7[%c0_6, %c0_7] : memref<8x32xf32, #tpu.memory_space<vmem>>, vector<8x32xf32>
    tpu.vector_store %arg7[%c0_6, %c0_7], %7 {strides = array<i32>} : memref<8x32xf32, #tpu.memory_space<vmem>>, vector<8x32xf32>,
    %c0_i32_8 = arith.constant 0 : i32
    %9 = arith.cmpi eq, %arg2, %c0_i32_8 : i32
    %10 = arith.extui %9 : i1 to i32
    %c0_i32_9 = arith.constant 0 : i32
    %11 = arith.cmpi ne, %10, %c0_i32_9 : i32
    scf.if %11 {
      %c0_10 = arith.constant 0 : index
      %c0_11 = arith.constant 0 : index
      %12 = vector.load %arg7[%c0_10, %c0_11] : memref<8x32xf32, #tpu.memory_space<vmem>>, vector<8x32xf32>
      %c0_12 = arith.constant 0 : index
      %c0_13 = arith.constant 0 : index
      %13 = vector.load %arg5[%c0_12, %c0_13] : memref<1x32xf32, #tpu.memory_space<vmem>>, vector<1x32xf32>
      %14 = vector.broadcast %13 : vector<1x32xf32> to vector<8x32xf32>
      %15 = arith.addf %12, %14 : vector<8x32xf32>
      %cst_14 = arith.constant 0.000000e+00 : f32
      %16 = vector.broadcast %cst_14 : f32 to vector<8x32xf32>
      %17 = arith.maximumf %15, %16 : vector<8x32xf32>
      %18 = arith.truncf %17 : vector<8x32xf32> to vector<8x32xbf16>
      %c0_15 = arith.constant 0 : index
      %c0_16 = arith.constant 0 : index
      %19 = vector.load %arg6[%c0_15, %c0_16] : memref<8x32xbf16, #tpu.memory_space<vmem>>, vector<8x32xbf16>
      tpu.vector_store %arg6[%c0_15, %c0_16], %18 {strides = array<i32>} : memref<8x32xbf16, #tpu.memory_space<vmem>>, vector<8x32xbf16>,
    } else {
    }
    return
  }
  func.func @transform_0(%arg0: i32, %arg1: i32, %arg2: i32) -> (i32, i32) {
    %c0_i32 = arith.constant 0 : i32
    return %arg0, %arg2 : i32, i32
  }
  func.func @transform_1(%arg0: i32, %arg1: i32, %arg2: i32) -> (i32, i32) {
    %c0_i32 = arith.constant 0 : i32
    return %arg2, %arg1 : i32, i32
  }
  func.func @transform_2(%arg0: i32, %arg1: i32, %arg2: i32) -> (i32, i32) {
    %c0_i32 = arith.constant 0 : i32
    %c0_i32_0 = arith.constant 0 : i32
    return %c0_i32, %arg1 : i32, i32
  }
  func.func @transform_3(%arg0: i32, %arg1: i32, %arg2: i32) -> (i32, i32) {
    %c0_i32 = arith.constant 0 : i32
    return %arg0, %arg1 : i32, i32
  }
}

module attributes {stable_mosaic.version = 11 : i64} {
  func.func @kernel(%arg0: i32, %arg1: i32, %arg2: i32, %arg3: memref<8x32xbf16, #tpu.memory_space<vmem>>, %arg4: memref<32x32xbf16, #tpu.memory_space<vmem>>, %arg5: memref<1x32xf32, #tpu.memory_space<vmem>>, %arg6: memref<8x32xbf16, #tpu.memory_space<vmem>>, %arg7: memref<8x32xf32, #tpu.memory_space<vmem>>) attributes {dimension_semantics = [#tpu.dimension_semantics<parallel>, #tpu.dimension_semantics<parallel>, #tpu.dimension_semantics<arbitrary>], iteration_bounds = array<i64: 1, 1, 1>, scalar_prefetch = 0 : i64, scratch_operands = 1 : i64, tpu.core_type = #tpu.core_type<tc>, window_params = [{transform_indices = @transform_0, window_bounds = array<i64: 8, 32>}, {transform_indices = @transform_1, window_bounds = array<i64: 32, 32>}, {transform_indices = @transform_2, window_bounds = array<i64: 1, 32>}, {transform_indices = @transform_3, window_bounds = array<i64: 8, 32>}]} {
    %c0_i32 = arith.constant 0 : i32
    %0 = arith.cmpi eq, %arg2, %c0_i32 : i32
    %1 = arith.extui %0 : i1 to i32
    %c0_i32_0 = arith.constant 0 : i32
    %2 = arith.cmpi ne, %1, %c0_i32_0 : i32
    scf.if %2 {
      %cst_10 = arith.constant 0.000000e+00 : f32
      %12 = vector.broadcast %cst_10 : f32 to vector<8x32xf32>
      %c0_11 = arith.constant 0 : index
      %c0_12 = arith.constant 0 : index
      %13 = vector.load %arg7[%c0_11, %c0_12] : memref<8x32xf32, #tpu.memory_space<vmem>>, vector<8x32xf32>
      tpu.vector_store %arg7[%c0_11, %c0_12], %12 {strides = array<i32>} : memref<8x32xf32, #tpu.memory_space<vmem>>, vector<8x32xf32>,
    } else {
    }
    %c0 = arith.constant 0 : index
    %c0_1 = arith.constant 0 : index
    %3 = vector.load %arg3[%c0, %c0_1] : memref<8x32xbf16, #tpu.memory_space<vmem>>, vector<8x32xbf16>
    %c0_2 = arith.constant 0 : index
    %c0_3 = arith.constant 0 : index
    %4 = vector.load %arg7[%c0_2, %c0_3] : memref<8x32xf32, #tpu.memory_space<vmem>>, vector<8x32xf32>
    %c0_4 = arith.constant 0 : index
    %c0_5 = arith.constant 0 : index
    %5 = vector.load %arg4[%c0_4, %c0_5] : memref<32x32xbf16, #tpu.memory_space<vmem>>, vector<32x32xbf16>
    %cst = arith.constant dense<0.000000e+00> : vector<8x32xf32>
    %6 = tpu.matmul %3, %5, %cst {dimension_numbers = #tpu.dot_dimension_numbers<[1], [0], [0], [1], [0, 0, 1, 1], [], []>} : vector<8x32xbf16>, vector<32x32xbf16>, vector<8x32xf32> -> vector<8x32xf32>
    %7 = arith.addf %4, %6 : vector<8x32xf32>
    %c0_6 = arith.constant 0 : index
    %c0_7 = arith.constant 0 : index
    %8 = vector.load %arg7[%c0_6, %c0_7] : memref<8x32xf32, #tpu.memory_space<vmem>>, vector<8x32xf32>
    tpu.vector_store %arg7[%c0_6, %c0_7], %7 {strides = array<i32>} : memref<8x32xf32, #tpu.memory_space<vmem>>, vector<8x32xf32>,
    %c0_i32_8 = arith.constant 0 : i32
    %9 = arith.cmpi eq, %arg2, %c0_i32_8 : i32
    %10 = arith.extui %9 : i1 to i32
    %c0_i32_9 = arith.constant 0 : i32
    %11 = arith.cmpi ne, %10, %c0_i32_9 : i32
    scf.if %11 {
      %c0_10 = arith.constant 0 : index
      %c0_11 = arith.constant 0 : index
      %12 = vector.load %arg7[%c0_10, %c0_11] : memref<8x32xf32, #tpu.memory_space<vmem>>, vector<8x32xf32>
      %c0_12 = arith.constant 0 : index
      %c0_13 = arith.constant 0 : index
      %13 = vector.load %arg5[%c0_12, %c0_13] : memref<1x32xf32, #tpu.memory_space<vmem>>, vector<1x32xf32>
      %14 = vector.broadcast %13 : vector<1x32xf32> to vector<8x32xf32>
      %15 = arith.addf %12, %14 : vector<8x32xf32>
      %16 = arith.truncf %15 : vector<8x32xf32> to vector<8x32xbf16>
      %c0_14 = arith.constant 0 : index
      %c0_15 = arith.constant 0 : index
      %17 = vector.load %arg6[%c0_14, %c0_15] : memref<8x32xbf16, #tpu.memory_space<vmem>>, vector<8x32xbf16>
      tpu.vector_store %arg6[%c0_14, %c0_15], %16 {strides = array<i32>} : memref<8x32xbf16, #tpu.memory_space<vmem>>, vector<8x32xbf16>,
    } else {
    }
    return
  }
  func.func @transform_0(%arg0: i32, %arg1: i32, %arg2: i32) -> (i32, i32) {
    %c0_i32 = arith.constant 0 : i32
    return %arg0, %arg2 : i32, i32
  }
  func.func @transform_1(%arg0: i32, %arg1: i32, %arg2: i32) -> (i32, i32) {
    %c0_i32 = arith.constant 0 : i32
    return %arg2, %arg1 : i32, i32
  }
  func.func @transform_2(%arg0: i32, %arg1: i32, %arg2: i32) -> (i32, i32) {
    %c0_i32 = arith.constant 0 : i32
    %c0_i32_0 = arith.constant 0 : i32
    return %c0_i32, %arg1 : i32, i32
  }
  func.func @transform_3(%arg0: i32, %arg1: i32, %arg2: i32) -> (i32, i32) {
    %c0_i32 = arith.constant 0 : i32
    return %arg0, %arg1 : i32, i32
  }
}

module attributes {stable_mosaic.version = 11 : i64} {
  func.func @kernel(%arg0: i32, %arg1: i32, %arg2: i32, %arg3: memref<8x32xbf16, #tpu.memory_space<vmem>>, %arg4: memref<32x32xbf16, #tpu.memory_space<vmem>>, %arg5: memref<1x32xf32, #tpu.memory_space<vmem>>, %arg6: memref<8x32xbf16, #tpu.memory_space<vmem>>, %arg7: memref<8x32xf32, #tpu.memory_space<vmem>>, %arg8: memref<8x32xf32, #tpu.memory_space<vmem>>) attributes {dimension_semantics = [#tpu.dimension_semantics<parallel>, #tpu.dimension_semantics<parallel>, #tpu.dimension_semantics<arbitrary>], iteration_bounds = array<i64: 1, 1, 1>, scalar_prefetch = 0 : i64, scratch_operands = 1 : i64, tpu.core_type = #tpu.core_type<tc>, window_params = [{transform_indices = @transform_0, window_bounds = array<i64: 8, 32>}, {transform_indices = @transform_1, window_bounds = array<i64: 32, 32>}, {transform_indices = @transform_2, window_bounds = array<i64: 1, 32>}, {transform_indices = @transform_3, window_bounds = array<i64: 8, 32>}, {transform_indices = @transform_4, window_bounds = array<i64: 8, 32>}]} {
    %c0_i32 = arith.constant 0 : i32
    %0 = arith.cmpi eq, %arg2, %c0_i32 : i32
    %1 = arith.extui %0 : i1 to i32
    %c0_i32_0 = arith.constant 0 : i32
    %2 = arith.cmpi ne, %1, %c0_i32_0 : i32
    scf.if %2 {
      %cst_10 = arith.constant 0.000000e+00 : f32
      %12 = vector.broadcast %cst_10 : f32 to vector<8x32xf32>
      %c0_11 = arith.constant 0 : index
      %c0_12 = arith.constant 0 : index
      %13 = vector.load %arg8[%c0_11, %c0_12] : memref<8x32xf32, #tpu.memory_space<vmem>>, vector<8x32xf32>
      tpu.vector_store %arg8[%c0_11, %c0_12], %12 {strides = array<i32>} : memref<8x32xf32, #tpu.memory_space<vmem>>, vector<8x32xf32>,
    } else {
    }
    %c0 = arith.constant 0 : index
    %c0_1 = arith.constant 0 : index
    %3 = vector.load %arg3[%c0, %c0_1] : memref<8x32xbf16, #tpu.memory_space<vmem>>, vector<8x32xbf16>
    %c0_2 = arith.constant 0 : index
    %c0_3 = arith.constant 0 : index
    %4 = vector.load %arg8[%c0_2, %c0_3] : memref<8x32xf32, #tpu.memory_space<vmem>>, vector<8x32xf32>
    %c0_4 = arith.constant 0 : index
    %c0_5 = arith.constant 0 : index
    %5 = vector.load %arg4[%c0_4, %c0_5] : memref<32x32xbf16, #tpu.memory_space<vmem>>, vector<32x32xbf16>
    %cst = arith.constant dense<0.000000e+00> : vector<8x32xf32>
    %6 = tpu.matmul %3, %5, %cst {dimension_numbers = #tpu.dot_dimension_numbers<[1], [0], [0], [1], [0, 0, 1, 1], [], []>} : vector<8x32xbf16>, vector<32x32xbf16>, vector<8x32xf32> -> vector<8x32xf32>
    %7 = arith.addf %4, %6 : vector<8x32xf32>
    %c0_6 = arith.constant 0 : index
    %c0_7 = arith.constant 0 : index
    %8 = vector.load %arg8[%c0_6, %c0_7] : memref<8x32xf32, #tpu.memory_space<vmem>>, vector<8x32xf32>
    tpu.vector_store %arg8[%c0_6, %c0_7], %7 {strides = array<i32>} : memref<8x32xf32, #tpu.memory_space<vmem>>, vector<8x32xf32>,
    %c0_i32_8 = arith.constant 0 : i32
    %9 = arith.cmpi eq, %arg2, %c0_i32_8 : i32
    %10 = arith.extui %9 : i1 to i32
    %c0_i32_9 = arith.constant 0 : i32
    %11 = arith.cmpi ne, %10, %c0_i32_9 : i32
    scf.if %11 {
      %c0_10 = arith.constant 0 : index
      %c0_11 = arith.constant 0 : index
      %12 = vector.load %arg8[%c0_10, %c0_11] : memref<8x32xf32, #tpu.memory_space<vmem>>, vector<8x32xf32>
      %c0_12 = arith.constant 0 : index
      %c0_13 = arith.constant 0 : index
      %13 = vector.load %arg5[%c0_12, %c0_13] : memref<1x32xf32, #tpu.memory_space<vmem>>, vector<1x32xf32>
      %14 = vector.broadcast %13 : vector<1x32xf32> to vector<8x32xf32>
      %15 = arith.addf %12, %14 : vector<8x32xf32>
      %c0_14 = arith.constant 0 : index
      %c0_15 = arith.constant 0 : index
      %16 = vector.load %arg6[%c0_14, %c0_15] : memref<8x32xbf16, #tpu.memory_space<vmem>>, vector<8x32xbf16>
      %17 = arith.extf %16 : vector<8x32xbf16> to vector<8x32xf32>
      %18 = arith.addf %15, %17 : vector<8x32xf32>
      %c0_16 = arith.constant 0 : index
      %c0_17 = arith.constant 0 : index
      %19 = vector.load %arg7[%c0_16, %c0_17] : memref<8x32xf32, #tpu.memory_space<vmem>>, vector<8x32xf32>
      tpu.vector_store %arg7[%c0_16, %c0_17], %18 {strides = array<i32>} : memref<8x32xf32, #tpu.memory_space<vmem>>, vector<8x32xf32>,
    } else {
    }
    return
  }
  func.func @transform_0(%arg0: i32, %arg1: i32, %arg2: i32) -> (i32, i32) {
    %c0_i32 = arith.constant 0 : i32
    return %arg0, %arg2 : i32, i32
  }
  func.func @transform_1(%arg0: i32, %arg1: i32, %arg2: i32) -> (i32, i32) {
    %c0_i32 = arith.constant 0 : i32
    return %arg2, %arg1 : i32, i32
  }
  func.func @transform_2(%arg0: i32, %arg1: i32, %arg2: i32) -> (i32, i32) {
    %c0_i32 = arith.constant 0 : i32
    %c0_i32_0 = arith.constant 0 : i32
    return %c0_i32, %arg1 : i32, i32
  }
  func.func @transform_3(%arg0: i32, %arg1: i32, %arg2: i32) -> (i32, i32) {
    %c0_i32 = arith.constant 0 : i32
    return %arg0, %arg1 : i32, i32
  }
  func.func @transform_4(%arg0: i32, %arg1: i32, %arg2: i32) -> (i32, i32) {
    %c0_i32 = arith.constant 0 : i32
    return %arg0, %arg1 : i32, i32
  }
}

module attributes {stable_mosaic.version = 11 : i64} {
  func.func @kernel(%arg0: i32, %arg1: i32, %arg2: i32, %arg3: memref<16x32xbf16, #tpu.memory_space<vmem>>, %arg4: memref<32x96xbf16, #tpu.memory_space<vmem>>, %arg5: memref<1x32xf32, #tpu.memory_space<vmem>>, %arg6: memref<1x32xf32, #tpu.memory_space<vmem>>, %arg7: memref<1x96xf32, #tpu.memory_space<vmem>>, %arg8: memref<16x96xbf16, #tpu.memory_space<vmem>>, %arg9: memref<16x96xf32, #tpu.memory_space<vmem>>) attributes {dimension_semantics = [#tpu.dimension_semantics<parallel>, #tpu.dimension_semantics<parallel>, #tpu.dimension_semantics<arbitrary>], iteration_bounds = array<i64: 1, 1, 1>, scalar_prefetch = 0 : i64, scratch_operands = 1 : i64, tpu.core_type = #tpu.core_type<tc>, window_params = [{transform_indices = @transform_0, window_bounds = array<i64: 16, 32>}, {transform_indices = @transform_1, window_bounds = array<i64: 32, 96>}, {pipeline_mode = #tpu.pipeline_mode<synchronous>, transform_indices = @transform_2, window_bounds = array<i64: 1, 32>}, {pipeline_mode = #tpu.pipeline_mode<synchronous>, transform_indices = @transform_3, window_bounds = array<i64: 1, 32>}, {transform_indices = @transform_4, window_bounds = array<i64: 1, 96>}, {transform_indices = @transform_5, window_bounds = array<i64: 16, 96>}]} {
    %c0_i32 = arith.constant 0 : i32
    %0 = arith.cmpi eq, %arg2, %c0_i32 : i32
    %1 = arith.extui %0 : i1 to i32
    %c0_i32_0 = arith.constant 0 : i32
    %2 = arith.cmpi ne, %1, %c0_i32_0 : i32
    scf.if %2 {
      %cst_19 = arith.constant 0.000000e+00 : f32
      %36 = vector.broadcast %cst_19 : f32 to vector<16x96xf32>
      %c0_20 = arith.constant 0 : index
      %c0_21 = arith.constant 0 : index
      %37 = vector.load %arg9[%c0_20, %c0_21] : memref<16x96xf32, #tpu.memory_space<vmem>>, vector<16x96xf32>
      tpu.vector_store %arg9[%c0_20, %c0_21], %36 {strides = array<i32>} : memref<16x96xf32, #tpu.memory_space<vmem>>, vector<16x96xf32>,
    } else {
    }
    %c0 = arith.constant 0 : index
    %c0_1 = arith.constant 0 : index
    %3 = vector.load %arg3[%c0, %c0_1] : memref<16x32xbf16, #tpu.memory_space<vmem>>, vector<16x32xbf16>
    %4 = arith.extf %3 : vector<16x32xbf16> to vector<16x32xf32>
    %cst = arith.constant dense<0.000000e+00> : vector<16xf32>
    %5 = vector.multi_reduction <add>, %4, %cst [1] : vector<16x32xf32> to vector<16xf32>
    %6 = vector.shape_cast %5 : vector<16xf32> to vector<16x1xf32>
    %cst_2 = arith.constant 3.200000e+01 : f32
    %7 = vector.broadcast %cst_2 : f32 to vector<16x1xf32>
    %8 = arith.divf %6, %7 : vector<16x1xf32>
    %9 = vector.broadcast %8 : vector<16x1xf32> to vector<16x32xf32>
    %10 = arith.subf %4, %9 : vector<16x32xf32>
    %11 = arith.mulf %10, %10 : vector<16x32xf32>
    %cst_3 = arith.constant dense<0.000000e+00> : vector<16xf32>
    %12 = vector.multi_reduction <add>, %11, %cst_3 [1] : vector<16x32xf32> to vector<16xf32>
    %13 = vector.shape_cast %12 : vector<16xf32> to vector<16x1xf32>
    %cst_4 = arith.constant 3.200000e+01 : f32
    %14 = vector.broadcast %cst_4 : f32 to vector<16x1xf32>
    %15 = arith.divf %13, %14 : vector<16x1xf32>
    %cst_5 = arith.constant 9.99999974E-6 : f32
    %16 = vector.broadcast %cst_5 : f32 to vector<16x1xf32>
    %17 = arith.addf %15, %16 : vector<16x1xf32>
    %18 = math.rsqrt %17 : vector<16x1xf32>
    %19 = vector.broadcast %18 : vector<16x1xf32> to vector<16x32xf32>
    %20 = arith.mulf %10, %19 : vector<16x32xf32>
    %c0_6 = arith.constant 0 : index
    %c0_7 = arith.constant 0 : index
    %21 = vector.load %arg5[%c0_6, %c0_7] : memref<1x32xf32, #tpu.memory_space<vmem>>, vector<1x32xf32>
    %22 = vector.broadcast %21 : vector<1x32xf32> to vector<16x32xf32>
    %23 = arith.mulf %20, %22 : vector<16x32xf32>
    %c0_8 = arith.constant 0 : index
    %c0_9 = arith.constant 0 : index
    %24 = vector.load %arg6[%c0_8, %c0_9] : memref<1x32xf32, #tpu.memory_space<vmem>>, vector<1x32xf32>
    %25 = vector.broadcast %24 : vector<1x32xf32> to vector<16x32xf32>
    %26 = arith.addf %23, %25 : vector<16x32xf32>
    %27 = arith.truncf %26 : vector<16x32xf32> to vector<16x32xbf16>
    %c0_10 = arith.constant 0 : index
    %c0_11 = arith.constant 0 : index
    %28 = vector.load %arg9[%c0_10, %c0_11] : memref<16x96xf32, #tpu.memory_space<vmem>>, vector<16x96xf32>
    %c0_12 = arith.constant 0 : index
    %c0_13 = arith.constant 0 : index
    %29 = vector.load %arg4[%c0_12, %c0_13] : memref<32x96xbf16, #tpu.memory_space<vmem>>, vector<32x96xbf16>
    %cst_14 = arith.constant dense<0.000000e+00> : vector<16x96xf32>
    %30 = tpu.matmul %27, %29, %cst_14 {dimension_numbers = #tpu.dot_dimension_numbers<[1], [0], [0], [1], [0, 0, 1, 1], [], []>} : vector<16x32xbf16>, vector<32x96xbf16>, vector<16x96xf32> -> vector<16x96xf32>
    %31 = arith.addf %28, %30 : vector<16x96xf32>
    %c0_15 = arith.constant 0 : index
    %c0_16 = arith.constant 0 : index
    %32 = vector.load %arg9[%c0_15, %c0_16] : memref<16x96xf32, #tpu.memory_space<vmem>>, vector<16x96xf32>
    tpu.vector_store %arg9[%c0_15, %c0_16], %31 {strides = array<i32>} : memref<16x96xf32, #tpu.memory_space<vmem>>, vector<16x96xf32>,
    %c0_i32_17 = arith.constant 0 : i32
    %33 = arith.cmpi eq, %arg2, %c0_i32_17 : i32
    %34 = arith.extui %33 : i1 to i32
    %c0_i32_18 = arith.constant 0 : i32
    %35 = arith.cmpi ne, %34, %c0_i32_18 : i32
    scf.if %35 {
      %c0_19 = arith.constant 0 : index
      %c0_20 = arith.constant 0 : index
      %36 = vector.load %arg9[%c0_19, %c0_20] : memref<16x96xf32, #tpu.memory_space<vmem>>, vector<16x96xf32>
      %c0_21 = arith.constant 0 : index
      %c0_22 = arith.constant 0 : index
      %37 = vector.load %arg7[%c0_21, %c0_22] : memref<1x96xf32, #tpu.memory_space<vmem>>, vector<1x96xf32>
      %38 = vector.broadcast %37 : vector<1x96xf32> to vector<16x96xf32>
      %39 = arith.addf %36, %38 : vector<16x96xf32>
      %40 = arith.truncf %39 : vector<16x96xf32> to vector<16x96xbf16>
      %c0_23 = arith.constant 0 : index
      %c0_24 = arith.constant 0 : index
      %41 = vector.load %arg8[%c0_23, %c0_24] : memref<16x96xbf16, #tpu.memory_space<vmem>>, vector<16x96xbf16>
      tpu.vector_store %arg8[%c0_23, %c0_24], %40 {strides = array<i32>} : memref<16x96xbf16, #tpu.memory_space<vmem>>, vector<16x96xbf16>,
    } else {
    }
    return
  }
  func.func @transform_0(%arg0: i32, %arg1: i32, %arg2: i32) -> (i32, i32) {
    %c0_i32 = arith.constant 0 : i32
    return %arg0, %arg2 : i32, i32
  }
  func.func @transform_1(%arg0: i32, %arg1: i32, %arg2: i32) -> (i32, i32) {
    %c0_i32 = arith.constant 0 : i32
    return %arg2, %arg1 : i32, i32
  }
  func.func @transform_2(%arg0: i32, %arg1: i32, %arg2: i32) -> (i32, i32) {
    %c0_i32 = arith.constant 0 : i32
    %c0_i32_0 = arith.constant 0 : i32
    %c0_i32_1 = arith.constant 0 : i32
    return %c0_i32, %c0_i32_0 : i32, i32
  }
  func.func @transform_3(%arg0: i32, %arg1: i32, %arg2: i32) -> (i32, i32) {
    %c0_i32 = arith.constant 0 : i32
    %c0_i32_0 = arith.constant 0 : i32
    %c0_i32_1 = arith.constant 0 : i32
    return %c0_i32, %c0_i32_0 : i32, i32
  }
  func.func @transform_4(%arg0: i32, %arg1: i32, %arg2: i32) -> (i32, i32) {
    %c0_i32 = arith.constant 0 : i32
    %c0_i32_0 = arith.constant 0 : i32
    return %c0_i32, %arg1 : i32, i32
  }
  func.func @transform_5(%arg0: i32, %arg1: i32, %arg2: i32) -> (i32, i32) {
    %c0_i32 = arith.constant 0 : i32
    return %arg0, %arg1 : i32, i32
  }
}

module attributes {stable_mosaic.version = 11 : i64} {
  func.func @_flash_attn_kernel(%arg0: i32, %arg1: i32, %arg2: i32, %arg3: memref<1x8x16xbf16, #tpu.memory_space<vmem>>, %arg4: memref<1x8x16xbf16, #tpu.memory_space<vmem>>, %arg5: memref<1x8x16xbf16, #tpu.memory_space<vmem>>, %arg6: memref<1x8x16xbf16, #tpu.memory_space<vmem>>, %arg7: memref<8x1xf32, #tpu.memory_space<vmem>>, %arg8: memref<8x1xf32, #tpu.memory_space<vmem>>, %arg9: memref<8x16xf32, #tpu.memory_space<vmem>>) attributes {dimension_semantics = [#tpu.dimension_semantics<parallel>, #tpu.dimension_semantics<parallel>, #tpu.dimension_semantics<arbitrary>], iteration_bounds = array<i64: 4, 1, 1>, scalar_prefetch = 0 : i64, scratch_operands = 3 : i64, tpu.core_type = #tpu.core_type<tc>, window_params = [{transform_indices = @transform_0, window_bounds = array<i64: 1, 8, 16>}, {transform_indices = @transform_1, window_bounds = array<i64: 1, 8, 16>}, {transform_indices = @transform_2, window_bounds = array<i64: 1, 8, 16>}, {transform_indices = @transform_3, window_bounds = array<i64: 1, 8, 16>}]} {
    %c0_i32 = arith.constant 0 : i32
    %0 = arith.cmpi eq, %arg2, %c0_i32 : i32
    %1 = arith.extui %0 : i1 to i32
    %c0_i32_0 = arith.constant 0 : i32
    %2 = arith.cmpi ne, %1, %c0_i32_0 : i32
    scf.if %2 {
      %cst_29 = arith.constant 0xFF800000 : f32
      %49 = vector.broadcast %cst_29 : f32 to vector<8x1xf32>
      %c0_30 = arith.constant 0 : index
      %c0_31 = arith.constant 0 : index
      %50 = vector.load %arg7[%c0_30, %c0_31] : memref<8x1xf32, #tpu.memory_space<vmem>>, vector<8x1xf32>
      tpu.vector_store %arg7[%c0_30, %c0_31], %49 {strides = array<i32>} : memref<8x1xf32, #tpu.memory_space<vmem>>, vector<8x1xf32>,
      %cst_32 = arith.constant 0.000000e+00 : f32
      %51 = vector.broadcast %cst_32 : f32 to vector<8x1xf32>
      %c0_33 = arith.constant 0 : index
      %c0_34 = arith.constant 0 : index
      %52 = vector.load %arg8[%c0_33, %c0_34] : memref<8x1xf32, #tpu.memory_space<vmem>>, vector<8x1xf32>
      tpu.vector_store %arg8[%c0_33, %c0_34], %51 {strides = array<i32>} : memref<8x1xf32, #tpu.memory_space<vmem>>, vector<8x1xf32>,
      %cst_35 = arith.constant 0.000000e+00 : f32
      %53 = vector.broadcast %cst_35 : f32 to vector<8x16xf32>
      %c0_36 = arith.constant 0 : index
      %c0_37 = arith.constant 0 : index
      %54 = vector.load %arg9[%c0_36, %c0_37] : memref<8x16xf32, #tpu.memory_space<vmem>>, vector<8x16xf32>
      tpu.vector_store %arg9[%c0_36, %c0_37], %53 {strides = array<i32>} : memref<8x16xf32, #tpu.memory_space<vmem>>, vector<8x16xf32>,
    } else {
    }
    %c0 = arith.constant 0 : index
    %c0_1 = arith.constant 0 : index
    %c0_2 = arith.constant 0 : index
    %3 = vector.load %arg3[%c0, %c0_1, %c0_2] : memref<1x8x16xbf16, #tpu.memory_space<vmem>>, vector<1x8x16xbf16>
    %4 = vector.shape_cast %3 : vector<1x8x16xbf16> to vector<8x16xbf16>
    %cst = arith.constant 2.500000e-01 : bf16
    %5 = vector.broadcast %cst : bf16 to vector<8x16xbf16>
    %6 = arith.mulf %4, %5 : vector<8x16xbf16>
    %c0_3 = arith.constant 0 : index
    %c0_4 = arith.constant 0 : index
    %c0_5 = arith.constant 0 : index
    %7 = vector.load %arg4[%c0_3, %c0_4, %c0_5] : memref<1x8x16xbf16, #tpu.memory_space<vmem>>, vector<1x8x16xbf16>
    %8 = vector.shape_cast %7 : vector<1x8x16xbf16> to vector<8x16xbf16>
    %cst_6 = arith.constant dense<0.000000e+00> : vector<8x8xf32>
    %9 = tpu.matmul %6, %8, %cst_6 {dimension_numbers = #tpu.dot_dimension_numbers<[1], [1], [0], [0], [0, 0, 1, 0], [], []>} : vector<8x16xbf16>, vector<8x16xbf16>, vector<8x8xf32> -> vector<8x8xf32>
    %c8_i32 = arith.constant 8 : i32
    %10 = arith.muli %arg1, %c8_i32 : i32
    %11 = tpu.iota {dimensions = array<i32: 0>} : vector<8x8xi32>
    %12 = vector.broadcast %10 : i32 to vector<8x8xi32>
    %13 = arith.addi %12, %11 : vector<8x8xi32>
    %c8_i32_7 = arith.constant 8 : i32
    %14 = arith.muli %arg2, %c8_i32_7 : i32
    %15 = tpu.iota {dimensions = array<i32: 1>} : vector<8x8xi32>
    %16 = vector.broadcast %14 : i32 to vector<8x8xi32>
    %17 = arith.addi %16, %15 : vector<8x8xi32>
    %18 = arith.cmpi sle, %17, %13 : vector<8x8xi32>
    %cst_8 = arith.constant -1.000000e+30 : f32
    %19 = vector.broadcast %cst_8 : f32 to vector<8x8xf32>
    %20 = arith.select %18, %9, %19 : vector<8x8xi1>, vector<8x8xf32>
    %c0_9 = arith.constant 0 : index
    %c0_10 = arith.constant 0 : index
    %21 = vector.load %arg7[%c0_9, %c0_10] : memref<8x1xf32, #tpu.memory_space<vmem>>, vector<8x1xf32>
    %cst_11 = arith.constant dense<0xFF800000> : vector<8xf32>
    %22 = vector.multi_reduction <maximumf>, %20, %cst_11 [1] : vector<8x8xf32> to vector<8xf32>
    %23 = vector.shape_cast %22 : vector<8xf32> to vector<8x1xf32>
    %24 = arith.maximumf %21, %23 : vector<8x1xf32>
    %25 = arith.subf %21, %24 : vector<8x1xf32>
    %26 = math.exp %25 : vector<8x1xf32>
    %27 = vector.broadcast %24 : vector<8x1xf32> to vector<8x8xf32>
    %28 = arith.subf %20, %27 : vector<8x8xf32>
    %29 = math.exp %28 : vector<8x8xf32>
    %c0_12 = arith.constant 0 : index
    %c0_13 = arith.constant 0 : index
    %30 = vector.load %arg8[%c0_12, %c0_13] : memref<8x1xf32, #tpu.memory_space<vmem>>, vector<8x1xf32>
    %31 = arith.mulf %26, %30 : vector<8x1xf32>
    %cst_14 = arith.constant dense<0.000000e+00> : vector<8xf32>
    %32 = vector.multi_reduction <add>, %29, %cst_14 [1] : vector<8x8xf32> to vector<8xf32>
    %33 = vector.shape_cast %32 : vector<8xf32> to vector<8x1xf32>
    %34 = arith.addf %31, %33 : vector<8x1xf32>
    %c0_15 = arith.constant 0 : index
    %c0_16 = arith.constant 0 : index
    %35 = vector.load %arg8[%c0_15, %c0_16] : memref<8x1xf32, #tpu.memory_space<vmem>>, vector<8x1xf32>
    tpu.vector_store %arg8[%c0_15, %c0_16], %34 {strides = array<i32>} : memref<8x1xf32, #tpu.memory_space<vmem>>, vector<8x1xf32>,
    %c0_17 = arith.constant 0 : index
    %c0_18 = arith.constant 0 : index
    %36 = vector.load %arg9[%c0_17, %c0_18] : memref<8x16xf32, #tpu.memory_space<vmem>>, vector<8x16xf32>
    %37 = vector.broadcast %26 : vector<8x1xf32> to vector<8x16xf32>
    %38 = arith.mulf %37, %36 : vector<8x16xf32>
    %39 = arith.truncf %29 : vector<8x8xf32> to vector<8x8xbf16>
    %c0_19 = arith.constant 0 : index
    %c0_20 = arith.constant 0 : index
    %c0_21 = arith.constant 0 : index
    %40 = vector.load %arg5[%c0_19, %c0_20, %c0_21] : memref<1x8x16xbf16, #tpu.memory_space<vmem>>, vector<1x8x16xbf16>
    %41 = vector.shape_cast %40 : vector<1x8x16xbf16> to vector<8x16xbf16>
    %cst_22 = arith.constant dense<0.000000e+00> : vector<8x16xf32>
    %42 = tpu.matmul %39, %41, %cst_22 {dimension_numbers = #tpu.dot_dimension_numbers<[1], [0], [0], [1], [0, 0, 1, 1], [], []>} : vector<8x8xbf16>, vector<8x16xbf16>, vector<8x16xf32> -> vector<8x16xf32>
    %43 = arith.addf %38, %42 : vector<8x16xf32>
    %c0_23 = arith.constant 0 : index
    %c0_24 = arith.constant 0 : index
    %44 = vector.load %arg9[%c0_23, %c0_24] : memref<8x16xf32, #tpu.memory_space<vmem>>, vector<8x16xf32>
    tpu.vector_store %arg9[%c0_23, %c0_24], %43 {strides = array<i32>} : memref<8x16xf32, #tpu.memory_space<vmem>>, vector<8x16xf32>,
    %c0_25 = arith.constant 0 : index
    %c0_26 = arith.constant 0 : index
    %45 = vector.load %arg7[%c0_25, %c0_26] : memref<8x1xf32, #tpu.memory_space<vmem>>, vector<8x1xf32>
    tpu.vector_store %arg7[%c0_25, %c0_26], %24 {strides = array<i32>} : memref<8x1xf32, #tpu.memory_space<vmem>>, vector<8x1xf32>,
    %c0_i32_27 = arith.constant 0 : i32
    %46 = arith.cmpi eq, %arg2, %c0_i32_27 : i32
    %47 = arith.extui %46 : i1 to i32
    %c0_i32_28 = arith.constant 0 : i32
    %48 = arith.cmpi ne, %47, %c0_i32_28 : i32
    scf.if %48 {
      %c0_29 = arith.constant 0 : index
      %c0_30 = arith.constant 0 : index
      %49 = vector.load %arg9[%c0_29, %c0_30] : memref<8x16xf32, #tpu.memory_space<vmem>>, vector<8x16xf32>
      %c0_31 = arith.constant 0 : index
      %c0_32 = arith.constant 0 : index
      %50 = vector.load %arg8[%c0_31, %c0_32] : memref<8x1xf32, #tpu.memory_space<vmem>>, vector<8x1xf32>
      %51 = tpu.reciprocal %50 {approx = true} : vector<8x1xf32> -> vector<8x1xf32>
      %52 = vector.broadcast %51 : vector<8x1xf32> to vector<8x16xf32>
      %53 = arith.mulf %49, %52 : vector<8x16xf32>
      %54 = arith.truncf %53 : vector<8x16xf32> to vector<8x16xbf16>
      %c0_33 = arith.constant 0 : index
      %c0_34 = arith.constant 0 : index
      %c0_35 = arith.constant 0 : index
      %55 = vector.load %arg6[%c0_33, %c0_34, %c0_35] : memref<1x8x16xbf16, #tpu.memory_space<vmem>>, vector<1x8x16xbf16>
      %56 = vector.shape_cast %55 : vector<1x8x16xbf16> to vector<8x16xbf16>
      %57 = vector.shape_cast %54 : vector<8x16xbf16> to vector<1x8x16xbf16>
      tpu.vector_store %arg6[%c0_33, %c0_34, %c0_35], %57 {strides = array<i32>} : memref<1x8x16xbf16, #tpu.memory_space<vmem>>, vector<1x8x16xbf16>,
    } else {
    }
    return
  }
  func.func @transform_0(%arg0: i32, %arg1: i32, %arg2: i32) -> (i32, i32, i32) {
    %c0_i32 = arith.constant 0 : i32
    %c0_i32_0 = arith.constant 0 : i32
    return %arg0, %arg1, %c0_i32 : i32, i32, i32
  }
  func.func @transform_1(%arg0: i32, %arg1: i32, %arg2: i32) -> (i32, i32, i32) {
    %c0_i32 = arith.constant 0 : i32
    %c0_i32_0 = arith.constant 0 : i32
    return %arg0, %arg2, %c0_i32 : i32, i32, i32
  }
  func.func @transform_2(%arg0: i32, %arg1: i32, %arg2: i32) -> (i32, i32, i32) {
    %c0_i32 = arith.constant 0 : i32
    %c0_i32_0 = arith.constant 0 : i32
    return %arg0, %arg2, %c0_i32 : i32, i32, i32
  }
  func.func @transform_3(%arg0: i32, %arg1: i32, %arg2: i32) -> (i32, i32, i32) {
    %c0_i32 = arith.constant 0 : i32
    %c0_i32_0 = arith.constant 0 : i32
    return %arg0, %arg1, %c0_i32 : i32, i32, i32
  }
}

module attributes {stable_mosaic.version = 11 : i64} {
  func.func @kernel(%arg0: i32, %arg1: i32, %arg2: i32, %arg3: memref<1x16x16xbf16, #tpu.memory_space<vmem>>, %arg4: memref<1x16x32xbf16, #tpu.memory_space<vmem>>, %arg5: memref<1x32xf32, #tpu.memory_space<vmem>>, %arg6: memref<16x32xbf16, #tpu.memory_space<vmem>>, %arg7: memref<16x32xbf16, #tpu.memory_space<vmem>>, %arg8: memref<16x32xf32, #tpu.memory_space<vmem>>) attributes {dimension_semantics = [#tpu.dimension_semantics<parallel>, #tpu.dimension_semantics<parallel>, #tpu.dimension_semantics<arbitrary>], iteration_bounds = array<i64: 1, 1, 2>, scalar_prefetch = 0 : i64, scratch_operands = 1 : i64, tpu.core_type = #tpu.core_type<tc>, window_params = [{transform_indices = @transform_0, window_bounds = array<i64: 1, 16, 16>}, {transform_indices = @transform_1, window_bounds = array<i64: 1, 16, 32>}, {transform_indices = @transform_2, window_bounds = array<i64: 1, 32>}, {transform_indices = @transform_3, window_bounds = array<i64: 16, 32>}, {transform_indices = @transform_4, window_bounds = array<i64: 16, 32>}]} {
    %c0_i32 = arith.constant 0 : i32
    %0 = arith.cmpi eq, %arg2, %c0_i32 : i32
    %1 = arith.extui %0 : i1 to i32
    %c0_i32_0 = arith.constant 0 : i32
    %2 = arith.cmpi ne, %1, %c0_i32_0 : i32
    scf.if %2 {
      %cst_11 = arith.constant 0.000000e+00 : f32
      %14 = vector.broadcast %cst_11 : f32 to vector<16x32xf32>
      %c0_12 = arith.constant 0 : index
      %c0_13 = arith.constant 0 : index
      %15 = vector.load %arg8[%c0_12, %c0_13] : memref<16x32xf32, #tpu.memory_space<vmem>>, vector<16x32xf32>
      tpu.vector_store %arg8[%c0_12, %c0_13], %14 {strides = array<i32>} : memref<16x32xf32, #tpu.memory_space<vmem>>, vector<16x32xf32>,
    } else {
    }
    %c0 = arith.constant 0 : index
    %c0_1 = arith.constant 0 : index
    %c0_2 = arith.constant 0 : index
    %3 = vector.load %arg3[%c0, %c0_1, %c0_2] : memref<1x16x16xbf16, #tpu.memory_space<vmem>>, vector<1x16x16xbf16>
    %4 = vector.shape_cast %3 : vector<1x16x16xbf16> to vector<16x16xbf16>
    %c0_3 = arith.constant 0 : index
    %c0_4 = arith.constant 0 : index
    %5 = vector.load %arg8[%c0_3, %c0_4] : memref<16x32xf32, #tpu.memory_space<vmem>>, vector<16x32xf32>
    %c0_5 = arith.constant 0 : index
    %c0_6 = arith.constant 0 : index
    %c0_7 = arith.constant 0 : index
    %6 = vector.load %arg4[%c0_5, %c0_6, %c0_7] : memref<1x16x32xbf16, #tpu.memory_space<vmem>>, vector<1x16x32xbf16>
    %7 = vector.shape_cast %6 : vector<1x16x32xbf16> to vector<16x32xbf16>
    %cst = arith.constant dense<0.000000e+00> : vector<16x32xf32>
    %8 = tpu.matmul %4, %7, %cst {dimension_numbers = #tpu.dot_dimension_numbers<[1], [0], [0], [1], [0, 0, 1, 1], [], []>} : vector<16x16xbf16>, vector<16x32xbf16>, vector<16x32xf32> -> vector<16x32xf32>
    %9 = arith.addf %5, %8 : vector<16x32xf32>
    %c0_8 = arith.constant 0 : index
    %c0_9 = arith.constant 0 : index
    %10 = vector.load %arg8[%c0_8, %c0_9] : memref<16x32xf32, #tpu.memory_space<vmem>>, vector<16x32xf32>
    tpu.vector_store %arg8[%c0_8, %c0_9], %9 {strides = array<i32>} : memref<16x32xf32, #tpu.memory_space<vmem>>, vector<16x32xf32>,
    %c1_i32 = arith.constant 1 : i32
    %11 = arith.cmpi eq, %arg2, %c1_i32 : i32
    %12 = arith.extui %11 : i1 to i32
    %c0_i32_10 = arith.constant 0 : i32
    %13 = arith.cmpi ne, %12, %c0_i32_10 : i32
    scf.if %13 {
      %c0_11 = arith.constant 0 : index
      %c0_12 = arith.constant 0 : index
      %14 = vector.load %arg8[%c0_11, %c0_12] : memref<16x32xf32, #tpu.memory_space<vmem>>, vector<16x32xf32>
      %c0_13 = arith.constant 0 : index
      %c0_14 = arith.constant 0 : index
      %15 = vector.load %arg5[%c0_13, %c0_14] : memref<1x32xf32, #tpu.memory_space<vmem>>, vector<1x32xf32>
      %16 = vector.broadcast %15 : vector<1x32xf32> to vector<16x32xf32>
      %17 = arith.addf %14, %16 : vector<16x32xf32>
      %c0_15 = arith.constant 0 : index
      %c0_16 = arith.constant 0 : index
      %18 = vector.load %arg6[%c0_15, %c0_16] : memref<16x32xbf16, #tpu.memory_space<vmem>>, vector<16x32xbf16>
      %19 = arith.extf %18 : vector<16x32xbf16> to vector<16x32xf32>
      %20 = arith.addf %17, %19 : vector<16x32xf32>
      %21 = arith.truncf %20 : vector<16x32xf32> to vector<16x32xbf16>
      %c0_17 = arith.constant 0 : index
      %c0_18 = arith.constant 0 : index
      %22 = vector.load %arg7[%c0_17, %c0_18] : memref<16x32xbf16, #tpu.memory_space<vmem>>, vector<16x32xbf16>
      tpu.vector_store %arg7[%c0_17, %c0_18], %21 {strides = array<i32>} : memref<16x32xbf16, #tpu.memory_space<vmem>>, vector<16x32xbf16>,
    } else {
    }
    return
  }
  func.func @transform_0(%arg0: i32, %arg1: i32, %arg2: i32) -> (i32, i32, i32) {
    %c0_i32 = arith.constant 0 : i32
    %c0_i32_0 = arith.constant 0 : i32
    return %arg2, %arg0, %c0_i32 : i32, i32, i32
  }
  func.func @transform_1(%arg0: i32, %arg1: i32, %arg2: i32) -> (i32, i32, i32) {
    %c0_i32 = arith.constant 0 : i32
    %c0_i32_0 = arith.constant 0 : i32
    return %arg2, %c0_i32, %arg1 : i32, i32, i32
  }
  func.func @transform_2(%arg0: i32, %arg1: i32, %arg2: i32) -> (i32, i32) {
    %c0_i32 = arith.constant 0 : i32
    %c0_i32_0 = arith.constant 0 : i32
    return %c0_i32, %arg1 : i32, i32
  }
  func.func @transform_3(%arg0: i32, %arg1: i32, %arg2: i32) -> (i32, i32) {
    %c0_i32 = arith.constant 0 : i32
    return %arg0, %arg1 : i32, i32
  }
  func.func @transform_4(%arg0: i32, %arg1: i32, %arg2: i32) -> (i32, i32) {
    %c0_i32 = arith.constant 0 : i32
    return %arg0, %arg1 : i32, i32
  }
}

module attributes {stable_mosaic.version = 11 : i64} {
  func.func @kernel(%arg0: i32, %arg1: i32, %arg2: i32, %arg3: memref<16x32xbf16, #tpu.memory_space<vmem>>, %arg4: memref<32x128xbf16, #tpu.memory_space<vmem>>, %arg5: memref<1x32xf32, #tpu.memory_space<vmem>>, %arg6: memref<1x32xf32, #tpu.memory_space<vmem>>, %arg7: memref<1x128xf32, #tpu.memory_space<vmem>>, %arg8: memref<16x128xbf16, #tpu.memory_space<vmem>>, %arg9: memref<16x128xf32, #tpu.memory_space<vmem>>) attributes {dimension_semantics = [#tpu.dimension_semantics<parallel>, #tpu.dimension_semantics<parallel>, #tpu.dimension_semantics<arbitrary>], iteration_bounds = array<i64: 1, 1, 1>, scalar_prefetch = 0 : i64, scratch_operands = 1 : i64, tpu.core_type = #tpu.core_type<tc>, window_params = [{transform_indices = @transform_0, window_bounds = array<i64: 16, 32>}, {transform_indices = @transform_1, window_bounds = array<i64: 32, 128>}, {pipeline_mode = #tpu.pipeline_mode<synchronous>, transform_indices = @transform_2, window_bounds = array<i64: 1, 32>}, {pipeline_mode = #tpu.pipeline_mode<synchronous>, transform_indices = @transform_3, window_bounds = array<i64: 1, 32>}, {transform_indices = @transform_4, window_bounds = array<i64: 1, 128>}, {transform_indices = @transform_5, window_bounds = array<i64: 16, 128>}]} {
    %c0_i32 = arith.constant 0 : i32
    %0 = arith.cmpi eq, %arg2, %c0_i32 : i32
    %1 = arith.extui %0 : i1 to i32
    %c0_i32_0 = arith.constant 0 : i32
    %2 = arith.cmpi ne, %1, %c0_i32_0 : i32
    scf.if %2 {
      %cst_19 = arith.constant 0.000000e+00 : f32
      %36 = vector.broadcast %cst_19 : f32 to vector<16x128xf32>
      %c0_20 = arith.constant 0 : index
      %c0_21 = arith.constant 0 : index
      %37 = vector.load %arg9[%c0_20, %c0_21] : memref<16x128xf32, #tpu.memory_space<vmem>>, vector<16x128xf32>
      tpu.vector_store %arg9[%c0_20, %c0_21], %36 {strides = array<i32>} : memref<16x128xf32, #tpu.memory_space<vmem>>, vector<16x128xf32>,
    } else {
    }
    %c0 = arith.constant 0 : index
    %c0_1 = arith.constant 0 : index
    %3 = vector.load %arg3[%c0, %c0_1] : memref<16x32xbf16, #tpu.memory_space<vmem>>, vector<16x32xbf16>
    %4 = arith.extf %3 : vector<16x32xbf16> to vector<16x32xf32>
    %cst = arith.constant dense<0.000000e+00> : vector<16xf32>
    %5 = vector.multi_reduction <add>, %4, %cst [1] : vector<16x32xf32> to vector<16xf32>
    %6 = vector.shape_cast %5 : vector<16xf32> to vector<16x1xf32>
    %cst_2 = arith.constant 3.200000e+01 : f32
    %7 = vector.broadcast %cst_2 : f32 to vector<16x1xf32>
    %8 = arith.divf %6, %7 : vector<16x1xf32>
    %9 = vector.broadcast %8 : vector<16x1xf32> to vector<16x32xf32>
    %10 = arith.subf %4, %9 : vector<16x32xf32>
    %11 = arith.mulf %10, %10 : vector<16x32xf32>
    %cst_3 = arith.constant dense<0.000000e+00> : vector<16xf32>
    %12 = vector.multi_reduction <add>, %11, %cst_3 [1] : vector<16x32xf32> to vector<16xf32>
    %13 = vector.shape_cast %12 : vector<16xf32> to vector<16x1xf32>
    %cst_4 = arith.constant 3.200000e+01 : f32
    %14 = vector.broadcast %cst_4 : f32 to vector<16x1xf32>
    %15 = arith.divf %13, %14 : vector<16x1xf32>
    %cst_5 = arith.constant 9.99999974E-6 : f32
    %16 = vector.broadcast %cst_5 : f32 to vector<16x1xf32>
    %17 = arith.addf %15, %16 : vector<16x1xf32>
    %18 = math.rsqrt %17 : vector<16x1xf32>
    %19 = vector.broadcast %18 : vector<16x1xf32> to vector<16x32xf32>
    %20 = arith.mulf %10, %19 : vector<16x32xf32>
    %c0_6 = arith.constant 0 : index
    %c0_7 = arith.constant 0 : index
    %21 = vector.load %arg5[%c0_6, %c0_7] : memref<1x32xf32, #tpu.memory_space<vmem>>, vector<1x32xf32>
    %22 = vector.broadcast %21 : vector<1x32xf32> to vector<16x32xf32>
    %23 = arith.mulf %20, %22 : vector<16x32xf32>
    %c0_8 = arith.constant 0 : index
    %c0_9 = arith.constant 0 : index
    %24 = vector.load %arg6[%c0_8, %c0_9] : memref<1x32xf32, #tpu.memory_space<vmem>>, vector<1x32xf32>
    %25 = vector.broadcast %24 : vector<1x32xf32> to vector<16x32xf32>
    %26 = arith.addf %23, %25 : vector<16x32xf32>
    %27 = arith.truncf %26 : vector<16x32xf32> to vector<16x32xbf16>
    %c0_10 = arith.constant 0 : index
    %c0_11 = arith.constant 0 : index
    %28 = vector.load %arg9[%c0_10, %c0_11] : memref<16x128xf32, #tpu.memory_space<vmem>>, vector<16x128xf32>
    %c0_12 = arith.constant 0 : index
    %c0_13 = arith.constant 0 : index
    %29 = vector.load %arg4[%c0_12, %c0_13] : memref<32x128xbf16, #tpu.memory_space<vmem>>, vector<32x128xbf16>
    %cst_14 = arith.constant dense<0.000000e+00> : vector<16x128xf32>
    %30 = tpu.matmul %27, %29, %cst_14 {dimension_numbers = #tpu.dot_dimension_numbers<[1], [0], [0], [1], [0, 0, 1, 1], [], []>} : vector<16x32xbf16>, vector<32x128xbf16>, vector<16x128xf32> -> vector<16x128xf32>
    %31 = arith.addf %28, %30 : vector<16x128xf32>
    %c0_15 = arith.constant 0 : index
    %c0_16 = arith.constant 0 : index
    %32 = vector.load %arg9[%c0_15, %c0_16] : memref<16x128xf32, #tpu.memory_space<vmem>>, vector<16x128xf32>
    tpu.vector_store %arg9[%c0_15, %c0_16], %31 {strides = array<i32>} : memref<16x128xf32, #tpu.memory_space<vmem>>, vector<16x128xf32>,
    %c0_i32_17 = arith.constant 0 : i32
    %33 = arith.cmpi eq, %arg2, %c0_i32_17 : i32
    %34 = arith.extui %33 : i1 to i32
    %c0_i32_18 = arith.constant 0 : i32
    %35 = arith.cmpi ne, %34, %c0_i32_18 : i32
    scf.if %35 {
      %c0_19 = arith.constant 0 : index
      %c0_20 = arith.constant 0 : index
      %36 = vector.load %arg9[%c0_19, %c0_20] : memref<16x128xf32, #tpu.memory_space<vmem>>, vector<16x128xf32>
      %c0_21 = arith.constant 0 : index
      %c0_22 = arith.constant 0 : index
      %37 = vector.load %arg7[%c0_21, %c0_22] : memref<1x128xf32, #tpu.memory_space<vmem>>, vector<1x128xf32>
      %38 = vector.broadcast %37 : vector<1x128xf32> to vector<16x128xf32>
      %39 = arith.addf %36, %38 : vector<16x128xf32>
      %cst_23 = arith.constant 1.702000e+00 : f32
      %40 = vector.broadcast %cst_23 : f32 to vector<16x128xf32>
      %41 = arith.mulf %40, %39 : vector<16x128xf32>
      %42 = arith.negf %41 : vector<16x128xf32>
      %43 = math.exp %42 : vector<16x128xf32>
      %cst_24 = arith.constant 1.000000e+00 : f32
      %44 = vector.broadcast %cst_24 : f32 to vector<16x128xf32>
      %45 = arith.addf %44, %43 : vector<16x128xf32>
      %46 = arith.divf %44, %45 : vector<16x128xf32>
      %47 = arith.mulf %39, %46 : vector<16x128xf32>
      %48 = arith.truncf %47 : vector<16x128xf32> to vector<16x128xbf16>
      %c0_25 = arith.constant 0 : index
      %c0_26 = arith.constant 0 : index
      %49 = vector.load %arg8[%c0_25, %c0_26] : memref<16x128xbf16, #tpu.memory_space<vmem>>, vector<16x128xbf16>
      tpu.vector_store %arg8[%c0_25, %c0_26], %48 {strides = array<i32>} : memref<16x128xbf16, #tpu.memory_space<vmem>>, vector<16x128xbf16>,
    } else {
    }
    return
  }
  func.func @transform_0(%arg0: i32, %arg1: i32, %arg2: i32) -> (i32, i32) {
    %c0_i32 = arith.constant 0 : i32
    return %arg0, %arg2 : i32, i32
  }
  func.func @transform_1(%arg0: i32, %arg1: i32, %arg2: i32) -> (i32, i32) {
    %c0_i32 = arith.constant 0 : i32
    return %arg2, %arg1 : i32, i32
  }
  func.func @transform_2(%arg0: i32, %arg1: i32, %arg2: i32) -> (i32, i32) {
    %c0_i32 = arith.constant 0 : i32
    %c0_i32_0 = arith.constant 0 : i32
    %c0_i32_1 = arith.constant 0 : i32
    return %c0_i32, %c0_i32_0 : i32, i32
  }
  func.func @transform_3(%arg0: i32, %arg1: i32, %arg2: i32) -> (i32, i32) {
    %c0_i32 = arith.constant 0 : i32
    %c0_i32_0 = arith.constant 0 : i32
    %c0_i32_1 = arith.constant 0 : i32
    return %c0_i32, %c0_i32_0 : i32, i32
  }
  func.func @transform_4(%arg0: i32, %arg1: i32, %arg2: i32) -> (i32, i32) {
    %c0_i32 = arith.constant 0 : i32
    %c0_i32_0 = arith.constant 0 : i32
    return %c0_i32, %arg1 : i32, i32
  }
  func.func @transform_5(%arg0: i32, %arg1: i32, %arg2: i32) -> (i32, i32) {
    %c0_i32 = arith.constant 0 : i32
    return %arg0, %arg1 : i32, i32
  }
}

module attributes {stable_mosaic.version = 11 : i64} {
  func.func @kernel(%arg0: i32, %arg1: i32, %arg2: i32, %arg3: memref<16x128xbf16, #tpu.memory_space<vmem>>, %arg4: memref<128x32xbf16, #tpu.memory_space<vmem>>, %arg5: memref<1x32xf32, #tpu.memory_space<vmem>>, %arg6: memref<16x32xbf16, #tpu.memory_space<vmem>>, %arg7: memref<16x32xbf16, #tpu.memory_space<vmem>>, %arg8: memref<16x32xf32, #tpu.memory_space<vmem>>) attributes {dimension_semantics = [#tpu.dimension_semantics<parallel>, #tpu.dimension_semantics<parallel>, #tpu.dimension_semantics<arbitrary>], iteration_bounds = array<i64: 1, 1, 1>, scalar_prefetch = 0 : i64, scratch_operands = 1 : i64, tpu.core_type = #tpu.core_type<tc>, window_params = [{transform_indices = @transform_0, window_bounds = array<i64: 16, 128>}, {transform_indices = @transform_1, window_bounds = array<i64: 128, 32>}, {transform_indices = @transform_2, window_bounds = array<i64: 1, 32>}, {transform_indices = @transform_3, window_bounds = array<i64: 16, 32>}, {transform_indices = @transform_4, window_bounds = array<i64: 16, 32>}]} {
    %c0_i32 = arith.constant 0 : i32
    %0 = arith.cmpi eq, %arg2, %c0_i32 : i32
    %1 = arith.extui %0 : i1 to i32
    %c0_i32_0 = arith.constant 0 : i32
    %2 = arith.cmpi ne, %1, %c0_i32_0 : i32
    scf.if %2 {
      %cst_10 = arith.constant 0.000000e+00 : f32
      %12 = vector.broadcast %cst_10 : f32 to vector<16x32xf32>
      %c0_11 = arith.constant 0 : index
      %c0_12 = arith.constant 0 : index
      %13 = vector.load %arg8[%c0_11, %c0_12] : memref<16x32xf32, #tpu.memory_space<vmem>>, vector<16x32xf32>
      tpu.vector_store %arg8[%c0_11, %c0_12], %12 {strides = array<i32>} : memref<16x32xf32, #tpu.memory_space<vmem>>, vector<16x32xf32>,
    } else {
    }
    %c0 = arith.constant 0 : index
    %c0_1 = arith.constant 0 : index
    %3 = vector.load %arg3[%c0, %c0_1] : memref<16x128xbf16, #tpu.memory_space<vmem>>, vector<16x128xbf16>
    %c0_2 = arith.constant 0 : index
    %c0_3 = arith.constant 0 : index
    %4 = vector.load %arg8[%c0_2, %c0_3] : memref<16x32xf32, #tpu.memory_space<vmem>>, vector<16x32xf32>
    %c0_4 = arith.constant 0 : index
    %c0_5 = arith.constant 0 : index
    %5 = vector.load %arg4[%c0_4, %c0_5] : memref<128x32xbf16, #tpu.memory_space<vmem>>, vector<128x32xbf16>
    %cst = arith.constant dense<0.000000e+00> : vector<16x32xf32>
    %6 = tpu.matmul %3, %5, %cst {dimension_numbers = #tpu.dot_dimension_numbers<[1], [0], [0], [1], [0, 0, 1, 1], [], []>} : vector<16x128xbf16>, vector<128x32xbf16>, vector<16x32xf32> -> vector<16x32xf32>
    %7 = arith.addf %4, %6 : vector<16x32xf32>
    %c0_6 = arith.constant 0 : index
    %c0_7 = arith.constant 0 : index
    %8 = vector.load %arg8[%c0_6, %c0_7] : memref<16x32xf32, #tpu.memory_space<vmem>>, vector<16x32xf32>
    tpu.vector_store %arg8[%c0_6, %c0_7], %7 {strides = array<i32>} : memref<16x32xf32, #tpu.memory_space<vmem>>, vector<16x32xf32>,
    %c0_i32_8 = arith.constant 0 : i32
    %9 = arith.cmpi eq, %arg2, %c0_i32_8 : i32
    %10 = arith.extui %9 : i1 to i32
    %c0_i32_9 = arith.constant 0 : i32
    %11 = arith.cmpi ne, %10, %c0_i32_9 : i32
    scf.if %11 {
      %c0_10 = arith.constant 0 : index
      %c0_11 = arith.constant 0 : index
      %12 = vector.load %arg8[%c0_10, %c0_11] : memref<16x32xf32, #tpu.memory_space<vmem>>, vector<16x32xf32>
      %c0_12 = arith.constant 0 : index
      %c0_13 = arith.constant 0 : index
      %13 = vector.load %arg5[%c0_12, %c0_13] : memref<1x32xf32, #tpu.memory_space<vmem>>, vector<1x32xf32>
      %14 = vector.broadcast %13 : vector<1x32xf32> to vector<16x32xf32>
      %15 = arith.addf %12, %14 : vector<16x32xf32>
      %c0_14 = arith.constant 0 : index
      %c0_15 = arith.constant 0 : index
      %16 = vector.load %arg6[%c0_14, %c0_15] : memref<16x32xbf16, #tpu.memory_space<vmem>>, vector<16x32xbf16>
      %17 = arith.extf %16 : vector<16x32xbf16> to vector<16x32xf32>
      %18 = arith.addf %15, %17 : vector<16x32xf32>
      %19 = arith.truncf %18 : vector<16x32xf32> to vector<16x32xbf16>
      %c0_16 = arith.constant 0 : index
      %c0_17 = arith.constant 0 : index
      %20 = vector.load %arg7[%c0_16, %c0_17] : memref<16x32xbf16, #tpu.memory_space<vmem>>, vector<16x32xbf16>
      tpu.vector_store %arg7[%c0_16, %c0_17], %19 {strides = array<i32>} : memref<16x32xbf16, #tpu.memory_space<vmem>>, vector<16x32xbf16>,
    } else {
    }
    return
  }
  func.func @transform_0(%arg0: i32, %arg1: i32, %arg2: i32) -> (i32, i32) {
    %c0_i32 = arith.constant 0 : i32
    return %arg0, %arg2 : i32, i32
  }
  func.func @transform_1(%arg0: i32, %arg1: i32, %arg2: i32) -> (i32, i32) {
    %c0_i32 = arith.constant 0 : i32
    return %arg2, %arg1 : i32, i32
  }
  func.func @transform_2(%arg0: i32, %arg1: i32, %arg2: i32) -> (i32, i32) {
    %c0_i32 = arith.constant 0 : i32
    %c0_i32_0 = arith.constant 0 : i32
    return %c0_i32, %arg1 : i32, i32
  }
  func.func @transform_3(%arg0: i32, %arg1: i32, %arg2: i32) -> (i32, i32) {
    %c0_i32 = arith.constant 0 : i32
    return %arg0, %arg1 : i32, i32
  }
  func.func @transform_4(%arg0: i32, %arg1: i32, %arg2: i32) -> (i32, i32) {
    %c0_i32 = arith.constant 0 : i32
    return %arg0, %arg1 : i32, i32
  }
}

module attributes {stable_mosaic.version = 11 : i64} {
  func.func @_ln_kernel(%arg0: i32, %arg1: memref<16x32xbf16, #tpu.memory_space<vmem>>, %arg2: memref<1x32xf32, #tpu.memory_space<vmem>>, %arg3: memref<1x32xf32, #tpu.memory_space<vmem>>, %arg4: memref<16x32xbf16, #tpu.memory_space<vmem>>) attributes {dimension_semantics = [#tpu.dimension_semantics<parallel>], iteration_bounds = array<i64: 1>, scalar_prefetch = 0 : i64, scratch_operands = 0 : i64, tpu.core_type = #tpu.core_type<tc>, window_params = [{transform_indices = @transform_0, window_bounds = array<i64: 16, 32>}, {pipeline_mode = #tpu.pipeline_mode<synchronous>, transform_indices = @transform_1, window_bounds = array<i64: 1, 32>}, {pipeline_mode = #tpu.pipeline_mode<synchronous>, transform_indices = @transform_2, window_bounds = array<i64: 1, 32>}, {transform_indices = @transform_3, window_bounds = array<i64: 16, 32>}]} {
    %c0 = arith.constant 0 : index
    %c0_0 = arith.constant 0 : index
    %0 = vector.load %arg1[%c0, %c0_0] : memref<16x32xbf16, #tpu.memory_space<vmem>>, vector<16x32xbf16>
    %1 = arith.extf %0 : vector<16x32xbf16> to vector<16x32xf32>
    %cst = arith.constant dense<0.000000e+00> : vector<16xf32>
    %2 = vector.multi_reduction <add>, %1, %cst [1] : vector<16x32xf32> to vector<16xf32>
    %3 = vector.shape_cast %2 : vector<16xf32> to vector<16x1xf32>
    %cst_1 = arith.constant 3.200000e+01 : f32
    %4 = vector.broadcast %cst_1 : f32 to vector<16x1xf32>
    %5 = arith.divf %3, %4 : vector<16x1xf32>
    %6 = vector.broadcast %5 : vector<16x1xf32> to vector<16x32xf32>
    %7 = arith.subf %1, %6 : vector<16x32xf32>
    %8 = arith.mulf %7, %7 : vector<16x32xf32>
    %cst_2 = arith.constant dense<0.000000e+00> : vector<16xf32>
    %9 = vector.multi_reduction <add>, %8, %cst_2 [1] : vector<16x32xf32> to vector<16xf32>
    %10 = vector.shape_cast %9 : vector<16xf32> to vector<16x1xf32>
    %cst_3 = arith.constant 3.200000e+01 : f32
    %11 = vector.broadcast %cst_3 : f32 to vector<16x1xf32>
    %12 = arith.divf %10, %11 : vector<16x1xf32>
    %cst_4 = arith.constant 9.99999974E-6 : f32
    %13 = vector.broadcast %cst_4 : f32 to vector<16x1xf32>
    %14 = arith.addf %12, %13 : vector<16x1xf32>
    %15 = math.rsqrt %14 : vector<16x1xf32>
    %16 = vector.broadcast %15 : vector<16x1xf32> to vector<16x32xf32>
    %17 = arith.mulf %7, %16 : vector<16x32xf32>
    %c0_5 = arith.constant 0 : index
    %c0_6 = arith.constant 0 : index
    %18 = vector.load %arg2[%c0_5, %c0_6] : memref<1x32xf32, #tpu.memory_space<vmem>>, vector<1x32xf32>
    %19 = vector.broadcast %18 : vector<1x32xf32> to vector<16x32xf32>
    %20 = arith.mulf %17, %19 : vector<16x32xf32>
    %c0_7 = arith.constant 0 : index
    %c0_8 = arith.constant 0 : index
    %21 = vector.load %arg3[%c0_7, %c0_8] : memref<1x32xf32, #tpu.memory_space<vmem>>, vector<1x32xf32>
    %22 = vector.broadcast %21 : vector<1x32xf32> to vector<16x32xf32>
    %23 = arith.addf %20, %22 : vector<16x32xf32>
    %24 = arith.truncf %23 : vector<16x32xf32> to vector<16x32xbf16>
    %c0_9 = arith.constant 0 : index
    %c0_10 = arith.constant 0 : index
    %25 = vector.load %arg4[%c0_9, %c0_10] : memref<16x32xbf16, #tpu.memory_space<vmem>>, vector<16x32xbf16>
    tpu.vector_store %arg4[%c0_9, %c0_10], %24 {strides = array<i32>} : memref<16x32xbf16, #tpu.memory_space<vmem>>, vector<16x32xbf16>,
    return
  }
  func.func @transform_0(%arg0: i32) -> (i32, i32) {
    %c0_i32 = arith.constant 0 : i32
    %c0_i32_0 = arith.constant 0 : i32
    return %arg0, %c0_i32 : i32, i32
  }
  func.func @transform_1(%arg0: i32) -> (i32, i32) {
    %c0_i32 = arith.constant 0 : i32
    %c0_i32_0 = arith.constant 0 : i32
    %c0_i32_1 = arith.constant 0 : i32
    return %c0_i32, %c0_i32_0 : i32, i32
  }
  func.func @transform_2(%arg0: i32) -> (i32, i32) {
    %c0_i32 = arith.constant 0 : i32
    %c0_i32_0 = arith.constant 0 : i32
    %c0_i32_1 = arith.constant 0 : i32
    return %c0_i32, %c0_i32_0 : i32, i32
  }
  func.func @transform_3(%arg0: i32) -> (i32, i32) {
    %c0_i32 = arith.constant 0 : i32
    %c0_i32_0 = arith.constant 0 : i32
    return %arg0, %c0_i32 : i32, i32
  }
}

module attributes {stable_mosaic.version = 11 : i64} {
  func.func @kernel(%arg0: i32, %arg1: i32, %arg2: i32, %arg3: memref<2x32xbf16, #tpu.memory_space<vmem>>, %arg4: memref<32x32xbf16, #tpu.memory_space<vmem>>, %arg5: memref<2x32xf32, #tpu.memory_space<vmem>>, %arg6: memref<2x32xf32, #tpu.memory_space<vmem>>) attributes {dimension_semantics = [#tpu.dimension_semantics<parallel>, #tpu.dimension_semantics<parallel>, #tpu.dimension_semantics<arbitrary>], iteration_bounds = array<i64: 1, 1, 1>, scalar_prefetch = 0 : i64, scratch_operands = 1 : i64, tpu.core_type = #tpu.core_type<tc>, window_params = [{transform_indices = @transform_0, window_bounds = array<i64: 2, 32>}, {transform_indices = @transform_1, window_bounds = array<i64: 32, 32>}, {transform_indices = @transform_2, window_bounds = array<i64: 2, 32>}]} {
    %c0_i32 = arith.constant 0 : i32
    %0 = arith.cmpi eq, %arg2, %c0_i32 : i32
    %1 = arith.extui %0 : i1 to i32
    %c0_i32_0 = arith.constant 0 : i32
    %2 = arith.cmpi ne, %1, %c0_i32_0 : i32
    scf.if %2 {
      %cst_10 = arith.constant 0.000000e+00 : f32
      %12 = vector.broadcast %cst_10 : f32 to vector<2x32xf32>
      %c0_11 = arith.constant 0 : index
      %c0_12 = arith.constant 0 : index
      %13 = vector.load %arg6[%c0_11, %c0_12] : memref<2x32xf32, #tpu.memory_space<vmem>>, vector<2x32xf32>
      tpu.vector_store %arg6[%c0_11, %c0_12], %12 {strides = array<i32>} : memref<2x32xf32, #tpu.memory_space<vmem>>, vector<2x32xf32>,
    } else {
    }
    %c0 = arith.constant 0 : index
    %c0_1 = arith.constant 0 : index
    %3 = vector.load %arg3[%c0, %c0_1] : memref<2x32xbf16, #tpu.memory_space<vmem>>, vector<2x32xbf16>
    %c0_2 = arith.constant 0 : index
    %c0_3 = arith.constant 0 : index
    %4 = vector.load %arg6[%c0_2, %c0_3] : memref<2x32xf32, #tpu.memory_space<vmem>>, vector<2x32xf32>
    %c0_4 = arith.constant 0 : index
    %c0_5 = arith.constant 0 : index
    %5 = vector.load %arg4[%c0_4, %c0_5] : memref<32x32xbf16, #tpu.memory_space<vmem>>, vector<32x32xbf16>
    %cst = arith.constant dense<0.000000e+00> : vector<2x32xf32>
    %6 = tpu.matmul %3, %5, %cst {dimension_numbers = #tpu.dot_dimension_numbers<[1], [0], [0], [1], [0, 0, 1, 1], [], []>} : vector<2x32xbf16>, vector<32x32xbf16>, vector<2x32xf32> -> vector<2x32xf32>
    %7 = arith.addf %4, %6 : vector<2x32xf32>
    %c0_6 = arith.constant 0 : index
    %c0_7 = arith.constant 0 : index
    %8 = vector.load %arg6[%c0_6, %c0_7] : memref<2x32xf32, #tpu.memory_space<vmem>>, vector<2x32xf32>
    tpu.vector_store %arg6[%c0_6, %c0_7], %7 {strides = array<i32>} : memref<2x32xf32, #tpu.memory_space<vmem>>, vector<2x32xf32>,
    %c0_i32_8 = arith.constant 0 : i32
    %9 = arith.cmpi eq, %arg2, %c0_i32_8 : i32
    %10 = arith.extui %9 : i1 to i32
    %c0_i32_9 = arith.constant 0 : i32
    %11 = arith.cmpi ne, %10, %c0_i32_9 : i32
    scf.if %11 {
      %c0_10 = arith.constant 0 : index
      %c0_11 = arith.constant 0 : index
      %12 = vector.load %arg6[%c0_10, %c0_11] : memref<2x32xf32, #tpu.memory_space<vmem>>, vector<2x32xf32>
      %c0_12 = arith.constant 0 : index
      %c0_13 = arith.constant 0 : index
      %13 = vector.load %arg5[%c0_12, %c0_13] : memref<2x32xf32, #tpu.memory_space<vmem>>, vector<2x32xf32>
      tpu.vector_store %arg5[%c0_12, %c0_13], %12 {strides = array<i32>} : memref<2x32xf32, #tpu.memory_space<vmem>>, vector<2x32xf32>,
    } else {
    }
    return
  }
  func.func @transform_0(%arg0: i32, %arg1: i32, %arg2: i32) -> (i32, i32) {
    %c0_i32 = arith.constant 0 : i32
    return %arg0, %arg2 : i32, i32
  }
  func.func @transform_1(%arg0: i32, %arg1: i32, %arg2: i32) -> (i32, i32) {
    %c0_i32 = arith.constant 0 : i32
    return %arg2, %arg1 : i32, i32
  }
  func.func @transform_2(%arg0: i32, %arg1: i32, %arg2: i32) -> (i32, i32) {
    %c0_i32 = arith.constant 0 : i32
    return %arg0, %arg1 : i32, i32
  }
}

module attributes {stable_mosaic.version = 11 : i64} {
  func.func @_pacl_head_kernel(%arg0: memref<2x4x32xf32, #tpu.memory_space<vmem>>, %arg1: memref<2x32xf32, #tpu.memory_space<vmem>>, %arg2: memref<2x2xf32, #tpu.memory_space<vmem>>) attributes {dimension_semantics = [], scalar_prefetch = 0 : i64, scratch_operands = 0 : i64, tpu.core_type = #tpu.core_type<tc>} {
    %c0 = arith.constant 0 : index
    %c0_0 = arith.constant 0 : index
    %c0_1 = arith.constant 0 : index
    %0 = vector.load %arg0[%c0, %c0_0, %c0_1] : memref<2x4x32xf32, #tpu.memory_space<vmem>>, vector<2x4x32xf32>
    %c0_2 = arith.constant 0 : index
    %c0_3 = arith.constant 0 : index
    %1 = vector.load %arg1[%c0_2, %c0_3] : memref<2x32xf32, #tpu.memory_space<vmem>>, vector<2x32xf32>
    %2 = vector.shape_cast %1 : vector<2x32xf32> to vector<2x1x32xf32>
    %3 = vector.broadcast %2 : vector<2x1x32xf32> to vector<2x4x32xf32>
    %4 = arith.mulf %0, %3 : vector<2x4x32xf32>
    %cst = arith.constant dense<0.000000e+00> : vector<2x4xf32>
    %5 = vector.multi_reduction <add>, %4, %cst [2] : vector<2x4x32xf32> to vector<2x4xf32>
    %cst_4 = arith.constant dense<0xFF800000> : vector<2xf32>
    %6 = vector.multi_reduction <maximumf>, %5, %cst_4 [1] : vector<2x4xf32> to vector<2xf32>
    %7 = vector.shape_cast %6 : vector<2xf32> to vector<2x1xf32>
    %8 = vector.broadcast %7 : vector<2x1xf32> to vector<2x4xf32>
    %9 = arith.subf %5, %8 : vector<2x4xf32>
    %10 = math.exp %9 : vector<2x4xf32>
    %cst_5 = arith.constant dense<0.000000e+00> : vector<2xf32>
    %11 = vector.multi_reduction <add>, %10, %cst_5 [1] : vector<2x4xf32> to vector<2xf32>
    %12 = vector.shape_cast %11 : vector<2xf32> to vector<2x1xf32>
    %13 = vector.broadcast %12 : vector<2x1xf32> to vector<2x4xf32>
    %14 = arith.divf %10, %13 : vector<2x4xf32>
    %15 = vector.shape_cast %14 : vector<2x4xf32> to vector<2x4x1xf32>
    %16 = vector.broadcast %15 : vector<2x4x1xf32> to vector<2x4x32xf32>
    %17 = arith.mulf %0, %16 : vector<2x4x32xf32>
    %cst_6 = arith.constant dense<0.000000e+00> : vector<2x32xf32>
    %18 = vector.multi_reduction <add>, %17, %cst_6 [1] : vector<2x4x32xf32> to vector<2x32xf32>
    %19 = arith.mulf %18, %18 : vector<2x32xf32>
    %cst_7 = arith.constant dense<0.000000e+00> : vector<2xf32>
    %20 = vector.multi_reduction <add>, %19, %cst_7 [1] : vector<2x32xf32> to vector<2xf32>
    %21 = vector.shape_cast %20 : vector<2xf32> to vector<2x1xf32>
    %22 = math.sqrt %21 : vector<2x1xf32>
    %cst_8 = arith.constant 9.99999993E-9 : f32
    %23 = vector.broadcast %cst_8 : f32 to vector<2x1xf32>
    %24 = arith.maximumf %22, %23 : vector<2x1xf32>
    %25 = vector.broadcast %24 : vector<2x1xf32> to vector<2x32xf32>
    %26 = arith.divf %18, %25 : vector<2x32xf32>
    %27 = arith.mulf %1, %1 : vector<2x32xf32>
    %cst_9 = arith.constant dense<0.000000e+00> : vector<2xf32>
    %28 = vector.multi_reduction <add>, %27, %cst_9 [1] : vector<2x32xf32> to vector<2xf32>
    %29 = vector.shape_cast %28 : vector<2xf32> to vector<2x1xf32>
    %30 = math.sqrt %29 : vector<2x1xf32>
    %cst_10 = arith.constant 9.99999993E-9 : f32
    %31 = vector.broadcast %cst_10 : f32 to vector<2x1xf32>
    %32 = arith.maximumf %30, %31 : vector<2x1xf32>
    %33 = vector.broadcast %32 : vector<2x1xf32> to vector<2x32xf32>
    %34 = arith.divf %1, %33 : vector<2x32xf32>
    "tpu.trace_start"() <{level = 10 : i32, message = "id,jd->ij"}> : () -> ()
    %cst_11 = arith.constant dense<0.000000e+00> : vector<2x2xf32>
    %35 = tpu.matmul %26, %34, %cst_11 {dimension_numbers = #tpu.dot_dimension_numbers<[1], [1], [0], [0], [0, 0, 1, 0], [], []>} : vector<2x32xf32>, vector<2x32xf32>, vector<2x2xf32> -> vector<2x2xf32>
    "tpu.trace_stop"() : () -> ()
    %c0_12 = arith.constant 0 : index
    %c0_13 = arith.constant 0 : index
    %36 = vector.load %arg2[%c0_12, %c0_13] : memref<2x2xf32, #tpu.memory_space<vmem>>, vector<2x2xf32>
    tpu.vector_store %arg2[%c0_12, %c0_13], %35 {strides = array<i32>} : memref<2x2xf32, #tpu.memory_space<vmem>>, vector<2x2xf32>,
    return
  }
}

</mosaic_0001>

<bundles_post_ra>
// kernel: pacl_clip_forward.31
= control target key start
LH: loop header
LB: loop body
LE: loop exit
PB: predicated region body
PF: predicated region fallthrough
CT: control target
= control target key end

     0   :  { %vm33_vm0 = vcmask 261120   ;;  %vm37_vm1 = vcmask 254976   ;;  %v183_v6 = vmov 32.0   ;;  %vm25_vm3 = vcmask 785408   ;;  %s249_s0 = inlined_call_operand.vmem [shape: bf16[10,32], index: 0, kind: input, shape index: {}]   ;;  %s250_s2 = inlined_call_operand.vmem [shape: f32[1,32], index: 2, kind: input, shape index: {}]   ;;  %s251_s3 = inlined_call_operand.vmem [shape: f32[1,32], index: 3, kind: input, shape index: {}]   ;;  %s252_s4 = inlined_call_operand.vmem [shape: f32[1,96], index: 4, kind: input, shape index: {}]   ;;  %s253_s1 = inlined_call_operand.vmem [shape: bf16[32,96], index: 1, kind: input, shape index: {}]   ;;  %s254_s5 = inlined_call_operand.vmem [shape: bf16[10,96], index: 5, kind: output, shape index: {}]  }
   0x1   :  { %v29_v0 = vld [vmem:[%s249_s0] sm:$0xf]  ;;  %v30_v2 = vld [vmem:[%s249_s0 + $0x4] sm:$0x1]  ;;  %177 = vrcp.f32 %v183_v6  ;;  %v171_v23 = vld [vmem:[%s253_s1 + $0x8] sm:$0xff]  ;;  %v184_v29 = vmov 0.0  }
   0x2   :  { %v31_v1 = vunpack.c.l.bf16 %v29_v0  ;;  %v32_v4 = vunpack.c.l.bf16 %v30_v2  ;;  %126 = vmatpush.bf16.msra.mxu0 %v171_v23  ;;  %v170_v25 = vld [vmem:[%s253_s1] sm:$0xff]  ;;  %26 = vst.msk [vmem:[#allocation2] sm:$0xff] %vm25_vm3, %v184_v29  ;;  %vm27_vm10 = vcmask 779264   ;;  %vm153_vm11 = vcmask 781312  }
   0x3   :  { %v174_v45 = vld [vmem:[%s250_s2] ss:$0 sm:$0xff]  ;;  %28 = vst.msk [vmem:[#allocation2 + $0x8] sm:$0x3] %vm27_vm10, %v184_v29  ;;  %vm155_vm12 = vcmask 778240  }
   0x4   :  { %v34_v3 = vsel %vm33_vm0, %v31_v1, 0.0  ;;  %v38_v5 = vsel %vm37_vm1, %v32_v4, 0.0  ;;  %v175_v50 = vld [vmem:[%s251_s3] ss:$0 sm:$0xff] }
   0x5   :  { %35 = vadd.xlane.f32.xlu0 %v34_v3  ;;  %v176_v59 = vld [vmem:[%s252_s4] ss:$0 sm:$0xff] }
   0x6   :  { %127 = vmatpush.bf16.msra.mxu0 %v170_v25 }
   0x7   :  { %v178_v7 = vpop.eup %177 }
   0x8   :  { %v42_v8 = vmul.f32 32.0, %v178_v7  ;;  %vm46_vm2 = vweird.f32 %v178_v7 }
   0x9   :  { %v99_v55 = vld [vmem:[#allocation2] sm:$0xff] }
   0xa   :  { %v43_v9 = vsub.f32 1.0, %v42_v8  ;;  %v100_v58 = vld [vmem:[#allocation2 + $0x8] sm:$0x3] }
   0xc   :  { %v44_v10 = vmul.f32 %v178_v7, %v43_v9 }
   0xd   :  { %39 = vadd.xlane.f32.xlu0 %v38_v5 }
   0xe   :  { %v45_v11 = vadd.f32 %v178_v7, %v44_v10 }
  0x10   :  { %v47_v12 = vsel %vm46_vm2, %v178_v7, %v45_v11 }
  0x78   :  { %v36_v13 = vpop.xlane.xlu0 %35 }
  0x79   :  { %v48_v14 = vmul.f32 %v47_v12, %v36_v13 }
  0x7b   :  { %v50_v15 = vsub.f32 %v31_v1, %v48_v14 }
  0x7d   :  { %v52_v16 = vmul.f32 %v50_v15, %v50_v15 }
  0x7f   :  { %v54_v17 = vsel %vm33_vm0, %v52_v16, 0.0 }
  0x80   :  { %55 = vadd.xlane.f32.xlu1 %v54_v17  ;;  %v40_v18 = vpop.xlane.xlu0 %39 }
  0x81   :  { %v49_v19 = vmul.f32 %v47_v12, %v40_v18 }
  0x83   :  { %v51_v20 = vsub.f32 %v32_v4, %v49_v19 }
  0x85   :  { %v53_v21 = vmul.f32 %v51_v20, %v51_v20 }
  0x87   :  { %v57_v22 = vsel %vm37_vm1, %v53_v21, 0.0 }
  0x88   :  { %58 = vadd.xlane.f32.xlu1 %v57_v22 }
  0xf3   :  { %v56_v24 = vpop.xlane.xlu1 %55 }
  0xf4   :  { %v60_v26 = vmul.f32 %v56_v24, %v47_v12 }
  0xf6   :  { %v62_v27 = vadd.f32 1e-05, %v60_v26 }
  0xf8   :  { %179 = vrsqrt.f32 %v62_v27  ;;  %vm70_vm5 = vweird.f32 %v62_v27 }
  0xfb   :  { %v59_v28 = vpop.xlane.xlu1 %58 }
  0xfc   :  { %v61_v30 = vmul.f32 %v59_v28, %v47_v12 }
  0xfe   :  { %v180_v31 = vpop.eup %179  ;;  %v63_v32 = vadd.f32 1e-05, %v61_v30 }
  0xff   :  { %v65_v33 = vmul.f32 %v180_v31, %v62_v27  ;;  %vm71_vm4 = vweird.f32 %v180_v31 }
 0x100   :  { %181 = vrsqrt.f32 %v63_v32  ;;  %vm72_vm6 = vmor %vm70_vm5, %vm71_vm4  ;;  %vm80_vm8 = vweird.f32 %v63_v32 }
 0x101   :  { %v66_v34 = vmul.f32 %v180_v31, %v65_v33 }
 0x103   :  { %v67_v35 = vmul.f32 0.5, %v66_v34 }
 0x105   :  { %v68_v36 = vsub.f32 1.5, %v67_v35 }
 0x106   :  { %v182_v37 = vpop.eup %181 }
 0x107   :  { %v69_v38 = vmul.f32 %v180_v31, %v68_v36  ;;  %v75_v39 = vmul.f32 %v182_v37, %v63_v32  ;;  %vm81_vm7 = vweird.f32 %v182_v37 }
 0x108   :  { %vm82_vm9 = vmor %vm80_vm8, %vm81_vm7 }
 0x109   :  { %v76_v40 = vmul.f32 %v182_v37, %v75_v39  ;;  %v73_v41 = vsel %vm72_vm6, %v180_v31, %v69_v38 }
 0x10a   :  { %v84_v44 = vmul.f32 %v73_v41, %v50_v15 }
 0x10b   :  { %v77_v42 = vmul.f32 0.5, %v76_v40 }
 0x10c   :  { %v90_v49 = vmul.f32 %v174_v45, %v84_v44 }
 0x10d   :  { %v78_v43 = vsub.f32 1.5, %v77_v42 }
 0x10e   :  { %v96_v52 = vadd.f32 %v175_v50, %v90_v49 }
 0x10f   :  { %v79_v46 = vmul.f32 %v182_v37, %v78_v43 }
 0x111   :  { %v83_v47 = vsel %vm82_vm9, %v182_v37, %v79_v46 }
 0x112   :  { %v85_v48 = vmul.f32 %v83_v47, %v51_v20 }
 0x114   :  { %v91_v51 = vmul.f32 %v174_v45, %v85_v48 }
 0x116   :  { %v97_v53 = vadd.f32 %v175_v50, %v91_v51 }
 0x118   :  { %v98_v54 = vpack.c.bf16 %v97_v53, %v96_v52 }
 0x11a   :  { %169 = vmatmul.msk.bf16.vlgmr.msra.gmra.mxu0 %vm33_vm0, %v98_v54 }
 0x197   :  { %v129_v56 = vpop.f32.mrf.mxu0 }
 0x198   :  { %v134_v57 = vadd.f32 %v129_v56, %v99_v55 }
 0x19a   :  { %137 = vst.msk [vmem:[#allocation2] sm:$0xff] %vm25_vm3, %v134_v57 }
 0x19f   :  { %v131_v60 = vpop.f32.mrf.mxu0 }
 0x1a0   :  { %v135_v61 = vadd.f32 %v131_v60, %v100_v58 }
 0x1a1   :  { %v143_v62 = vld [vmem:[#allocation2] sm:$0xff] }
 0x1a2   :  { %v149_v63 = vadd.f32 %v176_v59, %v143_v62  ;;  %139 = vst.msk [vmem:[#allocation2 + $0x8] sm:$0x3] %vm27_vm10, %v135_v61 }
 0x1a4   :  { %v151_v0 = vpack.c.bf16 %v149_v63, %v149_v63 }
 0x1a6   :  { %154 = vst.msk [vmem:[%s254_s5] sm:$0xf] %vm153_vm11, %v151_v0 }
 0x1a9   :  { %v144_v1 = vld [vmem:[#allocation2 + $0x8] sm:$0x3] }
 0x1aa   :  { %v150_v2 = vadd.f32 %v176_v59, %v144_v1 }
 0x1ac   :  { %v152_v3 = vpack.c.bf16 %v150_v2, %v150_v2 }
 0x1ae   :  { %156 = vst.msk [vmem:[%s254_s5 + $0x4] sm:$0x1] %vm155_vm12, %v152_v3 }

// kernel: pacl_clip_forward.30
= control target key start
LH: loop header
LB: loop body
LE: loop exit
PB: predicated region body
PF: predicated region fallthrough
CT: control target
= control target key end

     0   :  { %vm18_vm0 = vcmask 261120   ;;  %vm22_vm1 = vcmask 254976   ;;  %v102_v6 = vmov 32.0   ;;  %vm85_vm7 = vcmask 257024   ;;  %s145_s0 = inlined_call_operand.vmem [shape: bf16[10,32], index: 0, kind: input, shape index: {}]   ;;  %s146_s1 = inlined_call_operand.vmem [shape: f32[1,32], index: 1, kind: input, shape index: {}]   ;;  %s147_s2 = inlined_call_operand.vmem [shape: f32[1,32], index: 2, kind: input, shape index: {}]   ;;  %s148_s3 = inlined_call_operand.vmem [shape: bf16[10,32], index: 3, kind: output, shape index: {}]  }
   0x1   :  { %v14_v0 = vld [vmem:[%s145_s0] sm:$0xf]  ;;  %v15_v2 = vld [vmem:[%s145_s0 + $0x4] sm:$0x1]  ;;  %96 = vrcp.f32 %v102_v6  ;;  %vm87_vm10 = vcmask 253952  }
   0x2   :  { %v16_v1 = vunpack.c.l.bf16 %v14_v0  ;;  %v17_v4 = vunpack.c.l.bf16 %v15_v2  ;;  %v94_v37 = vld [vmem:[%s146_s1] ss:$0 sm:$0xff] }
   0x3   :  { %v95_v40 = vld [vmem:[%s147_s2] ss:$0 sm:$0xff] }
   0x4   :  { %v19_v3 = vsel %vm18_vm0, %v16_v1, 0.0  ;;  %v23_v5 = vsel %vm22_vm1, %v17_v4, 0.0 }
   0x5   :  { %20 = vadd.xlane.f32.xlu0 %v19_v3 }
   0x7   :  { %v97_v7 = vpop.eup %96 }
   0x8   :  { %v27_v8 = vmul.f32 32.0, %v97_v7  ;;  %vm31_vm2 = vweird.f32 %v97_v7 }
   0xa   :  { %v28_v9 = vsub.f32 1.0, %v27_v8 }
   0xc   :  { %v29_v10 = vmul.f32 %v97_v7, %v28_v9 }
   0xd   :  { %24 = vadd.xlane.f32.xlu0 %v23_v5 }
   0xe   :  { %v30_v11 = vadd.f32 %v97_v7, %v29_v10 }
  0x10   :  { %v32_v12 = vsel %vm31_vm2, %v97_v7, %v30_v11 }
  0x78   :  { %v21_v13 = vpop.xlane.xlu0 %20 }
  0x79   :  { %v33_v14 = vmul.f32 %v32_v12, %v21_v13 }
  0x7b   :  { %v35_v15 = vsub.f32 %v16_v1, %v33_v14 }
  0x7d   :  { %v37_v16 = vmul.f32 %v35_v15, %v35_v15 }
  0x7f   :  { %v39_v17 = vsel %vm18_vm0, %v37_v16, 0.0 }
  0x80   :  { %40 = vadd.xlane.f32.xlu1 %v39_v17  ;;  %v25_v18 = vpop.xlane.xlu0 %24 }
  0x81   :  { %v34_v19 = vmul.f32 %v32_v12, %v25_v18 }
  0x83   :  { %v36_v20 = vsub.f32 %v17_v4, %v34_v19 }
  0x85   :  { %v38_v21 = vmul.f32 %v36_v20, %v36_v20 }
  0x87   :  { %v42_v22 = vsel %vm22_vm1, %v38_v21, 0.0 }
  0x88   :  { %43 = vadd.xlane.f32.xlu1 %v42_v22 }
  0xf3   :  { %v41_v23 = vpop.xlane.xlu1 %40 }
  0xf4   :  { %v45_v24 = vmul.f32 %v41_v23, %v32_v12 }
  0xf6   :  { %v47_v25 = vadd.f32 1e-05, %v45_v24 }
  0xf8   :  { %98 = vrsqrt.f32 %v47_v25  ;;  %vm55_vm4 = vweird.f32 %v47_v25 }
  0xfb   :  { %v44_v26 = vpop.xlane.xlu1 %43 }
  0xfc   :  { %v46_v27 = vmul.f32 %v44_v26, %v32_v12 }
  0xfe   :  { %v99_v28 = vpop.eup %98  ;;  %v48_v29 = vadd.f32 1e-05, %v46_v27 }
  0xff   :  { %v50_v30 = vmul.f32 %v99_v28, %v47_v25  ;;  %vm56_vm3 = vweird.f32 %v99_v28 }
 0x100   :  { %100 = vrsqrt.f32 %v48_v29  ;;  %vm57_vm5 = vmor %vm55_vm4, %vm56_vm3  ;;  %vm65_vm8 = vweird.f32 %v48_v29 }
 0x101   :  { %v51_v31 = vmul.f32 %v99_v28, %v50_v30 }
 0x103   :  { %v52_v32 = vmul.f32 0.5, %v51_v31 }
 0x105   :  { %v53_v33 = vsub.f32 1.5, %v52_v32 }
 0x106   :  { %v101_v34 = vpop.eup %100 }
 0x107   :  { %v54_v35 = vmul.f32 %v99_v28, %v53_v33  ;;  %v60_v36 = vmul.f32 %v101_v34, %v48_v29  ;;  %vm66_vm6 = vweird.f32 %v101_v34 }
 0x108   :  { %vm67_vm9 = vmor %vm65_vm8, %vm66_vm6 }
 0x109   :  { %v58_v38 = vsel %vm57_vm5, %v99_v28, %v54_v35  ;;  %v61_v39 = vmul.f32 %v101_v34, %v60_v36 }
 0x10a   :  { %v69_v41 = vmul.f32 %v58_v38, %v35_v15 }
 0x10b   :  { %v62_v42 = vmul.f32 0.5, %v61_v39 }
 0x10c   :  { %v75_v43 = vmul.f32 %v94_v37, %v69_v41 }
 0x10d   :  { %v63_v44 = vsub.f32 1.5, %v62_v42 }
 0x10e   :  { %v81_v45 = vadd.f32 %v95_v40, %v75_v43 }
 0x10f   :  { %v64_v46 = vmul.f32 %v101_v34, %v63_v44 }
 0x110   :  { %v83_v47 = vpack.c.bf16 %v81_v45, %v81_v45 }
 0x111   :  { %v68_v48 = vsel %vm67_vm9, %v101_v34, %v64_v46 }
 0x112   :  { %86 = vst.msk [vmem:[%s148_s3] sm:$0xf] %vm85_vm7, %v83_v47  ;;  %v70_v49 = vmul.f32 %v68_v48, %v36_v20 }
 0x114   :  { %v76_v50 = vmul.f32 %v94_v37, %v70_v49 }
 0x116   :  { %v82_v51 = vadd.f32 %v95_v40, %v76_v50 }
 0x118   :  { %v84_v52 = vpack.c.bf16 %v82_v51, %v82_v51 }
 0x11a   :  { %88 = vst.msk [vmem:[%s148_s3 + $0x4] sm:$0x1] %vm87_vm10, %v84_v52 }

// kernel: pacl_clip_forward.29
= control target key start
LH: loop header
LB: loop body
LE: loop exit
PB: predicated region body
PF: predicated region fallthrough
CT: control target
= control target key end

     0   :  { %vm122_vm0 = vcmask 523264   ;;  %vm16_vm1 = vcmask 261120   ;;  %v228_v17 = vmov 0.0   ;;  %vm160_vm2 = vcmask 257024   ;;  %s286_s1 = inlined_call_operand.vmem [shape: bf16[192,32], index: 1, kind: input, shape index: {}]   ;;  %s287_s0 = inlined_call_operand.vmem [shape: bf16[8,192], index: 0, kind: input, shape index: {}]   ;;  %s288_s2 = inlined_call_operand.vmem [shape: bf16[8,32], index: 2, kind: output, shape index: {}]  }
   0x1   :  { %v222_v0 = vld [vmem:[%s286_s1 + $0x38] sm:$0xff]  ;;  %v221_v2 = vld [vmem:[%s286_s1 + $0x30] sm:$0xff]  ;;  %v220_v4 = vld [vmem:[%s286_s1 + $0x28] sm:$0xff]  ;;  %17 = vst.msk [vmem:[#allocation2] sm:$0xff] %vm16_vm1, %v228_v17 }
   0x2   :  { %v226_v1 = vld [vmem:[%s286_s1 + $0x58] sm:$0xff]  ;;  %126 = vmatpush.bf16.msra.mxu0 %v222_v0  ;;  %v225_v3 = vld [vmem:[%s286_s1 + $0x50] sm:$0xff]  ;;  %v224_v5 = vld [vmem:[%s286_s1 + $0x48] sm:$0xff] }
   0x3   :  { %143 = vmatpush.bf16.msra.mxu1 %v226_v1  ;;  %v18_v6 = vld [vmem:[%s287_s0] sm:$0xff]  ;;  %v218_v10 = vld [vmem:[%s286_s1 + $0x18] sm:$0xff]  ;;  %v217_v12 = vld [vmem:[%s286_s1 + $0x10] sm:$0xff] }
   0x4   :  { %v219_v7 = vld [vmem:[%s286_s1 + $0x20] sm:$0xff]  ;;  %v46_v8 = vunpack.c.h.b16 %v18_v6  ;;  %v216_v13 = vld [vmem:[%s286_s1 + $0x8] sm:$0xff]  ;;  %v45_v14 = vunpack.c.l.b16 %v18_v6 }
   0x5   :  { %v223_v9 = vld [vmem:[%s286_s1 + $0x40] sm:$0xff] }
   0x6   :  { %127 = vmatpush.bf16.msra.mxu0 %v221_v2  ;;  %v48_v11 = vpack.c.b16 %v46_v8, %v46_v8  ;;  %v215_v15 = vld [vmem:[%s286_s1] sm:$0xff]  ;;  %v47_v16 = vpack.c.b16 %v45_v14, %v45_v14 }
   0x7   :  { %144 = vmatpush.bf16.msra.mxu1 %v225_v3 }
   0x8   :  { %v19_v20 = vld [vmem:[#allocation2] sm:$0xff] }
   0xa   :  { %128 = vmatpush.bf16.msra.mxu0 %v220_v4 }
   0xb   :  { %145 = vmatpush.bf16.msra.mxu1 %v224_v5 }
   0xe   :  { %129 = vmatpush.bf16.msra.mxu0 %v219_v7 }
   0xf   :  { %146 = vmatpush.bf16.msra.mxu1 %v223_v9 }
  0x12   :  { %130 = vmatpush.bf16.msra.mxu0 %v218_v10  ;;  %214 = vmatmul.msk.bf16.vlgmr.msra.gmra.mxu1 %vm122_vm0, %v48_v11 }
  0x16   :  { %131 = vmatpush.bf16.msra.mxu0 %v217_v12 }
  0x1a   :  { %132 = vmatpush.bf16.msra.mxu0 %v216_v13 }
  0x1e   :  { %133 = vmatpush.bf16.msra.mxu0 %v215_v15 }
  0x21   :  { %134 = vmatmul.bf16.vlgmr.msra.gmra.mxu0 %v47_v16 }
  0x8f   :  { %v148_v18 = vpop.f32.mrf.mxu1 }
  0x97   :  { %v150_v19 = vpop.f32.mrf.mxu1 }
  0x9e   :  { %v135_v21 = vpop.f32.mrf.mxu0 }
  0x9f   :  { %v149_v22 = vadd.f32 %v148_v18, %v135_v21 }
  0xa1   :  { %v152_v23 = vadd.f32 %v149_v22, %v19_v20 }
  0xa3   :  { %154 = vst.msk [vmem:[#allocation2] sm:$0xff] %vm16_vm1, %v152_v23 }
  0xa6   :  { %v137_v24 = vpop.f32.mrf.mxu0 }
  0xaa   :  { %v158_v25 = vld [vmem:[#allocation2] sm:$0xff] }
  0xab   :  { %v159_v26 = vpack.c.bf16 %v158_v25, %v158_v25 }
  0xad   :  { %161 = vst.msk [vmem:[%s288_s2] sm:$0xf] %vm160_vm2, %v159_v26 }

// kernel: pacl_clip_forward.32
= control target key start
LH: loop header
LB: loop body
LE: loop exit
PB: predicated region body
PF: predicated region fallthrough
CT: control target
= control target key end

     0   :  { %s581_s12 = smov 0   ;;  %s583_s13 = smov 0   ;;  %s634_s0 = inlined_call_operand.vmem [shape: bf16[4,5,16], index: 0, kind: input, shape index: {}]   ;;  %s635_s1 = inlined_call_operand.vmem [shape: bf16[4,5,16], index: 1, kind: input, shape index: {}]   ;;  %s636_s2 = inlined_call_operand.vmem [shape: bf16[4,5,16], index: 2, kind: input, shape index: {}]   ;;  %s637_s3 = inlined_call_operand.vmem [shape: bf16[4,5,16], index: 3, kind: output, shape index: {}]  }
   0x1   :  { %s585_s14 = smov 0  }
   0x2 LB: > { %s32_s15 = sadd.s32 1, %s551_s13  ;;  %p487_p0 = scmp.ge.s32.totalorder %s555_s14, 1  ;;  %s555_s14 = sphi %s585_s14, %s13_s14   ;;  %s551_s13 = sphi %s583_s13, %s639_s13   ;;  %s547_s12 = sphi %s581_s12, %s638_s12  }
   0x3   : > { %p34_p1 = scmp.ge.s32.totalorder %s32_s15, 4  ;;  %p190_p2 = scmp.lt.s32.totalorder %s555_s14, 5 }
   0x5   : > { %s641_s15 = smov (%p34_p1, %s32_s15), 0  ;;  %p191_p3 = pnand %p487_p0, %p190_p2 }
   0x6   : > { %p232_p4 = scmp.lt.s32.totalorder (!%p191_p3), %s547_s12, 3 }
   0x7   : > { %194 = sbr.rel (%p191_p3) target bundleno = 626 (0x272), region = 32 }
   0xc   : > { %s643_s12 = smov (!%p232_p4, %s547_s12), 3  ;;  %vm275_vm0 = vcmask 130048   ;;  %vm265_vm1 = vcmask 4096   ;;  %v557_v6 = vmov -inf   ;;  %vm296_vm2 = vcmask 36864  }
   0xd   : > { %s599_s16 = sshll.u32 %s643_s12, 2  ;;  %266 = vst.msk [vmem:[#allocation2] sm:$0x1f] %vm265_vm1, %v557_v6  ;;  %v558_v10 = vmov 0   ;;  %v559_v11 = vmov 0.0   ;;  %vm333_vm3 = vcmask 1041408  }
   0xe   : > { %s245_s19 = scalar_lea.vmem %s635_s1, %s599_s16  ;;  %s238_s22 = scalar_lea.vmem %s634_s0, %s599_s16  ;;  %524 = vset.pattern.permute.xlu0 %v558_v10  ;;  %525 = vset.pattern.permute.xlu1 %v558_v10  ;;  %267 = vst.msk [vmem:[#allocation3] sm:$0x1f] %vm265_vm1, %v559_v11  ;;  %vm334_vm4 = vcmask 1042432   ;;  %v560_v17 = vmov 65535   ;;  %vm329_vm5 = vcmask 39936   ;;  %vm268_vm6 = vcmask 126976  }
   0xf   : > { %v274_v0 = vld [vmem:[%s245_s19] sm:$0x7]  ;;  %526 = vset.pattern.permute.xlu2 %v558_v10  ;;  %s252_s25 = scalar_lea.vmem %s636_s2, %s599_s16  ;;  %v335_v18 = vsel %vm333_vm3, 4294967295, %v560_v17  ;;  %269 = vst.msk [vmem:[#allocation4] sm:$0x1f] %vm268_vm6, %v559_v11  ;;  %s259_s28 = scalar_lea.vmem %s637_s3, %s599_s16  ;;  %vm370_vm7 = vcmask 124928  }
  0x10   : > { %v270_v1 = vld [vmem:[%s238_s22] sm:$0x7]  ;;  %v280_v2 = vsel %vm275_vm0, %v274_v0, 0  ;;  %v336_v19 = vsel %vm334_vm4, %v335_v18, 0  ;;  %vm371_vm8 = vsmask.f32 2304 }
  0x11   : > { %v271_v3 = vunpack.c.l.bf16 %v270_v1  ;;  %289 = vmatpush.bf16.xpose.msra.mxu0 %v280_v2  ;;  %v328_v16 = vld [vmem:[%s252_s25] sm:$0x7]  ;;  %vm372_vm9 = vmand %vm370_vm7, %vm371_vm8 }
  0x12   : > { %v338_v20 = vand.u32 %v336_v19, %v328_v16  ;;  %v373_v44 = vld [vmem:[%s259_s28] sm:$0x7] }
  0x13   : > { %v272_v4 = vmul.f32 0.25, %v271_v3 }
  0x14   : > { %v295_v12 = vld [vmem:[#allocation2] sm:$0x1f]  ;;  %347 = vmatpush.bf16.msra.mxu1 %v338_v20 }
  0x15   : > { %v273_v5 = vpack.c.bf16 %v272_v4, %v272_v4  ;;  %v312_v29 = vld [vmem:[#allocation3] sm:$0x1f] }
  0x16   : > { %v320_v37 = vld [vmem:[#allocation4] sm:$0x1f] }
  0x18   : > { %492 = vmatmul.msk.bf16.vlgmr.msra.gmra.mxu0 %vm275_vm0, %v273_v5 }
  0x95   : > { %v291_v7 = vpop.f32.mrf.mxu0 }
  0x96   : > { %v297_v8 = vsel %vm296_vm2, %v291_v7, -inf }
  0x97   : > { %298 = vmax.xlane.f32.xlu0 %v297_v8 }
  0x9d   : > { %v293_v9 = vpop.f32.mrf.mxu0 }
 0x10a   : > { %v299_v13 = vpop.xlane.xlu0 %298 }
 0x10b   : > { %v300_v14 = vmax.f32 %v295_v12, %v299_v13 }
 0x10d   : > { %v301_v15 = vsub.f32 %v295_v12, %v300_v14  ;;  %356 = vst.msk [vmem:[#allocation2] sm:$0x1f] %vm265_vm1, %v300_v14  ;;  %306 = vperm.xlu0 %524, %v300_v14  }
 0x10f   : > { %v302_v27 = vmul.f32 1.442695, %v301_v15 }
 0x17f   : > { %v307_v21 = vpop.permute.xlu0 %306 }
 0x180   : > { %v309_v22 = vsub.f32 %v291_v7, %v307_v21 }
 0x182   : > { %v310_v23 = vmul.f32 1.442695, %v309_v22 }
 0x184   : > { %527 = vpow2.f32 %v310_v23 }
 0x185   : > { %529 = vpow2.f32 %v302_v27 }
 0x18a   : > { %v528_v24 = vpop.eup %527 }
 0x18b   : > { %v314_v25 = vsel %vm296_vm2, %v528_v24, 0.0  ;;  %v327_v26 = vpack.c.bf16 %v528_v24, %v528_v24  ;;  %v530_v28 = vpop.eup %529 }
 0x18c   : > { %315 = vadd.xlane.f32.xlu1 %v314_v25  ;;  %v313_v30 = vmul.f32 %v530_v28, %v312_v29 }
 0x18d   : > { %493 = vmatmul.msk.bf16.vlgmr.msra.gmra.mxu1 %vm329_vm5, %v327_v26 }
 0x1a5   : > { %323 = vperm.xlu1 %525, %v530_v28  }
 0x1ff   : > { %v316_v31 = vpop.xlane.xlu1 %315 }
 0x200   : > { %v317_v32 = vadd.f32 %v316_v31, %v313_v30 }
 0x202   : > { %319 = vst.msk [vmem:[#allocation3] sm:$0x1f] %vm265_vm1, %v317_v32 }
 0x209   : > { %v361_v33 = vld [vmem:[#allocation3] sm:$0x1f] }
 0x20a   : > { %v349_v34 = vpop.f32.mrf.mxu1  ;;  %531 = vrcp.f32 %v361_v33 }
 0x210   : > { %v532_v35 = vpop.eup %531 }
 0x211   : > { %365 = vperm.xlu2 %526, %v532_v35  }
 0x212   : > { %v351_v36 = vpop.f32.mrf.mxu1 }
 0x217   : > { %v324_v38 = vpop.permute.xlu1 %323 }
 0x218   : > { %v326_v39 = vmul.f32 %v324_v38, %v320_v37 }
 0x21a   : > { %v353_v40 = vadd.f32 %v349_v34, %v326_v39 }
 0x21c   : > { %355 = vst.msk [vmem:[#allocation4] sm:$0x1f] %vm268_vm6, %v353_v40 }
 0x223   : > { %v360_v41 = vld [vmem:[#allocation4] sm:$0x1f] }
 0x26b   : > { %v366_v42 = vpop.permute.xlu2 %365 }
 0x26c   : > { %v368_v43 = vmul.f32 %v366_v42, %v360_v41 }
 0x26e   : > { %v369_v45 = vpack.c.bf16 %v368_v43, %v368_v43 }
 0x270   : > { %v374_v46 = vsel %vm372_vm9, %v369_v45, %v373_v44 }
 0x271   : > { %375 = vst [vmem:[%s259_s28] sm:$0x7] %v374_v46 }
 0x272 PF: > { %s13_s14 = sadd.s32 1, %s555_s14   ;;  %s638_s12 = smov %s551_s13 }
 0x273   : > { %p10_p5 = scmp.ge.s32.totalorder %s13_s14, 6   ;;  %s639_s13 = smov %s641_s15 }
 0x275   :  { %12 = sbr.rel (!%p10_p5) target bundleno = 2 (0x2), region = 76 }

// kernel: pacl_clip_forward.33
= control target key start
LH: loop header
LB: loop body
LE: loop exit
PB: predicated region body
PF: predicated region fallthrough
CT: control target
= control target key end

     0   :  { %s628_s15 = smov 0   ;;  %s630_s16 = smov 0   ;;  %s682_s0 = inlined_call_operand.vmem [shape: bf16[2,10,16], index: 0, kind: input, shape index: {}]   ;;  %s683_s1 = inlined_call_operand.vmem [shape: bf16[2,16,32], index: 1, kind: input, shape index: {}]   ;;  %s684_s2 = inlined_call_operand.vmem [shape: f32[1,32], index: 2, kind: input, shape index: {}]   ;;  %s685_s3 = inlined_call_operand.vmem [shape: bf16[10,32], index: 3, kind: input, shape index: {}]   ;;  %s686_s4 = inlined_call_operand.vmem [shape: bf16[10,32], index: 4, kind: output, shape index: {}]  }
   0x1   :  { %s632_s17 = smov 0  }
   0x2 LB: > { %s26_s18 = sadd.s32 1, %s596_s16  ;;  %p528_p0 = scmp.ge.s32.totalorder %s600_s17, 1  ;;  %s600_s17 = sphi %s632_s17, %s14_s17   ;;  %s596_s16 = sphi %s630_s16, %s688_s16   ;;  %s592_s15 = sphi %s628_s15, %s687_s15  }
   0x3   : > { %p27_p1 = scmp.ge.s32.totalorder %s26_s18, 2  ;;  %p229_p2 = scmp.lt.s32.totalorder %s600_s17, 3 }
   0x5   : > { %s690_s18 = smov (%p27_p1, %s26_s18), 0  ;;  %p230_p3 = pnand %p528_p0, %p229_p2 }
   0x6   : > { %p282_p4 = scmp.lt.s32.totalorder (!%p230_p3), %s592_s15, 1  ;;  %p533_p5 = scmp.ne.s32.totalorder (!%p230_p3), %s592_s15, 0 }
   0x7   : > { %233 = sbr.rel (%p230_p3) target bundleno = 176 (0xb0), region = 36 }
   0xc   : > { %s283_s19 = scalar_select %p282_p4, %s592_s15, 1 }
   0xd   : > { %324 = sbr.rel (%p533_p5) target bundleno = 21 (0x15), region = 40 }
   0xe   : > { %s548_s20 = sshll.u32 %s283_s19, 3 }
   0xf   : > { %s289_s23 = scalar_lea.vmem %s682_s0, %s548_s20  ;;  %s298_s26 = scalar_lea.vmem %s683_s1, %s548_s20 }
  0x12   : > { %vm325_vm0 = vcmask 261120   ;;  %vm327_vm1 = vcmask 254976   ;;  %v602_v0 = vmov 0.0  }
  0x13   : > { %326 = vst.msk [vmem:[#allocation2] sm:$0xff] %vm325_vm0, %v602_v0 }
  0x14   : > { %328 = vst.msk [vmem:[#allocation2 + $0x8] sm:$0x3] %vm327_vm1, %v602_v0 }
  0x15 PF: > { %v551_v1 = vld [vmem:[%s298_s26] sm:$0xff]  ;;  %vm346_vm2 = vcmask 130048   ;;  %vm366_vm3 = vcmask 261120   ;;  %vm368_vm4 = vcmask 254976   ;;  %p543_p6 = scmp.ne.s32.totalorder %s592_s15, 1 }
  0x16   : > { %v536_v2 = vld [vmem:[%s289_s23] sm:$0xf]  ;;  %v550_v3 = vld [vmem:[%s289_s23] sm:$0x10]  ;;  %357 = vmatpush.bf16.msra.mxu0 %v551_v1 }
  0x17   : > { %v537_v4 = vor.u32 %v550_v3, %v536_v2 }
  0x19   : > { %542 = vmatmul.msk.bf16.vlgmr.msra.gmra.mxu0 %vm346_vm2, %v537_v4 }
  0x1a   : > { %v331_v5 = vld [vmem:[#allocation2] sm:$0xff] }
  0x1b   : > { %v332_v8 = vld [vmem:[#allocation2 + $0x8] sm:$0x3] }
  0x96   : > { %v359_v6 = vpop.f32.mrf.mxu0 }
  0x97   : > { %v364_v7 = vadd.f32 %v359_v6, %v331_v5 }
  0x99   : > { %367 = vst.msk [vmem:[#allocation2] sm:$0xff] %vm366_vm3, %v364_v7 }
  0x9d   : > { %373 = sbr.rel (%p543_p6) target bundleno = 176 (0xb0), region = 44 }
  0x9e   : > { %v361_v9 = vpop.f32.mrf.mxu0 }
  0x9f   : > { %v365_v10 = vadd.f32 %v361_v9, %v332_v8 }
  0xa1   : > { %369 = vst.msk [vmem:[#allocation2 + $0x8] sm:$0x3] %vm368_vm4, %v365_v10 }
  0xa2   : > { %v374_v11 = vld [vmem:[#allocation2] sm:$0xff]  ;;  %vm390_vm5 = vcmask 257024   ;;  %vm392_vm6 = vcmask 253952  }
  0xa3   : > { %v577_v12 = vld [vmem:[%s684_s2] ss:$0 sm:$0xff]  ;;  %v383_v15 = vld [vmem:[%s685_s3 + $0x4] sm:$0x1] }
  0xa4   : > { %v382_v13 = vld [vmem:[%s685_s3] sm:$0xf]  ;;  %v380_v16 = vadd.f32 %v577_v12, %v374_v11  ;;  %v385_v19 = vunpack.c.l.bf16 %v383_v15 }
  0xa5   : > { %v384_v17 = vunpack.c.l.bf16 %v382_v13 }
  0xa7   : > { %v386_v20 = vadd.f32 %v384_v17, %v380_v16 }
  0xa8   : > { %v375_v14 = vld [vmem:[#allocation2 + $0x8] sm:$0x3] }
  0xa9   : > { %v381_v18 = vadd.f32 %v577_v12, %v375_v14  ;;  %v388_v22 = vpack.c.bf16 %v386_v20, %v386_v20 }
  0xab   : > { %v387_v21 = vadd.f32 %v385_v19, %v381_v18  ;;  %391 = vst.msk [vmem:[%s686_s4] sm:$0xf] %vm390_vm5, %v388_v22 }
  0xad   : > { %v389_v23 = vpack.c.bf16 %v387_v21, %v387_v21 }
  0xaf   : > { %393 = vst.msk [vmem:[%s686_s4 + $0x4] sm:$0x1] %vm392_vm6, %v389_v23 }
  0xb0 PF: > { %s14_s17 = sadd.s32 1, %s600_s17   ;;  %s687_s15 = smov %s596_s16 }
  0xb1   : > { %p11_p7 = scmp.ge.s32.totalorder %s14_s17, 4   ;;  %s688_s16 = smov %s690_s18 }
  0xb3   :  { %13 = sbr.rel (!%p11_p7) target bundleno = 2 (0x2), region = 83 }

// kernel: pacl_clip_forward.34
= control target key start
LH: loop header
LB: loop body
LE: loop exit
PB: predicated region body
PF: predicated region fallthrough
CT: control target
= control target key end

     0   :  { %vm31_vm0 = vcmask 261120   ;;  %vm35_vm1 = vcmask 254976   ;;  %v229_v6 = vmov 32.0   ;;  %v230_v29 = vmov 0.0   ;;  %s293_s0 = inlined_call_operand.vmem [shape: bf16[10,32], index: 0, kind: input, shape index: {}]   ;;  %s294_s2 = inlined_call_operand.vmem [shape: f32[1,32], index: 2, kind: input, shape index: {}]   ;;  %s295_s3 = inlined_call_operand.vmem [shape: f32[1,32], index: 3, kind: input, shape index: {}]   ;;  %s296_s4 = inlined_call_operand.vmem [shape: f32[1,128], index: 4, kind: input, shape index: {}]   ;;  %s297_s1 = inlined_call_operand.vmem [shape: bf16[32,128], index: 1, kind: input, shape index: {}]   ;;  %s298_s5 = inlined_call_operand.vmem [shape: bf16[10,128], index: 5, kind: output, shape index: {}]  }
   0x1   :  { %v27_v0 = vld [vmem:[%s293_s0] sm:$0xf]  ;;  %v28_v2 = vld [vmem:[%s293_s0 + $0x4] sm:$0x1]  ;;  %215 = vrcp.f32 %v229_v6  ;;  %v209_v23 = vld [vmem:[%s297_s1 + $0x8] sm:$0xff] }
   0x2   :  { %v29_v1 = vunpack.c.l.bf16 %v27_v0  ;;  %v30_v4 = vunpack.c.l.bf16 %v28_v2  ;;  %124 = vmatpush.bf16.msra.mxu0 %v209_v23  ;;  %v208_v25 = vld [vmem:[%s297_s1] sm:$0xff]  ;;  %26 = vst [vmem:[#allocation2 + $0x8] sm:$0x3] %v230_v29 }
   0x3   :  { %v212_v45 = vld [vmem:[%s294_s2] ss:$0 sm:$0xff] }
   0x4   :  { %v32_v3 = vsel %vm31_vm0, %v29_v1, 0.0  ;;  %v36_v5 = vsel %vm35_vm1, %v30_v4, 0.0  ;;  %v213_v50 = vld [vmem:[%s295_s3] ss:$0 sm:$0xff] }
   0x5   :  { %33 = vadd.xlane.f32.xlu0 %v32_v3  ;;  %v214_v55 = vld [vmem:[%s296_s4] ss:$0 sm:$0xff] }
   0x6   :  { %125 = vmatpush.bf16.msra.mxu0 %v208_v25 }
   0x7   :  { %v216_v7 = vpop.eup %215 }
   0x8   :  { %v40_v8 = vmul.f32 32.0, %v216_v7  ;;  %vm44_vm2 = vweird.f32 %v216_v7 }
   0x9   :  { %v98_v59 = vld [vmem:[#allocation2 + $0x8] sm:$0x3] }
   0xa   :  { %v41_v9 = vsub.f32 1.0, %v40_v8 }
   0xc   :  { %v42_v10 = vmul.f32 %v216_v7, %v41_v9 }
   0xd   :  { %37 = vadd.xlane.f32.xlu0 %v36_v5 }
   0xe   :  { %v43_v11 = vadd.f32 %v216_v7, %v42_v10 }
  0x10   :  { %v45_v12 = vsel %vm44_vm2, %v216_v7, %v43_v11 }
  0x78   :  { %v34_v13 = vpop.xlane.xlu0 %33 }
  0x79   :  { %v46_v14 = vmul.f32 %v45_v12, %v34_v13 }
  0x7b   :  { %v48_v15 = vsub.f32 %v29_v1, %v46_v14 }
  0x7d   :  { %v50_v16 = vmul.f32 %v48_v15, %v48_v15 }
  0x7f   :  { %v52_v17 = vsel %vm31_vm0, %v50_v16, 0.0 }
  0x80   :  { %53 = vadd.xlane.f32.xlu1 %v52_v17  ;;  %v38_v18 = vpop.xlane.xlu0 %37 }
  0x81   :  { %v47_v19 = vmul.f32 %v45_v12, %v38_v18 }
  0x83   :  { %v49_v20 = vsub.f32 %v30_v4, %v47_v19 }
  0x85   :  { %v51_v21 = vmul.f32 %v49_v20, %v49_v20 }
  0x87   :  { %v55_v22 = vsel %vm35_vm1, %v51_v21, 0.0 }
  0x88   :  { %56 = vadd.xlane.f32.xlu1 %v55_v22 }
  0xf3   :  { %v54_v24 = vpop.xlane.xlu1 %53 }
  0xf4   :  { %v58_v26 = vmul.f32 %v54_v24, %v45_v12 }
  0xf6   :  { %v60_v27 = vadd.f32 1e-05, %v58_v26 }
  0xf8   :  { %217 = vrsqrt.f32 %v60_v27  ;;  %vm68_vm4 = vweird.f32 %v60_v27 }
  0xfb   :  { %v57_v28 = vpop.xlane.xlu1 %56 }
  0xfc   :  { %v59_v30 = vmul.f32 %v57_v28, %v45_v12 }
  0xfe   :  { %v218_v31 = vpop.eup %217  ;;  %v61_v32 = vadd.f32 1e-05, %v59_v30 }
  0xff   :  { %v63_v33 = vmul.f32 %v218_v31, %v60_v27  ;;  %vm69_vm3 = vweird.f32 %v218_v31 }
 0x100   :  { %219 = vrsqrt.f32 %v61_v32  ;;  %vm70_vm5 = vmor %vm68_vm4, %vm69_vm3  ;;  %vm78_vm7 = vweird.f32 %v61_v32 }
 0x101   :  { %v64_v34 = vmul.f32 %v218_v31, %v63_v33 }
 0x103   :  { %v65_v35 = vmul.f32 0.5, %v64_v34 }
 0x105   :  { %v66_v36 = vsub.f32 1.5, %v65_v35 }
 0x106   :  { %v220_v37 = vpop.eup %219 }
 0x107   :  { %v67_v38 = vmul.f32 %v218_v31, %v66_v36  ;;  %v73_v39 = vmul.f32 %v220_v37, %v61_v32  ;;  %vm79_vm6 = vweird.f32 %v220_v37 }
 0x108   :  { %vm80_vm8 = vmor %vm78_vm7, %vm79_vm6 }
 0x109   :  { %v74_v40 = vmul.f32 %v220_v37, %v73_v39  ;;  %v71_v41 = vsel %vm70_vm5, %v218_v31, %v67_v38 }
 0x10a   :  { %v82_v44 = vmul.f32 %v71_v41, %v48_v15 }
 0x10b   :  { %v75_v42 = vmul.f32 0.5, %v74_v40 }
 0x10c   :  { %v88_v49 = vmul.f32 %v212_v45, %v82_v44 }
 0x10d   :  { %v76_v43 = vsub.f32 1.5, %v75_v42 }
 0x10e   :  { %v94_v52 = vadd.f32 %v213_v50, %v88_v49 }
 0x10f   :  { %v77_v46 = vmul.f32 %v220_v37, %v76_v43 }
 0x111   :  { %v81_v47 = vsel %vm80_vm8, %v220_v37, %v77_v46 }
 0x112   :  { %v83_v48 = vmul.f32 %v81_v47, %v49_v20 }
 0x114   :  { %v89_v51 = vmul.f32 %v212_v45, %v83_v48 }
 0x116   :  { %v95_v53 = vadd.f32 %v213_v50, %v89_v51 }
 0x118   :  { %v96_v54 = vpack.c.bf16 %v95_v53, %v94_v52 }
 0x11a   :  { %205 = vmatmul.msk.bf16.vlgmr.msra.gmra.mxu0 %vm31_vm0, %v96_v54 }
 0x197   :  { %v127_v56 = vpop.f32.mrf.mxu0 }
 0x198   :  { %v145_v57 = vadd.f32 %v214_v55, %v127_v56 }
 0x19a   :  { %v206_v58 = vmul.f32 -1.702, %v145_v57 }
 0x19c   :  { %v151_v60 = vmul.f32 1.442695, %v206_v58 }
 0x19e   :  { %221 = vpow2.f32 %v151_v60 }
 0x19f   :  { %v129_v61 = vpop.f32.mrf.mxu0 }
 0x1a0   :  { %v133_v62 = vadd.f32 %v129_v61, %v98_v59 }
 0x1a2   :  { %135 = vst [vmem:[#allocation2 + $0x8] sm:$0x3] %v133_v62 }
 0x1a4   :  { %v222_v63 = vpop.eup %221 }
 0x1a5   :  { %v155_v0 = vadd.f32 1.0, %v222_v63 }
 0x1a7   :  { %223 = vrcp.f32 %v155_v0  ;;  %v168_v8 = vand.u32 2147483648, %v155_v0  ;;  %v166_v10 = vand.u32 2147483647, %v155_v0  ;;  %vm162_vm10 = vweird.f32 %v155_v0 }
 0x1a9   :  { %v140_v1 = vld [vmem:[#allocation2 + $0x8] sm:$0x3]  ;;  %v169_v13 = vor.u32 1.1754944e-38, %v168_v8  ;;  %vm167_vm12 = vcmp.eq.f32.partialorder %v166_v10, 8.507059e+37 }
 0x1aa   :  { %v146_v2 = vadd.f32 %v214_v55, %v140_v1 }
 0x1ac   :  { %v207_v3 = vmul.f32 -1.702, %v146_v2 }
 0x1ad   :  { %v224_v5 = vpop.eup %223 }
 0x1ae   :  { %v153_v4 = vmul.f32 1.442695, %v207_v3  ;;  %v158_v6 = vmul.f32 %v224_v5, %v155_v0  ;;  %vm163_vm9 = vweird.f32 %v224_v5 }
 0x1af   :  { %vm164_vm11 = vmor %vm162_vm10, %vm163_vm9 }
 0x1b0   :  { %225 = vpow2.f32 %v153_v4  ;;  %v159_v7 = vsub.f32 1.0, %v158_v6 }
 0x1b2   :  { %v160_v9 = vmul.f32 %v224_v5, %v159_v7 }
 0x1b4   :  { %v161_v12 = vadd.f32 %v224_v5, %v160_v9 }
 0x1b6   :  { %v226_v11 = vpop.eup %225  ;;  %v165_v15 = vsel %vm164_vm11, %v224_v5, %v161_v12 }
 0x1b7   :  { %v156_v14 = vadd.f32 1.0, %v226_v11  ;;  %v170_v16 = vsel %vm167_vm12, %v169_v13, %v165_v15 }
 0x1b8   :  { %v187_v17 = vmul.f32 %v170_v16, %v145_v57 }
 0x1b9   :  { %227 = vrcp.f32 %v156_v14  ;;  %v183_v22 = vand.u32 2147483648, %v156_v14  ;;  %v181_v24 = vand.u32 2147483647, %v156_v14  ;;  %vm177_vm14 = vweird.f32 %v156_v14 }
 0x1ba   :  { %v189_v18 = vpack.c.bf16 %v187_v17, %v187_v17 }
 0x1bb   :  { %v184_v26 = vor.u32 1.1754944e-38, %v183_v22  ;;  %vm182_vm0 = vcmp.eq.f32.partialorder %v181_v24, 8.507059e+37 }
 0x1bc   :  { %191 = vst [vmem:[%s298_s5] sm:$0xf] %v189_v18 }
 0x1bf   :  { %v228_v19 = vpop.eup %227 }
 0x1c0   :  { %v173_v20 = vmul.f32 %v228_v19, %v156_v14  ;;  %vm178_vm13 = vweird.f32 %v228_v19 }
 0x1c1   :  { %vm179_vm15 = vmor %vm177_vm14, %vm178_vm13 }
 0x1c2   :  { %v174_v21 = vsub.f32 1.0, %v173_v20 }
 0x1c4   :  { %v175_v23 = vmul.f32 %v228_v19, %v174_v21 }
 0x1c6   :  { %v176_v25 = vadd.f32 %v228_v19, %v175_v23 }
 0x1c8   :  { %v180_v27 = vsel %vm179_vm15, %v228_v19, %v176_v25 }
 0x1c9   :  { %v185_v28 = vsel %vm182_vm0, %v184_v26, %v180_v27 }
 0x1ca   :  { %v188_v29 = vmul.f32 %v185_v28, %v146_v2 }
 0x1cc   :  { %v190_v30 = vpack.c.bf16 %v188_v29, %v188_v29 }
 0x1ce   :  { %192 = vst [vmem:[%s298_s5 + $0x4] sm:$0x1] %v190_v30 }

// kernel: pacl_clip_forward.35
= control target key start
LH: loop header
LB: loop body
LE: loop exit
PB: predicated region body
PF: predicated region fallthrough
CT: control target
= control target key end

     0   :  { %vm21_vm0 = vcmask 261120   ;;  %v193_v2 = vmov 0.0   ;;  %vm23_vm1 = vcmask 254976   ;;  %vm138_vm2 = vcmask 257024   ;;  %s266_s1 = inlined_call_operand.vmem [shape: bf16[128,32], index: 1, kind: input, shape index: {}]   ;;  %s267_s2 = inlined_call_operand.vmem [shape: f32[1,32], index: 2, kind: input, shape index: {}]   ;;  %s268_s0 = inlined_call_operand.vmem [shape: bf16[10,128], index: 0, kind: input, shape index: {}]   ;;  %s269_s3 = inlined_call_operand.vmem [shape: bf16[10,32], index: 3, kind: input, shape index: {}]   ;;  %s270_s4 = inlined_call_operand.vmem [shape: bf16[10,32], index: 4, kind: output, shape index: {}]  }
   0x1   :  { %v190_v0 = vld [vmem:[%s266_s1 + $0x38] sm:$0xff]  ;;  %v189_v1 = vld [vmem:[%s266_s1 + $0x30] sm:$0xff]  ;;  %22 = vst.msk [vmem:[#allocation2] sm:$0xff] %vm21_vm0, %v193_v2  ;;  %v188_v3 = vld [vmem:[%s266_s1 + $0x28] sm:$0xff]  ;;  %vm140_vm3 = vcmask 253952  }
   0x2   :  { %99 = vmatpush.bf16.msra.mxu0 %v190_v0  ;;  %v187_v4 = vld [vmem:[%s266_s1 + $0x20] sm:$0xff]  ;;  %v186_v5 = vld [vmem:[%s266_s1 + $0x18] sm:$0xff]  ;;  %v185_v6 = vld [vmem:[%s266_s1 + $0x10] sm:$0xff]  ;;  %24 = vst.msk [vmem:[#allocation2 + $0x8] sm:$0x3] %vm23_vm1, %v193_v2 }
   0x3   :  { %v184_v7 = vld [vmem:[%s266_s1 + $0x8] sm:$0xff]  ;;  %v183_v8 = vld [vmem:[%s266_s1] sm:$0xff] }
   0x4   :  { %v148_v9 = vld [vmem:[%s268_s0] sm:$0xf]  ;;  %v182_v10 = vld [vmem:[%s268_s0] sm:$0x10] }
   0x5   :  { %v149_v11 = vor.u32 %v182_v10, %v148_v9  ;;  %v130_v15 = vld [vmem:[%s269_s3] sm:$0xf]  ;;  %v131_v24 = vld [vmem:[%s269_s3 + $0x4] sm:$0x1] }
   0x6   :  { %100 = vmatpush.bf16.msra.mxu0 %v189_v1  ;;  %v192_v17 = vld [vmem:[%s267_s2] ss:$0 sm:$0xff]  ;;  %v132_v19 = vunpack.c.l.bf16 %v130_v15  ;;  %v133_v26 = vunpack.c.l.bf16 %v131_v24 }
   0x8   :  { %v27_v12 = vld [vmem:[#allocation2] sm:$0xff] }
   0x9   :  { %v28_v16 = vld [vmem:[#allocation2 + $0x8] sm:$0x3] }
   0xa   :  { %101 = vmatpush.bf16.msra.mxu0 %v188_v3 }
   0xe   :  { %102 = vmatpush.bf16.msra.mxu0 %v187_v4 }
  0x12   :  { %103 = vmatpush.bf16.msra.mxu0 %v186_v5 }
  0x16   :  { %104 = vmatpush.bf16.msra.mxu0 %v185_v6 }
  0x1a   :  { %105 = vmatpush.bf16.msra.mxu0 %v184_v7 }
  0x1e   :  { %106 = vmatpush.bf16.msra.mxu0 %v183_v8 }
  0x21   :  { %107 = vmatmul.bf16.vlgmr.msra.gmra.mxu0 %v149_v11 }
  0x9e   :  { %v108_v13 = vpop.f32.mrf.mxu0 }
  0x9f   :  { %v113_v14 = vadd.f32 %v108_v13, %v27_v12 }
  0xa1   :  { %116 = vst.msk [vmem:[#allocation2] sm:$0xff] %vm21_vm0, %v113_v14 }
  0xa6   :  { %v110_v18 = vpop.f32.mrf.mxu0 }
  0xa7   :  { %v114_v20 = vadd.f32 %v110_v18, %v28_v16 }
  0xa8   :  { %v122_v21 = vld [vmem:[#allocation2] sm:$0xff] }
  0xa9   :  { %v128_v22 = vadd.f32 %v192_v17, %v122_v21  ;;  %118 = vst.msk [vmem:[#allocation2 + $0x8] sm:$0x3] %vm23_vm1, %v114_v20 }
  0xab   :  { %v134_v23 = vadd.f32 %v132_v19, %v128_v22 }
  0xad   :  { %v136_v25 = vpack.c.bf16 %v134_v23, %v134_v23 }
  0xaf   :  { %139 = vst.msk [vmem:[%s270_s4] sm:$0xf] %vm138_vm2, %v136_v25 }
  0xb0   :  { %v123_v27 = vld [vmem:[#allocation2 + $0x8] sm:$0x3] }
  0xb1   :  { %v129_v28 = vadd.f32 %v192_v17, %v123_v27 }
  0xb3   :  { %v135_v29 = vadd.f32 %v133_v26, %v129_v28 }
  0xb5   :  { %v137_v30 = vpack.c.bf16 %v135_v29, %v135_v29 }
  0xb7   :  { %141 = vst.msk [vmem:[%s270_s4 + $0x4] sm:$0x1] %vm140_vm3, %v137_v30 }

// kernel: pacl_clip_forward.41
= control target key start
LH: loop header
LB: loop body
LE: loop exit
PB: predicated region body
PF: predicated region fallthrough
CT: control target
= control target key end

     0   :  { %vm16_vm0 = vcmask 261120   ;;  %v70_v3 = vmov 32.0   ;;  %vm57_vm5 = vcmask 257024   ;;  %s105_s0 = inlined_call_operand.vmem [shape: bf16[8,32], index: 0, kind: input, shape index: {}]   ;;  %s106_s1 = inlined_call_operand.vmem [shape: f32[1,32], index: 1, kind: input, shape index: {}]   ;;  %s107_s2 = inlined_call_operand.vmem [shape: f32[1,32], index: 2, kind: input, shape index: {}]   ;;  %s108_s3 = inlined_call_operand.vmem [shape: bf16[8,32], index: 3, kind: output, shape index: {}]  }
   0x1   :  { %v14_v0 = vld [vmem:[%s105_s0] sm:$0xf]  ;;  %66 = vrcp.f32 %v70_v3 }
   0x2   :  { %v15_v1 = vunpack.c.l.bf16 %v14_v0  ;;  %v64_v24 = vld [vmem:[%s106_s1] ss:$0 sm:$0xff] }
   0x3   :  { %v65_v26 = vld [vmem:[%s107_s2] ss:$0 sm:$0xff] }
   0x4   :  { %v17_v2 = vsel %vm16_vm0, %v15_v1, 0.0 }
   0x5   :  { %18 = vadd.xlane.f32.xlu0 %v17_v2 }
   0x7   :  { %v67_v4 = vpop.eup %66 }
   0x8   :  { %v21_v5 = vmul.f32 32.0, %v67_v4  ;;  %vm25_vm1 = vweird.f32 %v67_v4 }
   0xa   :  { %v22_v6 = vsub.f32 1.0, %v21_v5 }
   0xc   :  { %v23_v7 = vmul.f32 %v67_v4, %v22_v6 }
   0xe   :  { %v24_v8 = vadd.f32 %v67_v4, %v23_v7 }
  0x10   :  { %v26_v9 = vsel %vm25_vm1, %v67_v4, %v24_v8 }
  0x78   :  { %v19_v10 = vpop.xlane.xlu0 %18 }
  0x79   :  { %v27_v11 = vmul.f32 %v26_v9, %v19_v10 }
  0x7b   :  { %v28_v12 = vsub.f32 %v15_v1, %v27_v11 }
  0x7d   :  { %v29_v13 = vmul.f32 %v28_v12, %v28_v12 }
  0x7f   :  { %v30_v14 = vsel %vm16_vm0, %v29_v13, 0.0 }
  0x80   :  { %31 = vadd.xlane.f32.xlu0 %v30_v14 }
  0xf3   :  { %v32_v15 = vpop.xlane.xlu0 %31 }
  0xf4   :  { %v33_v16 = vmul.f32 %v32_v15, %v26_v9 }
  0xf6   :  { %v34_v17 = vadd.f32 1e-05, %v33_v16 }
  0xf8   :  { %68 = vrsqrt.f32 %v34_v17  ;;  %vm41_vm3 = vweird.f32 %v34_v17 }
  0xfe   :  { %v69_v18 = vpop.eup %68 }
  0xff   :  { %v36_v19 = vmul.f32 %v69_v18, %v34_v17  ;;  %vm42_vm2 = vweird.f32 %v69_v18 }
 0x100   :  { %vm43_vm4 = vmor %vm41_vm3, %vm42_vm2 }
 0x101   :  { %v37_v20 = vmul.f32 %v69_v18, %v36_v19 }
 0x103   :  { %v38_v21 = vmul.f32 0.5, %v37_v20 }
 0x105   :  { %v39_v22 = vsub.f32 1.5, %v38_v21 }
 0x107   :  { %v40_v23 = vmul.f32 %v69_v18, %v39_v22 }
 0x109   :  { %v44_v25 = vsel %vm43_vm4, %v69_v18, %v40_v23 }
 0x10a   :  { %v45_v27 = vmul.f32 %v44_v25, %v28_v12 }
 0x10c   :  { %v50_v28 = vmul.f32 %v64_v24, %v45_v27 }
 0x10e   :  { %v55_v29 = vadd.f32 %v65_v26, %v50_v28 }
 0x110   :  { %v56_v30 = vpack.c.bf16 %v55_v29, %v55_v29 }
 0x112   :  { %58 = vst.msk [vmem:[%s108_s3] sm:$0xf] %vm57_vm5, %v56_v30 }

// kernel: pacl_clip_forward.42
= control target key start
LH: loop header
LB: loop body
LE: loop exit
PB: predicated region body
PF: predicated region fallthrough
CT: control target
= control target key end

     0   :  { %vm19_vm0 = vcmask 261120   ;;  %v88_v1 = vmov 0.0   ;;  %vm69_vm1 = vcmask 257024   ;;  %s124_s1 = inlined_call_operand.vmem [shape: bf16[32,32], index: 1, kind: input, shape index: {}]   ;;  %s125_s2 = inlined_call_operand.vmem [shape: f32[1,32], index: 2, kind: input, shape index: {}]   ;;  %s126_s0 = inlined_call_operand.vmem [shape: bf16[8,32], index: 0, kind: input, shape index: {}]   ;;  %s127_s3 = inlined_call_operand.vmem [shape: bf16[8,32], index: 3, kind: output, shape index: {}]  }
   0x1   :  { %v85_v0 = vld [vmem:[%s124_s1 + $0x8] sm:$0xff]  ;;  %20 = vst.msk [vmem:[#allocation2] sm:$0xff] %vm19_vm0, %v88_v1  ;;  %v84_v2 = vld [vmem:[%s124_s1] sm:$0xff] }
   0x2   :  { %49 = vmatpush.bf16.msra.mxu0 %v85_v0  ;;  %v21_v3 = vld [vmem:[%s126_s0] sm:$0xf] }
   0x3   :  { %v87_v7 = vld [vmem:[%s125_s2] ss:$0 sm:$0xff] }
   0x6   :  { %50 = vmatpush.bf16.msra.mxu0 %v84_v2 }
   0x8   :  { %v22_v4 = vld [vmem:[#allocation2] sm:$0xff] }
   0x9   :  { %83 = vmatmul.msk.bf16.vlgmr.msra.gmra.mxu0 %vm19_vm0, %v21_v3 }
  0x86   :  { %v52_v5 = vpop.f32.mrf.mxu0 }
  0x87   :  { %v56_v6 = vadd.f32 %v52_v5, %v22_v4 }
  0x89   :  { %57 = vst.msk [vmem:[#allocation2] sm:$0xff] %vm19_vm0, %v56_v6 }
  0x8e   :  { %v54_v8 = vpop.f32.mrf.mxu0 }
  0x90   :  { %v61_v9 = vld [vmem:[#allocation2] sm:$0xff] }
  0x91   :  { %v66_v10 = vadd.f32 %v87_v7, %v61_v9 }
  0x93   :  { %v67_v11 = vmax.f32 %v66_v10, 0.0 }
  0x95   :  { %v68_v12 = vpack.c.bf16 %v67_v11, %v67_v11 }
  0x97   :  { %70 = vst.msk [vmem:[%s127_s3] sm:$0xf] %vm69_vm1, %v68_v12 }

// kernel: pacl_clip_forward.43
= control target key start
LH: loop header
LB: loop body
LE: loop exit
PB: predicated region body
PF: predicated region fallthrough
CT: control target
= control target key end

     0   :  { %vm19_vm0 = vcmask 261120   ;;  %v87_v1 = vmov 0.0   ;;  %vm68_vm1 = vcmask 257024   ;;  %s123_s1 = inlined_call_operand.vmem [shape: bf16[32,32], index: 1, kind: input, shape index: {}]   ;;  %s124_s2 = inlined_call_operand.vmem [shape: f32[1,32], index: 2, kind: input, shape index: {}]   ;;  %s125_s0 = inlined_call_operand.vmem [shape: bf16[8,32], index: 0, kind: input, shape index: {}]   ;;  %s126_s3 = inlined_call_operand.vmem [shape: bf16[8,32], index: 3, kind: output, shape index: {}]  }
   0x1   :  { %v84_v0 = vld [vmem:[%s123_s1 + $0x8] sm:$0xff]  ;;  %20 = vst.msk [vmem:[#allocation2] sm:$0xff] %vm19_vm0, %v87_v1  ;;  %v83_v2 = vld [vmem:[%s123_s1] sm:$0xff] }
   0x2   :  { %49 = vmatpush.bf16.msra.mxu0 %v84_v0  ;;  %v21_v3 = vld [vmem:[%s125_s0] sm:$0xf] }
   0x3   :  { %v86_v7 = vld [vmem:[%s124_s2] ss:$0 sm:$0xff] }
   0x6   :  { %50 = vmatpush.bf16.msra.mxu0 %v83_v2 }
   0x8   :  { %v22_v4 = vld [vmem:[#allocation2] sm:$0xff] }
   0x9   :  { %82 = vmatmul.msk.bf16.vlgmr.msra.gmra.mxu0 %vm19_vm0, %v21_v3 }
  0x86   :  { %v52_v5 = vpop.f32.mrf.mxu0 }
  0x87   :  { %v56_v6 = vadd.f32 %v52_v5, %v22_v4 }
  0x89   :  { %57 = vst.msk [vmem:[#allocation2] sm:$0xff] %vm19_vm0, %v56_v6 }
  0x8e   :  { %v54_v8 = vpop.f32.mrf.mxu0 }
  0x90   :  { %v61_v9 = vld [vmem:[#allocation2] sm:$0xff] }
  0x91   :  { %v66_v10 = vadd.f32 %v86_v7, %v61_v9 }
  0x93   :  { %v67_v11 = vpack.c.bf16 %v66_v10, %v66_v10 }
  0x95   :  { %69 = vst.msk [vmem:[%s126_s3] sm:$0xf] %vm68_vm1, %v67_v11 }

// kernel: pacl_clip_forward.44
= control target key start
LH: loop header
LB: loop body
LE: loop exit
PB: predicated region body
PF: predicated region fallthrough
CT: control target
= control target key end

     0   :  { %vm22_vm0 = vcmask 261120   ;;  %v91_v1 = vmov 0.0   ;;  %s139_s1 = inlined_call_operand.vmem [shape: bf16[32,32], index: 1, kind: input, shape index: {}]   ;;  %s140_s2 = inlined_call_operand.vmem [shape: f32[1,32], index: 2, kind: input, shape index: {}]   ;;  %s141_s0 = inlined_call_operand.vmem [shape: bf16[8,32], index: 0, kind: input, shape index: {}]   ;;  %s142_s3 = inlined_call_operand.vmem [shape: bf16[8,32], index: 3, kind: input, shape index: {}]   ;;  %s143_s4 = inlined_call_operand.vmem [shape: f32[8,32], index: 4, kind: output, shape index: {}]  }
   0x1   :  { %v88_v0 = vld [vmem:[%s139_s1 + $0x8] sm:$0xff]  ;;  %23 = vst.msk [vmem:[#allocation2] sm:$0xff] %vm22_vm0, %v91_v1  ;;  %v87_v2 = vld [vmem:[%s139_s1] sm:$0xff] }
   0x2   :  { %52 = vmatpush.bf16.msra.mxu0 %v88_v0  ;;  %v24_v3 = vld [vmem:[%s141_s0] sm:$0xf] }
   0x3   :  { %v70_v7 = vld [vmem:[%s142_s3] sm:$0xf] }
   0x4   :  { %v90_v8 = vld [vmem:[%s140_s2] ss:$0 sm:$0xff]  ;;  %v71_v10 = vunpack.c.l.bf16 %v70_v7 }
   0x6   :  { %53 = vmatpush.bf16.msra.mxu0 %v87_v2 }
   0x8   :  { %v25_v4 = vld [vmem:[#allocation2] sm:$0xff] }
   0x9   :  { %86 = vmatmul.msk.bf16.vlgmr.msra.gmra.mxu0 %vm22_vm0, %v24_v3 }
  0x86   :  { %v55_v5 = vpop.f32.mrf.mxu0 }
  0x87   :  { %v59_v6 = vadd.f32 %v55_v5, %v25_v4 }
  0x89   :  { %60 = vst.msk [vmem:[#allocation2] sm:$0xff] %vm22_vm0, %v59_v6 }
  0x8e   :  { %v57_v9 = vpop.f32.mrf.mxu0 }
  0x90   :  { %v64_v11 = vld [vmem:[#allocation2] sm:$0xff] }
  0x91   :  { %v69_v12 = vadd.f32 %v90_v8, %v64_v11 }
  0x93   :  { %v72_v13 = vadd.f32 %v71_v10, %v69_v12 }
  0x95   :  { %73 = vst.msk [vmem:[%s143_s4] sm:$0xff] %vm22_vm0, %v72_v13 }

// kernel: pacl_clip_forward.45
= control target key start
LH: loop header
LB: loop body
LE: loop exit
PB: predicated region body
PF: predicated region fallthrough
CT: control target
= control target key end

     0   :  { %vm32_vm0 = vcmask 261120   ;;  %v183_v5 = vmov 32.0   ;;  %vm25_vm2 = vcmask 785408   ;;  %v184_v28 = vmov 0.0   ;;  %s248_s0 = inlined_call_operand.vmem [shape: bf16[16,32], index: 0, kind: input, shape index: {}]   ;;  %s249_s2 = inlined_call_operand.vmem [shape: f32[1,32], index: 2, kind: input, shape index: {}]   ;;  %s250_s3 = inlined_call_operand.vmem [shape: f32[1,32], index: 3, kind: input, shape index: {}]   ;;  %s251_s4 = inlined_call_operand.vmem [shape: f32[1,96], index: 4, kind: input, shape index: {}]   ;;  %s252_s1 = inlined_call_operand.vmem [shape: bf16[32,96], index: 1, kind: input, shape index: {}]   ;;  %s253_s5 = inlined_call_operand.vmem [shape: bf16[16,96], index: 5, kind: output, shape index: {}]  }
   0x1   :  { %v169_v0 = vld [vmem:[%s248_s0] sm:$0xff]   ;;  %177 = vrcp.f32 %v183_v5  ;;  %v167_v22 = vld [vmem:[%s252_s1 + $0x8] sm:$0xff]  ;;  %26 = vst.msk [vmem:[#allocation2] sm:$0xff] %vm25_vm2, %v184_v28  ;;  %vm150_vm9 = vcmask 781312  }
   0x2   :  { %v170_v1 = vunpack.c.l.bf16 %v169_v0  ;;  %v171_v3 = vunpack.c.h.bf16 %v169_v0  ;;  %124 = vmatpush.bf16.msra.mxu0 %v167_v22  ;;  %v166_v24 = vld [vmem:[%s252_s1] sm:$0xff]  ;;  %27 = vst.msk [vmem:[#allocation2 + $0x8] sm:$0xff] %vm25_vm2, %v184_v28 }
   0x3   :  { %v174_v44 = vld [vmem:[%s249_s2] ss:$0 sm:$0xff] }
   0x4   :  { %v33_v2 = vsel %vm32_vm0, %v170_v1, 0.0  ;;  %v36_v4 = vsel %vm32_vm0, %v171_v3, 0.0  ;;  %v175_v49 = vld [vmem:[%s250_s3] ss:$0 sm:$0xff] }
   0x5   :  { %34 = vadd.xlane.f32.xlu0 %v33_v2  ;;  %v176_v58 = vld [vmem:[%s251_s4] ss:$0 sm:$0xff] }
   0x6   :  { %125 = vmatpush.bf16.msra.mxu0 %v166_v24 }
   0x7   :  { %v178_v6 = vpop.eup %177 }
   0x8   :  { %v40_v7 = vmul.f32 32.0, %v178_v6  ;;  %vm44_vm1 = vweird.f32 %v178_v6  ;;  %v97_v54 = vld [vmem:[#allocation2] sm:$0xff] }
   0x9   :  { %v98_v57 = vld [vmem:[#allocation2 + $0x8] sm:$0xff] }
   0xa   :  { %v41_v8 = vsub.f32 1.0, %v40_v7 }
   0xc   :  { %v42_v9 = vmul.f32 %v178_v6, %v41_v8 }
   0xd   :  { %37 = vadd.xlane.f32.xlu0 %v36_v4 }
   0xe   :  { %v43_v10 = vadd.f32 %v178_v6, %v42_v9 }
  0x10   :  { %v45_v11 = vsel %vm44_vm1, %v178_v6, %v43_v10 }
  0x78   :  { %v35_v12 = vpop.xlane.xlu0 %34 }
  0x79   :  { %v46_v13 = vmul.f32 %v45_v11, %v35_v12 }
  0x7b   :  { %v48_v14 = vsub.f32 %v170_v1, %v46_v13 }
  0x7d   :  { %v50_v15 = vmul.f32 %v48_v14, %v48_v14 }
  0x7f   :  { %v52_v16 = vsel %vm32_vm0, %v50_v15, 0.0 }
  0x80   :  { %53 = vadd.xlane.f32.xlu1 %v52_v16  ;;  %v38_v17 = vpop.xlane.xlu0 %37 }
  0x81   :  { %v47_v18 = vmul.f32 %v45_v11, %v38_v17 }
  0x83   :  { %v49_v19 = vsub.f32 %v171_v3, %v47_v18 }
  0x85   :  { %v51_v20 = vmul.f32 %v49_v19, %v49_v19 }
  0x87   :  { %v55_v21 = vsel %vm32_vm0, %v51_v20, 0.0 }
  0x88   :  { %56 = vadd.xlane.f32.xlu1 %v55_v21 }
  0xf3   :  { %v54_v23 = vpop.xlane.xlu1 %53 }
  0xf4   :  { %v58_v25 = vmul.f32 %v54_v23, %v45_v11 }
  0xf6   :  { %v60_v26 = vadd.f32 1e-05, %v58_v25 }
  0xf8   :  { %179 = vrsqrt.f32 %v60_v26  ;;  %vm68_vm4 = vweird.f32 %v60_v26 }
  0xfb   :  { %v57_v27 = vpop.xlane.xlu1 %56 }
  0xfc   :  { %v59_v29 = vmul.f32 %v57_v27, %v45_v11 }
  0xfe   :  { %v180_v30 = vpop.eup %179  ;;  %v61_v31 = vadd.f32 1e-05, %v59_v29 }
  0xff   :  { %v63_v32 = vmul.f32 %v180_v30, %v60_v26  ;;  %vm69_vm3 = vweird.f32 %v180_v30 }
 0x100   :  { %181 = vrsqrt.f32 %v61_v31  ;;  %vm70_vm5 = vmor %vm68_vm4, %vm69_vm3  ;;  %vm78_vm7 = vweird.f32 %v61_v31 }
 0x101   :  { %v64_v33 = vmul.f32 %v180_v30, %v63_v32 }
 0x103   :  { %v65_v34 = vmul.f32 0.5, %v64_v33 }
 0x105   :  { %v66_v35 = vsub.f32 1.5, %v65_v34 }
 0x106   :  { %v182_v36 = vpop.eup %181 }
 0x107   :  { %v67_v37 = vmul.f32 %v180_v30, %v66_v35  ;;  %v73_v38 = vmul.f32 %v182_v36, %v61_v31  ;;  %vm79_vm6 = vweird.f32 %v182_v36 }
 0x108   :  { %vm80_vm8 = vmor %vm78_vm7, %vm79_vm6 }
 0x109   :  { %v74_v39 = vmul.f32 %v182_v36, %v73_v38  ;;  %v71_v40 = vsel %vm70_vm5, %v180_v30, %v67_v37 }
 0x10a   :  { %v82_v43 = vmul.f32 %v71_v40, %v48_v14 }
 0x10b   :  { %v75_v41 = vmul.f32 0.5, %v74_v39 }
 0x10c   :  { %v88_v48 = vmul.f32 %v174_v44, %v82_v43 }
 0x10d   :  { %v76_v42 = vsub.f32 1.5, %v75_v41 }
 0x10e   :  { %v94_v51 = vadd.f32 %v175_v49, %v88_v48 }
 0x10f   :  { %v77_v45 = vmul.f32 %v182_v36, %v76_v42 }
 0x111   :  { %v81_v46 = vsel %vm80_vm8, %v182_v36, %v77_v45 }
 0x112   :  { %v83_v47 = vmul.f32 %v81_v46, %v49_v19 }
 0x114   :  { %v89_v50 = vmul.f32 %v174_v44, %v83_v47 }
 0x116   :  { %v95_v52 = vadd.f32 %v175_v49, %v89_v50 }
 0x118   :  { %v96_v53 = vpack.c.bf16 %v95_v52, %v94_v51 }
 0x11a   :  { %165 = vmatmul.msk.bf16.vlgmr.msra.gmra.mxu0 %vm32_vm0, %v96_v53 }
 0x197   :  { %v127_v55 = vpop.f32.mrf.mxu0 }
 0x198   :  { %v132_v56 = vadd.f32 %v127_v55, %v97_v54 }
 0x19a   :  { %135 = vst.msk [vmem:[#allocation2] sm:$0xff] %vm25_vm2, %v132_v56 }
 0x19f   :  { %v129_v59 = vpop.f32.mrf.mxu0 }
 0x1a0   :  { %v133_v60 = vadd.f32 %v129_v59, %v98_v57 }
 0x1a1   :  { %v140_v61 = vld [vmem:[#allocation2] sm:$0xff] }
 0x1a2   :  { %v146_v62 = vadd.f32 %v176_v58, %v140_v61  ;;  %136 = vst.msk [vmem:[#allocation2 + $0x8] sm:$0xff] %vm25_vm2, %v133_v60 }
 0x1a4   :  { %v148_v63 = vpack.c.bf16 %v146_v62, %v146_v62 }
 0x1a6   :  { %151 = vst.msk [vmem:[%s253_s5] sm:$0xf] %vm150_vm9, %v148_v63 }
 0x1a9   :  { %v141_v0 = vld [vmem:[#allocation2 + $0x8] sm:$0xff] }
 0x1aa   :  { %v147_v1 = vadd.f32 %v176_v58, %v141_v0 }
 0x1ac   :  { %v149_v2 = vpack.c.bf16 %v147_v1, %v147_v1 }
 0x1ae   :  { %152 = vst.msk [vmem:[%s253_s5 + $0x4] sm:$0xf] %vm150_vm9, %v149_v2 }

// kernel: pacl_clip_forward.47
= control target key start
LH: loop header
LB: loop body
LE: loop exit
PB: predicated region body
PF: predicated region fallthrough
CT: control target
= control target key end

     0   :  { %s629_s15 = smov 0   ;;  %s631_s16 = smov 0   ;;  %s680_s0 = inlined_call_operand.vmem [shape: bf16[2,16,16], index: 0, kind: input, shape index: {}]   ;;  %s681_s1 = inlined_call_operand.vmem [shape: bf16[2,16,32], index: 1, kind: input, shape index: {}]   ;;  %s682_s2 = inlined_call_operand.vmem [shape: f32[1,32], index: 2, kind: input, shape index: {}]   ;;  %s683_s3 = inlined_call_operand.vmem [shape: bf16[16,32], index: 3, kind: input, shape index: {}]   ;;  %s684_s4 = inlined_call_operand.vmem [shape: bf16[16,32], index: 4, kind: output, shape index: {}]  }
   0x1   :  { %s633_s17 = smov 0  }
   0x2 LB: > { %s26_s18 = sadd.s32 1, %s597_s16  ;;  %p525_p0 = scmp.ge.s32.totalorder %s601_s17, 1  ;;  %s601_s17 = sphi %s633_s17, %s14_s17   ;;  %s597_s16 = sphi %s631_s16, %s686_s16   ;;  %s593_s15 = sphi %s629_s15, %s685_s15  }
   0x3   : > { %p27_p1 = scmp.ge.s32.totalorder %s26_s18, 2  ;;  %p229_p2 = scmp.lt.s32.totalorder %s601_s17, 3 }
   0x5   : > { %s688_s18 = smov (%p27_p1, %s26_s18), 0  ;;  %p230_p3 = pnand %p525_p0, %p229_p2 }
   0x6   : > { %p282_p4 = scmp.lt.s32.totalorder (!%p230_p3), %s593_s15, 1  ;;  %p530_p5 = scmp.ne.s32.totalorder (!%p230_p3), %s593_s15, 0 }
   0x7   : > { %233 = sbr.rel (%p230_p3) target bundleno = 176 (0xb0), region = 36 }
   0xc   : > { %s283_s19 = scalar_select %p282_p4, %s593_s15, 1 }
   0xd   : > { %324 = sbr.rel (%p530_p5) target bundleno = 21 (0x15), region = 40 }
   0xe   : > { %s545_s20 = sshll.u32 %s283_s19, 3 }
   0xf   : > { %s289_s23 = scalar_lea.vmem %s680_s0, %s545_s20  ;;  %s298_s26 = scalar_lea.vmem %s681_s1, %s545_s20 }
  0x12   : > { %vm325_vm0 = vcmask 261120   ;;  %v603_v0 = vmov 0.0  }
  0x13   : > { %326 = vst.msk [vmem:[#allocation2] sm:$0xff] %vm325_vm0, %v603_v0 }
  0x14   : > { %327 = vst.msk [vmem:[#allocation2 + $0x8] sm:$0xff] %vm325_vm0, %v603_v0 }
  0x15 PF: > { %v548_v1 = vld [vmem:[%s298_s26] sm:$0xff]  ;;  %vm345_vm1 = vcmask 130048   ;;  %vm365_vm2 = vcmask 261120   ;;  %p540_p6 = scmp.ne.s32.totalorder %s593_s15, 1 }
  0x16   : > { %v547_v2 = vld [vmem:[%s289_s23] sm:$0xff]  ;;  %356 = vmatpush.bf16.msra.mxu0 %v548_v1 }
  0x19   : > { %539 = vmatmul.msk.bf16.vlgmr.msra.gmra.mxu0 %vm345_vm1, %v547_v2 }
  0x1a   : > { %v330_v3 = vld [vmem:[#allocation2] sm:$0xff] }
  0x1b   : > { %v331_v6 = vld [vmem:[#allocation2 + $0x8] sm:$0xff] }
  0x96   : > { %v358_v4 = vpop.f32.mrf.mxu0 }
  0x97   : > { %v363_v5 = vadd.f32 %v358_v4, %v330_v3 }
  0x99   : > { %366 = vst.msk [vmem:[#allocation2] sm:$0xff] %vm365_vm2, %v363_v5 }
  0x9d   : > { %371 = sbr.rel (%p540_p6) target bundleno = 176 (0xb0), region = 44 }
  0x9e   : > { %v360_v7 = vpop.f32.mrf.mxu0 }
  0x9f   : > { %v364_v8 = vadd.f32 %v360_v7, %v331_v6 }
  0xa1   : > { %367 = vst.msk [vmem:[#allocation2 + $0x8] sm:$0xff] %vm365_vm2, %v364_v8 }
  0xa2   : > { %v372_v9 = vld [vmem:[#allocation2] sm:$0xff]  ;;  %vm388_vm3 = vcmask 257024  }
  0xa3   : > { %v578_v10 = vld [vmem:[%s682_s2] ss:$0 sm:$0xff] }
  0xa4   : > { %v550_v11 = vld [vmem:[%s683_s3] sm:$0xff]   ;;  %v378_v13 = vadd.f32 %v578_v10, %v372_v9 }
  0xa5   : > { %v551_v14 = vunpack.c.l.bf16 %v550_v11  ;;  %v552_v16 = vunpack.c.h.bf16 %v550_v11 }
  0xa7   : > { %v384_v17 = vadd.f32 %v551_v14, %v378_v13 }
  0xa8   : > { %v373_v12 = vld [vmem:[#allocation2 + $0x8] sm:$0xff] }
  0xa9   : > { %v379_v15 = vadd.f32 %v578_v10, %v373_v12  ;;  %v386_v19 = vpack.c.bf16 %v384_v17, %v384_v17 }
  0xab   : > { %v385_v18 = vadd.f32 %v552_v16, %v379_v15  ;;  %389 = vst.msk [vmem:[%s684_s4] sm:$0xf] %vm388_vm3, %v386_v19 }
  0xad   : > { %v387_v20 = vpack.c.bf16 %v385_v18, %v385_v18 }
  0xaf   : > { %390 = vst.msk [vmem:[%s684_s4 + $0x4] sm:$0xf] %vm388_vm3, %v387_v20 }
  0xb0 PF: > { %s14_s17 = sadd.s32 1, %s601_s17   ;;  %s685_s15 = smov %s597_s16 }
  0xb1   : > { %p11_p7 = scmp.ge.s32.totalorder %s14_s17, 4   ;;  %s686_s16 = smov %s688_s18 }
  0xb3   :  { %13 = sbr.rel (!%p11_p7) target bundleno = 2 (0x2), region = 83 }

// kernel: pacl_clip_forward.46
= control target key start
LH: loop header
LB: loop body
LE: loop exit
PB: predicated region body
PF: predicated region fallthrough
CT: control target
= control target key end

     0   :  { %s582_s12 = smov 0   ;;  %s584_s13 = smov 0   ;;  %s638_s0 = inlined_call_operand.vmem [shape: bf16[4,8,16], index: 0, kind: input, shape index: {}]   ;;  %s639_s1 = inlined_call_operand.vmem [shape: bf16[4,8,16], index: 1, kind: input, shape index: {}]   ;;  %s640_s2 = inlined_call_operand.vmem [shape: bf16[4,8,16], index: 2, kind: input, shape index: {}]   ;;  %s641_s3 = inlined_call_operand.vmem [shape: bf16[4,8,16], index: 3, kind: output, shape index: {}]  }
   0x1   :  { %s586_s14 = smov 0  }
   0x2 LB: > { %s32_s15 = sadd.s32 1, %s553_s13  ;;  %p490_p0 = scmp.ge.s32.totalorder %s557_s14, 1  ;;  %s557_s14 = sphi %s586_s14, %s13_s14   ;;  %s553_s13 = sphi %s584_s13, %s643_s13   ;;  %s549_s12 = sphi %s582_s12, %s642_s12  }
   0x3   : > { %p34_p1 = scmp.ge.s32.totalorder %s32_s15, 4  ;;  %p190_p2 = scmp.lt.s32.totalorder %s557_s14, 5 }
   0x5   : > { %s645_s15 = smov (%p34_p1, %s32_s15), 0  ;;  %p191_p3 = pnand %p490_p0, %p190_p2 }
   0x6   : > { %p232_p4 = scmp.lt.s32.totalorder (!%p191_p3), %s549_s12, 3 }
   0x7   : > { %194 = sbr.rel (%p191_p3) target bundleno = 626 (0x272), region = 32 }
   0xc   : > { %vm265_vm0 = vcmask 7168   ;;  %v559_v0 = vmov 0.0   ;;  %vm268_vm1 = vcmask 130048   ;;  %s647_s12 = smov (!%p232_p4, %s549_s12), 3  ;;  %v560_v7 = vmov -inf  }
   0xd   : > { %267 = vst.msk [vmem:[#allocation3] sm:$0xff] %vm265_vm0, %v559_v0  ;;  %s602_s16 = sshll.u32 %s647_s12, 2  ;;  %v296_v8 = vlaneseq  ;;  %vm308_vm3 = vcmask 64512   ;;  %v561_v15 = vmov 0   ;;  %vm344_vm4 = vcmask 1043456  }
   0xe   : > { %269 = vst.msk [vmem:[#allocation4] sm:$0xff] %vm268_vm1, %v559_v0  ;;  %s245_s19 = scalar_lea.vmem %s639_s1, %s602_s16  ;;  %s238_s22 = scalar_lea.vmem %s638_s0, %s602_s16  ;;  %526 = vset.pattern.permute.xlu0 %v561_v15  ;;  %527 = vset.pattern.permute.xlu1 %v561_v15  ;;  %vm377_vm5 = vcmask 125952  }
   0xf   : > { %v274_v1 = vld [vmem:[%s245_s19] sm:$0xf]  ;;  %266 = vst.msk [vmem:[#allocation2] sm:$0xff] %vm265_vm0, %v560_v7  ;;  %v297_v9 = vshrl.u32 %v296_v8, 7  ;;  %v302_v10 = vand.u32 127, %v296_v8  ;;  %528 = vset.pattern.permute.xlu2 %v561_v15  ;;  %s252_s25 = scalar_lea.vmem %s640_s2, %s602_s16  ;;  %s259_s28 = scalar_lea.vmem %s641_s3, %s602_s16 }
  0x10   : > { %v270_v2 = vld [vmem:[%s238_s22] sm:$0xf]  ;;  %v280_v3 = vsel %vm268_vm1, %v274_v1, 0 }
  0x11   : > { %v271_v4 = vunpack.c.l.bf16 %v270_v2  ;;  %289 = vmatpush.bf16.xpose.msra.mxu0 %v280_v3  ;;  %vm305_vm2 = vcmp.le.s32.totalorder %v302_v10, %v297_v9  ;;  %v340_v20 = vld [vmem:[%s252_s25] sm:$0xf] }
  0x12   : > { %v346_v21 = vsel %vm344_vm4, %v340_v20, 0 }
  0x13   : > { %v272_v5 = vmul.f32 0.25, %v271_v4  ;;  %355 = vmatpush.bf16.msra.mxu1 %v346_v21 }
  0x14   : > { %v324_v30 = vld [vmem:[#allocation3] sm:$0xff] }
  0x15   : > { %v273_v6 = vpack.c.bf16 %v272_v5, %v272_v5  ;;  %v332_v38 = vld [vmem:[#allocation4] sm:$0xff] }
  0x16   : > { %v307_v16 = vld [vmem:[#allocation2] sm:$0xff] }
  0x18   : > { %495 = vmatmul.msk.bf16.vlgmr.msra.gmra.mxu0 %vm268_vm1, %v273_v6 }
  0x95   : > { %v291_v11 = vpop.f32.mrf.mxu0 }
  0x96   : > { %v306_v12 = vsel %vm305_vm2, %v291_v11, -1e+30 }
  0x97   : > { %v309_v13 = vsel %vm308_vm3, %v306_v12, -inf }
  0x98   : > { %310 = vmax.xlane.f32.xlu0 %v309_v13 }
  0x9d   : > { %v293_v14 = vpop.f32.mrf.mxu0 }
 0x10b   : > { %v311_v17 = vpop.xlane.xlu0 %310 }
 0x10c   : > { %v312_v18 = vmax.f32 %v307_v16, %v311_v17 }
 0x10e   : > { %v313_v19 = vsub.f32 %v307_v16, %v312_v18  ;;  %363 = vst.msk [vmem:[#allocation2] sm:$0xff] %vm265_vm0, %v312_v18  ;;  %318 = vperm.xlu0 %526, %v312_v18  }
 0x110   : > { %v314_v28 = vmul.f32 1.442695, %v313_v19 }
 0x180   : > { %v319_v22 = vpop.permute.xlu0 %318 }
 0x181   : > { %v321_v23 = vsub.f32 %v306_v12, %v319_v22 }
 0x183   : > { %v322_v24 = vmul.f32 1.442695, %v321_v23 }
 0x185   : > { %529 = vpow2.f32 %v322_v24 }
 0x186   : > { %531 = vpow2.f32 %v314_v28 }
 0x18b   : > { %v530_v25 = vpop.eup %529 }
 0x18c   : > { %v326_v26 = vsel %vm308_vm3, %v530_v25, 0.0  ;;  %v339_v27 = vpack.c.bf16 %v530_v25, %v530_v25  ;;  %v532_v29 = vpop.eup %531 }
 0x18d   : > { %327 = vadd.xlane.f32.xlu1 %v326_v26  ;;  %v325_v31 = vmul.f32 %v532_v29, %v324_v30 }
 0x18e   : > { %496 = vmatmul.msk.bf16.vlgmr.msra.gmra.mxu1 %vm308_vm3, %v339_v27 }
 0x1a6   : > { %335 = vperm.xlu1 %527, %v532_v29  }
 0x200   : > { %v328_v32 = vpop.xlane.xlu1 %327 }
 0x201   : > { %v329_v33 = vadd.f32 %v328_v32, %v325_v31 }
 0x203   : > { %331 = vst.msk [vmem:[#allocation3] sm:$0xff] %vm265_vm0, %v329_v33 }
 0x20a   : > { %v368_v34 = vld [vmem:[#allocation3] sm:$0xff] }
 0x20b   : > { %v357_v35 = vpop.f32.mrf.mxu1  ;;  %533 = vrcp.f32 %v368_v34 }
 0x211   : > { %v534_v36 = vpop.eup %533 }
 0x212   : > { %372 = vperm.xlu2 %528, %v534_v36  }
 0x213   : > { %v359_v37 = vpop.f32.mrf.mxu1 }
 0x218   : > { %v336_v39 = vpop.permute.xlu1 %335 }
 0x219   : > { %v338_v40 = vmul.f32 %v336_v39, %v332_v38 }
 0x21b   : > { %v361_v41 = vadd.f32 %v357_v35, %v338_v40 }
 0x21d   : > { %362 = vst.msk [vmem:[#allocation4] sm:$0xff] %vm268_vm1, %v361_v41 }
 0x224   : > { %v367_v42 = vld [vmem:[#allocation4] sm:$0xff] }
 0x26c   : > { %v373_v43 = vpop.permute.xlu2 %372 }
 0x26d   : > { %v375_v44 = vmul.f32 %v373_v43, %v367_v42 }
 0x26f   : > { %v376_v45 = vpack.c.bf16 %v375_v44, %v375_v44 }
 0x271   : > { %378 = vst.msk [vmem:[%s259_s28] sm:$0xf] %vm377_vm5, %v376_v45 }
 0x272 PF: > { %s13_s14 = sadd.s32 1, %s557_s14   ;;  %s642_s12 = smov %s553_s13 }
 0x273   : > { %p10_p5 = scmp.ge.s32.totalorder %s13_s14, 6   ;;  %s643_s13 = smov %s645_s15 }
 0x275   :  { %12 = sbr.rel (!%p10_p5) target bundleno = 2 (0x2), region = 76 }

// kernel: pacl_clip_forward.48
= control target key start
LH: loop header
LB: loop body
LE: loop exit
PB: predicated region body
PF: predicated region fallthrough
CT: control target
= control target key end

     0   :  { %vm31_vm0 = vcmask 261120   ;;  %v236_v5 = vmov 32.0   ;;  %s293_s0 = inlined_call_operand.vmem [shape: bf16[16,32], index: 0, kind: input, shape index: {}]   ;;  %s294_s2 = inlined_call_operand.vmem [shape: f32[1,32], index: 2, kind: input, shape index: {}]   ;;  %s295_s3 = inlined_call_operand.vmem [shape: f32[1,32], index: 3, kind: input, shape index: {}]   ;;  %s296_s4 = inlined_call_operand.vmem [shape: f32[1,128], index: 4, kind: input, shape index: {}]   ;;  %s297_s1 = inlined_call_operand.vmem [shape: bf16[32,128], index: 1, kind: input, shape index: {}]   ;;  %s298_s5 = inlined_call_operand.vmem [shape: bf16[16,128], index: 5, kind: output, shape index: {}]  }
   0x1   :  { %v210_v0 = vld [vmem:[%s293_s0] sm:$0xff]   ;;  %222 = vrcp.f32 %v236_v5  ;;  %v208_v22 = vld [vmem:[%s297_s1 + $0x8] sm:$0xff] }
   0x2   :  { %v211_v1 = vunpack.c.l.bf16 %v210_v0  ;;  %v212_v3 = vunpack.c.h.bf16 %v210_v0  ;;  %123 = vmatpush.bf16.msra.mxu0 %v208_v22  ;;  %v207_v24 = vld [vmem:[%s297_s1] sm:$0xff] }
   0x3   :  { %v219_v43 = vld [vmem:[%s294_s2] ss:$0 sm:$0xff] }
   0x4   :  { %v32_v2 = vsel %vm31_vm0, %v211_v1, 0.0  ;;  %v35_v4 = vsel %vm31_vm0, %v212_v3, 0.0  ;;  %v220_v48 = vld [vmem:[%s295_s3] ss:$0 sm:$0xff] }
   0x5   :  { %33 = vadd.xlane.f32.xlu0 %v32_v2  ;;  %v221_v53 = vld [vmem:[%s296_s4] ss:$0 sm:$0xff] }
   0x6   :  { %124 = vmatpush.bf16.msra.mxu0 %v207_v24 }
   0x7   :  { %v223_v6 = vpop.eup %222 }
   0x8   :  { %v39_v7 = vmul.f32 32.0, %v223_v6  ;;  %vm43_vm1 = vweird.f32 %v223_v6 }
   0xa   :  { %v40_v8 = vsub.f32 1.0, %v39_v7 }
   0xc   :  { %v41_v9 = vmul.f32 %v223_v6, %v40_v8 }
   0xd   :  { %36 = vadd.xlane.f32.xlu0 %v35_v4 }
   0xe   :  { %v42_v10 = vadd.f32 %v223_v6, %v41_v9 }
  0x10   :  { %v44_v11 = vsel %vm43_vm1, %v223_v6, %v42_v10 }
  0x78   :  { %v34_v12 = vpop.xlane.xlu0 %33 }
  0x79   :  { %v45_v13 = vmul.f32 %v44_v11, %v34_v12 }
  0x7b   :  { %v47_v14 = vsub.f32 %v211_v1, %v45_v13 }
  0x7d   :  { %v49_v15 = vmul.f32 %v47_v14, %v47_v14 }
  0x7f   :  { %v51_v16 = vsel %vm31_vm0, %v49_v15, 0.0 }
  0x80   :  { %52 = vadd.xlane.f32.xlu1 %v51_v16  ;;  %v37_v17 = vpop.xlane.xlu0 %36 }
  0x81   :  { %v46_v18 = vmul.f32 %v44_v11, %v37_v17 }
  0x83   :  { %v48_v19 = vsub.f32 %v212_v3, %v46_v18 }
  0x85   :  { %v50_v20 = vmul.f32 %v48_v19, %v48_v19 }
  0x87   :  { %v54_v21 = vsel %vm31_vm0, %v50_v20, 0.0 }
  0x88   :  { %55 = vadd.xlane.f32.xlu1 %v54_v21 }
  0xf3   :  { %v53_v23 = vpop.xlane.xlu1 %52 }
  0xf4   :  { %v57_v25 = vmul.f32 %v53_v23, %v44_v11 }
  0xf6   :  { %v59_v26 = vadd.f32 1e-05, %v57_v25 }
  0xf8   :  { %224 = vrsqrt.f32 %v59_v26  ;;  %vm67_vm3 = vweird.f32 %v59_v26 }
  0xfb   :  { %v56_v27 = vpop.xlane.xlu1 %55 }
  0xfc   :  { %v58_v28 = vmul.f32 %v56_v27, %v44_v11 }
  0xfe   :  { %v225_v29 = vpop.eup %224  ;;  %v60_v30 = vadd.f32 1e-05, %v58_v28 }
  0xff   :  { %v62_v31 = vmul.f32 %v225_v29, %v59_v26  ;;  %vm68_vm2 = vweird.f32 %v225_v29 }
 0x100   :  { %226 = vrsqrt.f32 %v60_v30  ;;  %vm69_vm4 = vmor %vm67_vm3, %vm68_vm2  ;;  %vm77_vm6 = vweird.f32 %v60_v30 }
 0x101   :  { %v63_v32 = vmul.f32 %v225_v29, %v62_v31 }
 0x103   :  { %v64_v33 = vmul.f32 0.5, %v63_v32 }
 0x105   :  { %v65_v34 = vsub.f32 1.5, %v64_v33 }
 0x106   :  { %v227_v35 = vpop.eup %226 }
 0x107   :  { %v66_v36 = vmul.f32 %v225_v29, %v65_v34  ;;  %v72_v37 = vmul.f32 %v227_v35, %v60_v30  ;;  %vm78_vm5 = vweird.f32 %v227_v35 }
 0x108   :  { %vm79_vm7 = vmor %vm77_vm6, %vm78_vm5 }
 0x109   :  { %v73_v38 = vmul.f32 %v227_v35, %v72_v37  ;;  %v70_v39 = vsel %vm69_vm4, %v225_v29, %v66_v36 }
 0x10a   :  { %v81_v42 = vmul.f32 %v70_v39, %v47_v14 }
 0x10b   :  { %v74_v40 = vmul.f32 0.5, %v73_v38 }
 0x10c   :  { %v87_v47 = vmul.f32 %v219_v43, %v81_v42 }
 0x10d   :  { %v75_v41 = vsub.f32 1.5, %v74_v40 }
 0x10e   :  { %v93_v50 = vadd.f32 %v220_v48, %v87_v47 }
 0x10f   :  { %v76_v44 = vmul.f32 %v227_v35, %v75_v41 }
 0x111   :  { %v80_v45 = vsel %vm79_vm7, %v227_v35, %v76_v44 }
 0x112   :  { %v82_v46 = vmul.f32 %v80_v45, %v48_v19 }
 0x114   :  { %v88_v49 = vmul.f32 %v219_v43, %v82_v46 }
 0x116   :  { %v94_v51 = vadd.f32 %v220_v48, %v88_v49 }
 0x118   :  { %v95_v52 = vpack.c.bf16 %v94_v51, %v93_v50 }
 0x11a   :  { %204 = vmatmul.msk.bf16.vlgmr.msra.gmra.mxu0 %vm31_vm0, %v95_v52 }
 0x197   :  { %v126_v54 = vpop.f32.mrf.mxu0 }
 0x198   :  { %v144_v55 = vadd.f32 %v221_v53, %v126_v54 }
 0x19a   :  { %v205_v56 = vmul.f32 -1.702, %v144_v55 }
 0x19c   :  { %v150_v57 = vmul.f32 1.442695, %v205_v56 }
 0x19e   :  { %228 = vpow2.f32 %v150_v57 }
 0x19f   :  { %v128_v58 = vpop.f32.mrf.mxu0 }
 0x1a0   :  { %v145_v59 = vadd.f32 %v221_v53, %v128_v58 }
 0x1a2   :  { %v206_v60 = vmul.f32 -1.702, %v145_v59 }
 0x1a4   :  { %v229_v61 = vpop.eup %228  ;;  %v152_v62 = vmul.f32 1.442695, %v206_v60 }
 0x1a5   :  { %v154_v63 = vadd.f32 1.0, %v229_v61 }
 0x1a6   :  { %230 = vpow2.f32 %v152_v62 }
 0x1a7   :  { %232 = vrcp.f32 %v154_v63  ;;  %v167_v9 = vand.u32 2147483648, %v154_v63  ;;  %vm161_vm9 = vweird.f32 %v154_v63  ;;  %v165_v10 = vand.u32 2147483647, %v154_v63 }
 0x1a9   :  { %v168_v16 = vor.u32 1.1754944e-38, %v167_v9  ;;  %vm166_vm12 = vcmp.eq.f32.partialorder %v165_v10, 8.507059e+37 }
 0x1ac   :  { %v231_v0 = vpop.eup %230 }
 0x1ad   :  { %v233_v1 = vpop.eup %232  ;;  %v155_v2 = vadd.f32 1.0, %v231_v0 }
 0x1ae   :  { %v157_v3 = vmul.f32 %v233_v1, %v154_v63  ;;  %vm162_vm8 = vweird.f32 %v233_v1 }
 0x1af   :  { %234 = vrcp.f32 %v155_v2  ;;  %vm163_vm10 = vmor %vm161_vm9, %vm162_vm8  ;;  %v182_v12 = vand.u32 2147483648, %v155_v2  ;;  %v180_v15 = vand.u32 2147483647, %v155_v2  ;;  %vm176_vm13 = vweird.f32 %v155_v2 }
 0x1b0   :  { %v158_v4 = vsub.f32 1.0, %v157_v3 }
 0x1b1   :  { %v183_v19 = vor.u32 1.1754944e-38, %v182_v12  ;;  %vm181_vm15 = vcmp.eq.f32.partialorder %v180_v15, 8.507059e+37 }
 0x1b2   :  { %v159_v5 = vmul.f32 %v233_v1, %v158_v4 }
 0x1b4   :  { %v160_v7 = vadd.f32 %v233_v1, %v159_v5 }
 0x1b5   :  { %v235_v6 = vpop.eup %234 }
 0x1b6   :  { %v172_v8 = vmul.f32 %v235_v6, %v155_v2  ;;  %v164_v13 = vsel %vm163_vm10, %v233_v1, %v160_v7  ;;  %vm177_vm11 = vweird.f32 %v235_v6 }
 0x1b7   :  { %v169_v18 = vsel %vm166_vm12, %v168_v16, %v164_v13  ;;  %vm178_vm14 = vmor %vm176_vm13, %vm177_vm11 }
 0x1b8   :  { %v173_v11 = vsub.f32 1.0, %v172_v8  ;;  %v186_v22 = vmul.f32 %v169_v18, %v144_v55 }
 0x1ba   :  { %v174_v14 = vmul.f32 %v235_v6, %v173_v11 }
 0x1bc   :  { %v175_v17 = vadd.f32 %v235_v6, %v174_v14 }
 0x1be   :  { %v179_v20 = vsel %vm178_vm14, %v235_v6, %v175_v17 }
 0x1bf   :  { %v184_v21 = vsel %vm181_vm15, %v183_v19, %v179_v20 }
 0x1c0   :  { %v187_v23 = vmul.f32 %v184_v21, %v145_v59 }
 0x1c2   :  { %v216_v24 = vpack.c.bf16 %v187_v23, %v186_v22 }
 0x1c4   :  { %217 = vst [vmem:[%s298_s5] sm:$0xff] %v216_v24  }

// kernel: pacl_clip_forward.49
= control target key start
LH: loop header
LB: loop body
LE: loop exit
PB: predicated region body
PF: predicated region fallthrough
CT: control target
= control target key end

     0   :  { %vm21_vm0 = vcmask 261120   ;;  %v194_v2 = vmov 0.0   ;;  %vm136_vm1 = vcmask 257024   ;;  %s263_s1 = inlined_call_operand.vmem [shape: bf16[128,32], index: 1, kind: input, shape index: {}]   ;;  %s264_s2 = inlined_call_operand.vmem [shape: f32[1,32], index: 2, kind: input, shape index: {}]   ;;  %s265_s0 = inlined_call_operand.vmem [shape: bf16[16,128], index: 0, kind: input, shape index: {}]   ;;  %s266_s3 = inlined_call_operand.vmem [shape: bf16[16,32], index: 3, kind: input, shape index: {}]   ;;  %s267_s4 = inlined_call_operand.vmem [shape: bf16[16,32], index: 4, kind: output, shape index: {}]  }
   0x1   :  { %v187_v0 = vld [vmem:[%s263_s1 + $0x38] sm:$0xff]  ;;  %v186_v1 = vld [vmem:[%s263_s1 + $0x30] sm:$0xff]  ;;  %22 = vst.msk [vmem:[#allocation2] sm:$0xff] %vm21_vm0, %v194_v2  ;;  %v185_v3 = vld [vmem:[%s263_s1 + $0x28] sm:$0xff] }
   0x2   :  { %98 = vmatpush.bf16.msra.mxu0 %v187_v0  ;;  %23 = vst.msk [vmem:[#allocation2 + $0x8] sm:$0xff] %vm21_vm0, %v194_v2  ;;  %v184_v4 = vld [vmem:[%s263_s1 + $0x20] sm:$0xff]  ;;  %v183_v5 = vld [vmem:[%s263_s1 + $0x18] sm:$0xff]  ;;  %v182_v6 = vld [vmem:[%s263_s1 + $0x10] sm:$0xff] }
   0x3   :  { %v181_v7 = vld [vmem:[%s263_s1 + $0x8] sm:$0xff]  ;;  %v180_v8 = vld [vmem:[%s263_s1] sm:$0xff] }
   0x4   :  { %v179_v9 = vld [vmem:[%s265_s0] sm:$0xff] }
   0x5   :  { %v189_v13 = vld [vmem:[%s266_s3] sm:$0xff]  }
   0x6   :  { %99 = vmatpush.bf16.msra.mxu0 %v186_v1  ;;  %v193_v15 = vld [vmem:[%s264_s2] ss:$0 sm:$0xff]  ;;  %v190_v17 = vunpack.c.l.bf16 %v189_v13  ;;  %v191_v23 = vunpack.c.h.bf16 %v189_v13 }
   0x8   :  { %v26_v10 = vld [vmem:[#allocation2] sm:$0xff] }
   0x9   :  { %v27_v14 = vld [vmem:[#allocation2 + $0x8] sm:$0xff] }
   0xa   :  { %100 = vmatpush.bf16.msra.mxu0 %v185_v3 }
   0xe   :  { %101 = vmatpush.bf16.msra.mxu0 %v184_v4 }
  0x12   :  { %102 = vmatpush.bf16.msra.mxu0 %v183_v5 }
  0x16   :  { %103 = vmatpush.bf16.msra.mxu0 %v182_v6 }
  0x1a   :  { %104 = vmatpush.bf16.msra.mxu0 %v181_v7 }
  0x1e   :  { %105 = vmatpush.bf16.msra.mxu0 %v180_v8 }
  0x21   :  { %106 = vmatmul.bf16.vlgmr.msra.gmra.mxu0 %v179_v9 }
  0x9e   :  { %v107_v11 = vpop.f32.mrf.mxu0 }
  0x9f   :  { %v112_v12 = vadd.f32 %v107_v11, %v26_v10 }
  0xa1   :  { %115 = vst.msk [vmem:[#allocation2] sm:$0xff] %vm21_vm0, %v112_v12 }
  0xa6   :  { %v109_v16 = vpop.f32.mrf.mxu0 }
  0xa7   :  { %v113_v18 = vadd.f32 %v109_v16, %v27_v14 }
  0xa8   :  { %v120_v19 = vld [vmem:[#allocation2] sm:$0xff] }
  0xa9   :  { %v126_v20 = vadd.f32 %v193_v15, %v120_v19  ;;  %116 = vst.msk [vmem:[#allocation2 + $0x8] sm:$0xff] %vm21_vm0, %v113_v18 }
  0xab   :  { %v132_v21 = vadd.f32 %v190_v17, %v126_v20 }
  0xad   :  { %v134_v22 = vpack.c.bf16 %v132_v21, %v132_v21 }
  0xaf   :  { %137 = vst.msk [vmem:[%s267_s4] sm:$0xf] %vm136_vm1, %v134_v22 }
  0xb0   :  { %v121_v24 = vld [vmem:[#allocation2 + $0x8] sm:$0xff] }
  0xb1   :  { %v127_v25 = vadd.f32 %v193_v15, %v121_v24 }
  0xb3   :  { %v133_v26 = vadd.f32 %v191_v23, %v127_v25 }
  0xb5   :  { %v135_v27 = vpack.c.bf16 %v133_v26, %v133_v26 }
  0xb7   :  { %138 = vst.msk [vmem:[%s267_s4 + $0x4] sm:$0xf] %vm136_vm1, %v135_v27 }

// kernel: pacl_clip_forward.55
= control target key start
LH: loop header
LB: loop body
LE: loop exit
PB: predicated region body
PF: predicated region fallthrough
CT: control target
= control target key end

     0   :  { %vm18_vm0 = vcmask 261120   ;;  %v104_v5 = vmov 32.0   ;;  %vm84_vm6 = vcmask 257024   ;;  %s144_s0 = inlined_call_operand.vmem [shape: bf16[16,32], index: 0, kind: input, shape index: {}]   ;;  %s145_s1 = inlined_call_operand.vmem [shape: f32[1,32], index: 1, kind: input, shape index: {}]   ;;  %s146_s2 = inlined_call_operand.vmem [shape: f32[1,32], index: 2, kind: input, shape index: {}]   ;;  %s147_s3 = inlined_call_operand.vmem [shape: bf16[16,32], index: 3, kind: output, shape index: {}]  }
   0x1   :  { %v92_v0 = vld [vmem:[%s144_s0] sm:$0xff]   ;;  %98 = vrcp.f32 %v104_v5 }
   0x2   :  { %v93_v1 = vunpack.c.l.bf16 %v92_v0  ;;  %v94_v3 = vunpack.c.h.bf16 %v92_v0  ;;  %v96_v36 = vld [vmem:[%s145_s1] ss:$0 sm:$0xff] }
   0x3   :  { %v97_v39 = vld [vmem:[%s146_s2] ss:$0 sm:$0xff] }
   0x4   :  { %v19_v2 = vsel %vm18_vm0, %v93_v1, 0.0  ;;  %v22_v4 = vsel %vm18_vm0, %v94_v3, 0.0 }
   0x5   :  { %20 = vadd.xlane.f32.xlu0 %v19_v2 }
   0x7   :  { %v99_v6 = vpop.eup %98 }
   0x8   :  { %v26_v7 = vmul.f32 32.0, %v99_v6  ;;  %vm30_vm1 = vweird.f32 %v99_v6 }
   0xa   :  { %v27_v8 = vsub.f32 1.0, %v26_v7 }
   0xc   :  { %v28_v9 = vmul.f32 %v99_v6, %v27_v8 }
   0xd   :  { %23 = vadd.xlane.f32.xlu0 %v22_v4 }
   0xe   :  { %v29_v10 = vadd.f32 %v99_v6, %v28_v9 }
  0x10   :  { %v31_v11 = vsel %vm30_vm1, %v99_v6, %v29_v10 }
  0x78   :  { %v21_v12 = vpop.xlane.xlu0 %20 }
  0x79   :  { %v32_v13 = vmul.f32 %v31_v11, %v21_v12 }
  0x7b   :  { %v34_v14 = vsub.f32 %v93_v1, %v32_v13 }
  0x7d   :  { %v36_v15 = vmul.f32 %v34_v14, %v34_v14 }
  0x7f   :  { %v38_v16 = vsel %vm18_vm0, %v36_v15, 0.0 }
  0x80   :  { %39 = vadd.xlane.f32.xlu1 %v38_v16  ;;  %v24_v17 = vpop.xlane.xlu0 %23 }
  0x81   :  { %v33_v18 = vmul.f32 %v31_v11, %v24_v17 }
  0x83   :  { %v35_v19 = vsub.f32 %v94_v3, %v33_v18 }
  0x85   :  { %v37_v20 = vmul.f32 %v35_v19, %v35_v19 }
  0x87   :  { %v41_v21 = vsel %vm18_vm0, %v37_v20, 0.0 }
  0x88   :  { %42 = vadd.xlane.f32.xlu1 %v41_v21 }
  0xf3   :  { %v40_v22 = vpop.xlane.xlu1 %39 }
  0xf4   :  { %v44_v23 = vmul.f32 %v40_v22, %v31_v11 }
  0xf6   :  { %v46_v24 = vadd.f32 1e-05, %v44_v23 }
  0xf8   :  { %100 = vrsqrt.f32 %v46_v24  ;;  %vm54_vm3 = vweird.f32 %v46_v24 }
  0xfb   :  { %v43_v25 = vpop.xlane.xlu1 %42 }
  0xfc   :  { %v45_v26 = vmul.f32 %v43_v25, %v31_v11 }
  0xfe   :  { %v101_v27 = vpop.eup %100  ;;  %v47_v28 = vadd.f32 1e-05, %v45_v26 }
  0xff   :  { %v49_v29 = vmul.f32 %v101_v27, %v46_v24  ;;  %vm55_vm2 = vweird.f32 %v101_v27 }
 0x100   :  { %102 = vrsqrt.f32 %v47_v28  ;;  %vm56_vm4 = vmor %vm54_vm3, %vm55_vm2  ;;  %vm64_vm7 = vweird.f32 %v47_v28 }
 0x101   :  { %v50_v30 = vmul.f32 %v101_v27, %v49_v29 }
 0x103   :  { %v51_v31 = vmul.f32 0.5, %v50_v30 }
 0x105   :  { %v52_v32 = vsub.f32 1.5, %v51_v31 }
 0x106   :  { %v103_v33 = vpop.eup %102 }
 0x107   :  { %v53_v34 = vmul.f32 %v101_v27, %v52_v32  ;;  %v59_v35 = vmul.f32 %v103_v33, %v47_v28  ;;  %vm65_vm5 = vweird.f32 %v103_v33 }
 0x108   :  { %vm66_vm8 = vmor %vm64_vm7, %vm65_vm5 }
 0x109   :  { %v57_v37 = vsel %vm56_vm4, %v101_v27, %v53_v34  ;;  %v60_v38 = vmul.f32 %v103_v33, %v59_v35 }
 0x10a   :  { %v68_v40 = vmul.f32 %v57_v37, %v34_v14 }
 0x10b   :  { %v61_v41 = vmul.f32 0.5, %v60_v38 }
 0x10c   :  { %v74_v42 = vmul.f32 %v96_v36, %v68_v40 }
 0x10d   :  { %v62_v43 = vsub.f32 1.5, %v61_v41 }
 0x10e   :  { %v80_v44 = vadd.f32 %v97_v39, %v74_v42 }
 0x10f   :  { %v63_v45 = vmul.f32 %v103_v33, %v62_v43 }
 0x110   :  { %v82_v46 = vpack.c.bf16 %v80_v44, %v80_v44 }
 0x111   :  { %v67_v47 = vsel %vm66_vm8, %v103_v33, %v63_v45 }
 0x112   :  { %85 = vst.msk [vmem:[%s147_s3] sm:$0xf] %vm84_vm6, %v82_v46  ;;  %v69_v48 = vmul.f32 %v67_v47, %v35_v19 }
 0x114   :  { %v75_v49 = vmul.f32 %v96_v36, %v69_v48 }
 0x116   :  { %v81_v50 = vadd.f32 %v97_v39, %v75_v49 }
 0x118   :  { %v83_v51 = vpack.c.bf16 %v81_v50, %v81_v50 }
 0x11a   :  { %86 = vst.msk [vmem:[%s147_s3 + $0x4] sm:$0xf] %vm84_vm6, %v83_v51 }

// kernel: pacl_clip_forward.56
= control target key start
LH: loop header
LB: loop body
LE: loop exit
PB: predicated region body
PF: predicated region fallthrough
CT: control target
= control target key end

     0   :  { %vm16_vm0 = vcmask 254976   ;;  %v77_v1 = vmov 0.0   ;;  %vm36_vm1 = vcmask 261120   ;;  %s108_s1 = inlined_call_operand.vmem [shape: bf16[32,32], index: 1, kind: input, shape index: {}]   ;;  %s109_s0 = inlined_call_operand.vmem [shape: bf16[2,32], index: 0, kind: input, shape index: {}]   ;;  %s110_s2 = inlined_call_operand.vmem [shape: f32[2,32], index: 2, kind: output, shape index: {}]  }
   0x1   :  { %v75_v0 = vld [vmem:[%s108_s1 + $0x8] sm:$0xff]  ;;  %17 = vst.msk [vmem:[#allocation2] sm:$0x3] %vm16_vm0, %v77_v1  ;;  %v74_v2 = vld [vmem:[%s108_s1] sm:$0xff] }
   0x2   :  { %46 = vmatpush.bf16.msra.mxu0 %v75_v0  ;;  %v18_v3 = vld [vmem:[%s109_s0] sm:$0x1] }
   0x6   :  { %47 = vmatpush.bf16.msra.mxu0 %v74_v2 }
   0x8   :  { %v19_v4 = vld [vmem:[#allocation2] sm:$0x3] }
   0x9   :  { %73 = vmatmul.msk.bf16.vlgmr.msra.gmra.mxu0 %vm36_vm1, %v18_v3 }
  0x86   :  { %v49_v5 = vpop.f32.mrf.mxu0 }
  0x87   :  { %v53_v6 = vadd.f32 %v49_v5, %v19_v4 }
  0x89   :  { %55 = vst.msk [vmem:[#allocation2] sm:$0x3] %vm16_vm0, %v53_v6 }
  0x8e   :  { %v51_v7 = vpop.f32.mrf.mxu0 }
  0x90   :  { %v59_v8 = vld [vmem:[#allocation2] sm:$0x3] }
  0x91   :  { %60 = vst.msk [vmem:[%s110_s2] sm:$0x3] %vm16_vm0, %v59_v8 }

// kernel: pacl_clip_forward.57
= control target key start
LH: loop header
LB: loop body
LE: loop exit
PB: predicated region body
PF: predicated region fallthrough
CT: control target
= control target key end

     0   :  { %s386_s0 = inlined_call_operand.vmem [shape: f32[2,4,32], index: 0, kind: input, shape index: {}]   ;;  %s387_s1 = inlined_call_operand.vmem [shape: f32[2,32], index: 1, kind: input, shape index: {}]   ;;  %s388_s2 = inlined_call_operand.hbm [shape: f32[2,2], index: 2, kind: output, shape index: {}]  }
   0x1   :  { %v338_v0 = vld [vmem:[%s386_s0] sm:$0xf] }
   0x2   :  { %v343_v1 = vld [vmem:[%s387_s1] sm:$0x3] }
   0x3   :  { %v17_v2 = vperm.slane %v343_v1, 0  ;;  %v16_v3 = vrot.slane %v343_v1, 1 }
   0x4   :  { %7 = vsyncpa [#allocation3], 0  ;;  %vm23_vm0 = vcmask 257024   ;;  %v351_v6 = vld [vmem:[%s386_s0 + $0x4] sm:$0xf]  ;;  %v32_v11 = vlaneseq  ;;  %vm36_vm1 = vcmask 1041409   ;;  %v187_v34 = vmul.f32 %v343_v1, %v343_v1 }
   0x5   :  { %v21_v4 = vmul.f32 %v17_v2, %v338_v0  ;;  %v18_v5 = vperm.slane %v16_v3, 0  ;;  %vm39_vm2 = vcmask 25600   ;;  %v318_v18 = vmov 0   ;;  %s319_s0 = smov [#allocation2]   ;;  %s258_s17 = sshll.u32 %s388_s2, 4  ;;  %s259_s17 = int_to_ptr.hbm [resolvable:$true] %s258_s17 }
   0x6   :  { %v33_v12 = vand.u32 127, %v32_v11  ;;  %272 = vset.pattern.permute.xlu2 %v318_v18  ;;  %271 = vset.pattern.permute.xlu1 %v318_v18  ;;  %vm136_vm3 = vcmask 254976   ;;  %s256_s1 = sshll.u32 %s319_s0, 4  ;;  %s257_s1 = int_to_ptr.vmem [resolvable:$true] %s256_s1 }
   0x7   :  { %v24_v7 = vsel %vm23_vm0, %v21_v4, 0.0  ;;  %v22_v8 = vmul.f32 %v18_v5, %v351_v6  ;;  %273 = vset.pattern.permute.xlu0 %v318_v18  ;;  %v188_v35 = vsel %vm136_vm3, %v187_v34, 0.0 }
   0x8   :  { %25 = vadd.xlane.f32.xlu0 %v24_v7 }
   0x9   :  { %v27_v9 = vsel %vm23_vm0, %v22_v8, 0.0 }
  0x10   :  { %28 = vadd.xlane.f32.xlu0 %v27_v9 }
  0x7b   :  { %v26_v10 = vpop.xlane.xlu0 %25 }
  0x7c   :  { %v34_v14 = vperm.slane %v26_v10, %v33_v12 }
  0x83   :  { %v29_v13 = vpop.xlane.xlu0 %28 }
  0x84   :  { %v35_v15 = vperm.slane %v29_v13, %v33_v12 }
  0x86   :  { %v37_v16 = vsel %vm36_vm1, %v35_v15, %v34_v14 }
  0x87   :  { %v40_v17 = vsel %vm39_vm2, %v37_v16, -inf }
  0x88   :  { %41 = vmax.xlane.f32.xlu1 %v40_v17 }
  0xfb   :  { %v42_v19 = vpop.xlane.xlu1 %41 }
  0xfc   :  { %v44_v20 = vperm.slane %v42_v19, 0  ;;  %v45_v21 = vperm.slane %v42_v19, 1 }
  0xfe   :  { %v48_v22 = vsub.f32 %v26_v10, %v44_v20  ;;  %v49_v23 = vsub.f32 %v29_v13, %v45_v21 }
 0x100   :  { %v50_v24 = vmul.f32 1.442695, %v48_v22  ;;  %v52_v25 = vmul.f32 1.442695, %v49_v23 }
 0x102   :  { %274 = vpow2.f32 %v50_v24 }
 0x103   :  { %276 = vpow2.f32 %v52_v25 }
 0x108   :  { %v275_v26 = vpop.eup %274 }
 0x109   :  { %v277_v27 = vpop.eup %276  ;;  %57 = vperm.xlu1 %271, %v275_v26  }
 0x10a   :  { %60 = vperm.xlu2 %272, %v277_v27  }
 0x164   :  { %v61_v28 = vpop.permute.xlu2 %60 }
 0x165   :  { %v63_v30 = vperm.slane %v61_v28, %v33_v12 }
 0x17b   :  { %v58_v29 = vpop.permute.xlu1 %57 }
 0x17c   :  { %v62_v31 = vperm.slane %v58_v29, %v33_v12 }
 0x17e   :  { %v64_v32 = vsel %vm36_vm1, %v63_v30, %v62_v31 }
 0x17f   :  { %v66_v33 = vsel %vm39_vm2, %v64_v32, 0.0 }
 0x180   :  { %67 = vadd.xlane.f32.xlu2 %v66_v33 }
 0x188   :  { %189 = vadd.xlane.f32.xlu2 %v188_v35 }
 0x1f3   :  { %v68_v36 = vpop.xlane.xlu2 %67 }
 0x1f4   :  { %v70_v37 = vperm.slane %v68_v36, 0  ;;  %v71_v38 = vperm.slane %v68_v36, 1 }
 0x1f6   :  { %278 = vrcp.f32 %v70_v37  ;;  %v85_v45 = vand.u32 2147483648, %v70_v37  ;;  %v100_v46 = vand.u32 2147483648, %v71_v38  ;;  %v83_v48 = vand.u32 2147483647, %v70_v37 }
 0x1f7   :  { %280 = vrcp.f32 %v71_v38  ;;  %v98_v50 = vand.u32 2147483647, %v71_v38  ;;  %vm79_vm6 = vweird.f32 %v70_v37  ;;  %vm94_vm7 = vweird.f32 %v71_v38 }
 0x1f8   :  { %v86_v53 = vor.u32 1.1754944e-38, %v85_v45  ;;  %v101_v54 = vor.u32 1.1754944e-38, %v100_v46  ;;  %vm84_vm10 = vcmp.eq.f32.partialorder %v83_v48, 8.507059e+37 }
 0x1f9   :  { %vm99_vm11 = vcmp.eq.f32.partialorder %v98_v50, 8.507059e+37 }
 0x1fb   :  { %v190_v20 = vpop.xlane.xlu2 %189 }
 0x1fc   :  { %v279_v39 = vpop.eup %278  ;;  %282 = vrsqrt.f32 %v190_v20  ;;  %vm198_vm12 = vcmp.eq.f32.partialorder %v190_v20, inf  ;;  %v201_v28 = vand.u32 2147483648, %v190_v20  ;;  %vm200_vm13 = vcmp.eq.f32.partialorder %v190_v20, 0.0 }
 0x1fd   :  { %v281_v40 = vpop.eup %280  ;;  %v75_v41 = vmul.f32 %v279_v39, %v70_v37  ;;  %vm80_vm4 = vweird.f32 %v279_v39 }
 0x1fe   :  { %v90_v42 = vmul.f32 %v281_v40, %v71_v38  ;;  %vm95_vm5 = vweird.f32 %v281_v40  ;;  %vm81_vm8 = vmor %vm79_vm6, %vm80_vm4 }
 0x1ff   :  { %v76_v43 = vsub.f32 1.0, %v75_v41  ;;  %vm96_vm9 = vmor %vm94_vm7, %vm95_vm5 }
 0x200   :  { %v91_v44 = vsub.f32 1.0, %v90_v42 }
 0x201   :  { %v77_v47 = vmul.f32 %v279_v39, %v76_v43 }
 0x202   :  { %v92_v49 = vmul.f32 %v281_v40, %v91_v44  ;;  %v283_v21 = vpop.eup %282 }
 0x203   :  { %v78_v51 = vadd.f32 %v279_v39, %v77_v47  ;;  %v192_v22 = vmul.f32 %v283_v21, %v190_v20 }
 0x204   :  { %v93_v52 = vadd.f32 %v281_v40, %v92_v49 }
 0x205   :  { %v82_v55 = vsel %vm81_vm8, %v279_v39, %v78_v51  ;;  %v193_v23 = vmul.f32 %v283_v21, %v192_v22 }
 0x206   :  { %v97_v56 = vsel %vm96_vm9, %v281_v40, %v93_v52  ;;  %v87_v57 = vsel %vm84_vm10, %v86_v53, %v82_v55 }
 0x207   :  { %v102_v58 = vsel %vm99_vm11, %v101_v54, %v97_v56  ;;  %v88_v59 = vmul.f32 %v275_v26, %v87_v57  ;;  %v194_v24 = vmul.f32 0.5, %v193_v23 }
 0x208   :  { %v103_v60 = vmul.f32 %v277_v27, %v102_v58 }
 0x209   :  { %106 = vperm.xlu0 %273, %v88_v59   ;;  %v195_v25 = vsub.f32 1.5, %v194_v24 }
 0x20a   :  { %111 = vperm.xlu1 %271, %v103_v60  }
 0x20b   :  { %v196_v26 = vmul.f32 %v283_v21, %v195_v25 }
 0x20d   :  { %v197_v27 = vmul.f32 %v196_v26, %v190_v20 }
 0x20f   :  { %v199_v29 = vsel %vm198_vm12, %v190_v20, %v197_v27 }
 0x210   :  { %v202_v30 = vsel %vm200_vm13, %v201_v28, %v199_v29 }
 0x211   :  { %v203_v31 = vmax.f32 %v202_v30, 1e-08 }
 0x213   :  { %284 = vrcp.f32 %v203_v31  ;;  %v215_v36 = vand.u32 2147483648, %v203_v31  ;;  %vm209_vm14 = vweird.f32 %v203_v31  ;;  %v213_v38 = vand.u32 2147483647, %v203_v31 }
 0x215   :  { %v216_v39 = vor.u32 1.1754944e-38, %v215_v36  ;;  %vm214_vm2 = vcmp.eq.f32.partialorder %v213_v38, 8.507059e+37 }
 0x219   :  { %v285_v32 = vpop.eup %284 }
 0x21a   :  { %v205_v33 = vmul.f32 %v285_v32, %v203_v31  ;;  %vm210_vm15 = vweird.f32 %v285_v32 }
 0x21c   :  { %v206_v34 = vsub.f32 1.0, %v205_v33 }
 0x21e   :  { %v207_v35 = vmul.f32 %v285_v32, %v206_v34 }
 0x220   :  { %v208_v37 = vadd.f32 %v285_v32, %v207_v35 }
 0x27b   :  { %v107_v61 = vpop.permute.xlu0 %106 }
 0x27c   :  { %v112_v62 = vpop.permute.xlu1 %111  ;;  %v114_v63 = vmul.f32 %v107_v61, %v338_v0 }
 0x27d   :  { %v115_v2 = vmul.f32 %v112_v62, %v351_v6 }
 0x27e   :  { %v116_v3 = vsel %vm23_vm0, %v114_v63, 0.0 }
 0x27f   :  { %v123_v4 = vsel %vm23_vm0, %v115_v2, 0.0  ;;  %v117_v5 = vrot.slane %v116_v3, 4  ;;  %vm211_vm0 = vmor %vm209_vm14, %vm210_vm15  ;;  %vm249_vm14 = vcmask 9216  }
 0x280   :  { %v124_v7 = vrot.slane %v123_v4, 4  ;;  %v212_v40 = vsel %vm211_vm0, %v285_v32, %v208_v37 }
 0x281   :  { %v118_v8 = vadd.f32 %v117_v5, %v116_v3  ;;  %v217_v41 = vsel %vm214_vm2, %v216_v39, %v212_v40 }
 0x282   :  { %v125_v9 = vadd.f32 %v124_v7, %v123_v4  ;;  %v218_v42 = vmul.f32 %v217_v41, %v343_v1 }
 0x283   :  { %v119_v10 = vrot.slane %v118_v8, 2 }
 0x284   :  { %v126_v11 = vrot.slane %v125_v9, 2 }
 0x285   :  { %v120_v12 = vadd.f32 %v119_v10, %v118_v8 }
 0x286   :  { %v127_v13 = vadd.f32 %v126_v11, %v125_v9 }
 0x287   :  { %v121_v14 = vrot.slane %v120_v12, 1 }
 0x288   :  { %v128_v15 = vrot.slane %v127_v13, 1 }
 0x289   :  { %v367_v16 = vadd.f32 %v121_v14, %v120_v12 }
 0x28a   :  { %v369_v17 = vadd.f32 %v128_v15, %v127_v13 }
 0x28b   :  { %v130_v0 = vmul.f32 %v367_v16, %v367_v16 }
 0x28c   :  { %v131_v6 = vmul.f32 %v369_v17, %v369_v17 }
 0x28e   :  { %v134_v18 = vsel %vm36_vm1, %v131_v6, %v130_v0 }
 0x28f   :  { %v137_v19 = vsel %vm136_vm3, %v134_v18, 0.0  ;;  %vm223_vm3 = vcmask 261120  }
 0x290   :  { %138 = vadd.xlane.f32.xlu1 %v137_v19  ;;  %267 = vmatpush.xpose.msk.msra.mxu0 %vm223_vm3, %v218_v42 }
 0x303   :  { %v139_v43 = vpop.xlane.xlu1 %138 }
 0x304   :  { %286 = vrsqrt.f32 %v139_v43  ;;  %vm147_vm4 = vcmp.eq.f32.partialorder %v139_v43, inf  ;;  %v150_v51 = vand.u32 2147483648, %v139_v43  ;;  %vm149_vm5 = vcmp.eq.f32.partialorder %v139_v43, 0.0 }
 0x30a   :  { %v287_v44 = vpop.eup %286 }
 0x30b   :  { %v141_v45 = vmul.f32 %v287_v44, %v139_v43 }
 0x30d   :  { %v142_v46 = vmul.f32 %v287_v44, %v141_v45 }
 0x30f   :  { %v143_v47 = vmul.f32 0.5, %v142_v46 }
 0x311   :  { %v144_v48 = vsub.f32 1.5, %v143_v47 }
 0x313   :  { %v145_v49 = vmul.f32 %v287_v44, %v144_v48 }
 0x315   :  { %v146_v50 = vmul.f32 %v145_v49, %v139_v43 }
 0x317   :  { %v148_v52 = vsel %vm147_vm4, %v139_v43, %v146_v50 }
 0x318   :  { %v151_v53 = vsel %vm149_vm5, %v150_v51, %v148_v52 }
 0x319   :  { %v152_v54 = vmax.f32 %v151_v53, 1e-08 }
 0x31b   :  { %288 = vrcp.f32 %v152_v54  ;;  %v154_v1 = vrot.slane %v152_v54, 1  ;;  %vm162_vm7 = vweird.f32 %v152_v54  ;;  %v166_v62 = vand.u32 2147483647, %v152_v54 }
 0x31c   :  { %v168_v63 = vand.u32 2147483648, %v152_v54 }
 0x31d   :  { %290 = vrcp.f32 %v154_v1  ;;  %v183_v2 = vand.u32 2147483648, %v154_v1  ;;  %v181_v5 = vand.u32 2147483647, %v154_v1  ;;  %vm177_vm10 = vweird.f32 %v154_v1 }
 0x31e   :  { %v169_v9 = vor.u32 1.1754944e-38, %v168_v63  ;;  %vm167_vm12 = vcmp.eq.f32.partialorder %v166_v62, 8.507059e+37 }
 0x31f   :  { %v184_v10 = vor.u32 1.1754944e-38, %v183_v2  ;;  %vm182_vm13 = vcmp.eq.f32.partialorder %v181_v5, 8.507059e+37 }
 0x321   :  { %v289_v55 = vpop.eup %288 }
 0x322   :  { %v158_v56 = vmul.f32 %v289_v55, %v152_v54  ;;  %vm163_vm6 = vweird.f32 %v289_v55 }
 0x323   :  { %v291_v57 = vpop.eup %290  ;;  %vm164_vm9 = vmor %vm162_vm7, %vm163_vm6 }
 0x324   :  { %v159_v58 = vsub.f32 1.0, %v158_v56  ;;  %v173_v59 = vmul.f32 %v291_v57, %v154_v1  ;;  %vm178_vm8 = vweird.f32 %v291_v57 }
 0x325   :  { %vm179_vm11 = vmor %vm177_vm10, %vm178_vm8 }
 0x326   :  { %v160_v60 = vmul.f32 %v289_v55, %v159_v58  ;;  %v174_v61 = vsub.f32 1.0, %v173_v59 }
 0x328   :  { %v161_v3 = vadd.f32 %v289_v55, %v160_v60  ;;  %v175_v4 = vmul.f32 %v291_v57, %v174_v61 }
 0x32a   :  { %v165_v7 = vsel %vm164_vm9, %v289_v55, %v161_v3  ;;  %v176_v8 = vadd.f32 %v291_v57, %v175_v4 }
 0x32b   :  { %v170_v12 = vsel %vm167_vm12, %v169_v9, %v165_v7 }
 0x32c   :  { %v180_v11 = vsel %vm179_vm11, %v291_v57, %v176_v8  ;;  %v171_v15 = vmul.f32 %v170_v12, %v367_v16 }
 0x32d   :  { %v185_v13 = vsel %vm182_vm13, %v184_v10, %v180_v11 }
 0x32e   :  { %v186_v14 = vmul.f32 %v185_v13, %v369_v17 }
 0x330   :  { %v221_v0 = vrot.slane %v186_v14, 7 }
 0x332   :  { %v222_v6 = vsel %vm36_vm1, %v221_v0, %v171_v15 }
 0x333   :  { %268 = vmatmul.msk.f32.vlgmr.msra.gmra.mxu0 %vm223_vm3, %v222_v6 }
 0x3b0   :  { %v246_v18 = vpop.f32.mrf.mxu0 }
 0x3b1   :  { %250 = vst.msk [vmem:[#allocation2] sm:$0x3] %vm249_vm14, %v246_v18 }
 0x3b2   :  { %261 = dma.vmem_to_hbm [thread:$0]  %s257_s1, 32, %s259_s17, [#allocation3]  }
 0x3b3   :  { %316 = dma.done.wait [#allocation3], 32  }
 0x3b4   :  { %317 = vsyncadd [#allocation3], 4294967264 }
 0x3b5   :  { %266 = vsyncpa [#allocation3], 1 }

</bundles_post_ra>
